<compile_context>
chip_gen: v5e
topology: v5e:2x2
jax: 0.10.0
libtpu: 0.0.40
codegen_flags: <defaults>
</compile_context>

<pallas_src>
import functools

import numpy as np

import jax
import jax.numpy as jnp
from jax.experimental import pallas as pl
from jax.experimental.pallas import tpu as pltpu


# ----------------------------- Pallas kernels ------------------------------

def _gemm_bias_kernel(w_ref, x_ref, b_ref, o_ref, *, relu):
    # (Cout, K) @ (K, tm) -> (Cout, tm), + per-channel bias, optional ReLU.
    acc = jnp.dot(w_ref[...], x_ref[...], preferred_element_type=jnp.float32)
    acc = acc + b_ref[...]
    if relu:
        acc = jnp.maximum(acc, 0.0)
    o_ref[...] = acc.astype(o_ref.dtype)


def _gemm_bias_res_kernel(w_ref, x_ref, b_ref, r_ref, o_ref):
    # conv2 + bn2 + identity-shortcut add + relu
    acc = jnp.dot(w_ref[...], x_ref[...], preferred_element_type=jnp.float32)
    acc = acc + b_ref[...] + r_ref[...].astype(jnp.float32)
    o_ref[...] = jnp.maximum(acc, 0.0).astype(o_ref.dtype)


def _gemm_bias_down_kernel(w_ref, x_ref, b_ref, wd_ref, xd_ref, o_ref):
    # conv2 + bn2 + (1x1 downsample conv + bn) + relu, fused in one kernel.
    acc = jnp.dot(w_ref[...], x_ref[...], preferred_element_type=jnp.float32)
    acc = acc + jnp.dot(wd_ref[...], xd_ref[...],
                        preferred_element_type=jnp.float32)
    acc = acc + b_ref[...]
    o_ref[...] = jnp.maximum(acc, 0.0).astype(o_ref.dtype)


def _max9_kernel(*refs):
    # 9 lane-dense taps -> elementwise max.
    o_ref = refs[-1]
    m = refs[0][...]
    for r in refs[1:-1]:
        m = jnp.maximum(m, r[...])
    o_ref[...] = m


# ------------------------------- glue / calls ------------------------------

def _round_up(a, b):
    return (a + b - 1) // b * b


def _pick_tile(mp):
    # Prefer larger lane tiles, but keep >=2 grid steps when possible so the
    # "parallel" axis can shard across v7x's 2 TensorCores.
    for tm in (512, 256):
        if mp % tm == 0 and mp // tm >= 2:
            return tm
    return 128


def gemm_tn(wT, pT, bias, *, relu=True, residual=None, down=None):
    """Lane-transposed fused GEMM.

    wT:   (Cout, K)  bf16, BN scale already folded in
    pT:   (K, M)     bf16, transposed im2col patches
    bias: (Cout,)    f32
    residual: (Cout, M) bf16 identity shortcut (added before ReLU)
    down: (wdT (Cout, Cd) bf16, xdT (Cd, M) bf16) fused 1x1 downsample
    returns (Cout, M) bf16
    """
    Cout, K = wT.shape
    M = pT.shape[1]
    Mp = _round_up(M, 128)
    tm = _pick_tile(Mp)
    Mp = _round_up(Mp, tm)

    def pad_m(a):
        return a if a.shape[1] == Mp else jnp.pad(a, ((0, 0), (0, Mp - a.shape[1])))

    pT = pad_m(pT)
    bias2 = bias.reshape(Cout, 1).astype(jnp.float32)

    in_specs = [
        pl.BlockSpec((Cout, K), lambda i: (0, 0)),
        pl.BlockSpec((K, tm), lambda i: (0, i)),
        pl.BlockSpec((Cout, 1), lambda i: (0, 0)),
    ]
    args = [wT, pT, bias2]

    if residual is not None:
        in_specs.append(pl.BlockSpec((Cout, tm), lambda i: (0, i)))
        args.append(pad_m(residual))
        kernel = _gemm_bias_res_kernel
    elif down is not None:
        wdT, xdT = down
        Cd = wdT.shape[1]
        in_specs += [pl.BlockSpec((Cout, Cd), lambda i: (0, 0)),
                     pl.BlockSpec((Cd, tm), lambda i: (0, i))]
        args += [wdT, pad_m(xdT)]
        kernel = _gemm_bias_down_kernel
    else:
        kernel = functools.partial(_gemm_bias_kernel, relu=relu)

    out = pl.pallas_call(
        kernel,
        out_shape=jax.ShapeDtypeStruct((Cout, Mp), jnp.bfloat16),
        grid=(Mp // tm,),
        in_specs=in_specs,
        out_specs=pl.BlockSpec((Cout, tm), lambda i: (0, i)),
        compiler_params=pltpu.CompilerParams(
            dimension_semantics=("parallel",)),
    )(*args)
    return out[:, :M]


def im2colT(x, ks, stride, pad):
    """x: (C, N, H, W) -> transposed patches (ks*ks*C, N*Ho*Wo), plus dims.

    Only pads / strided-slices / reshapes in the channel-leading layout, so no
    XLA transposes are needed and the GEMM input is already (K, M)."""
    C, N, H, W = x.shape
    if pad:
        x = jnp.pad(x, ((0, 0), (0, 0), (pad, pad), (pad, pad)))
    Ho = (H + 2 * pad - ks) // stride + 1
    Wo = (W + 2 * pad - ks) // stride + 1
    taps = []
    for kh in range(ks):
        for kw in range(ks):
            taps.append(jax.lax.slice(
                x, (0, 0, kh, kw),
                (C, N, kh + stride * (Ho - 1) + 1, kw + stride * (Wo - 1) + 1),
                (1, 1, stride, stride)).reshape(C, N * Ho * Wo))
    pT = jnp.concatenate(taps, axis=0) if len(taps) > 1 else taps[0]
    return pT, (N, Ho, Wo)


def conv_bn(x, wT, bias, *, ks, stride, relu=True):
    """x: (Cin, N, H, W) bf16; wT: (Cout, ks*ks*Cin) bf16 (BN folded)."""
    pT, (N, Ho, Wo) = im2colT(x, ks, stride, (ks - 1) // 2)
    out = gemm_tn(wT, pT, bias, relu=relu)
    return out.reshape(wT.shape[0], N, Ho, Wo)


def maxpool3x3s2(x):
    """nn.MaxPool2d(kernel_size=3, stride=2, padding=1) on (C, N, H, W)."""
    C, N, H, W = x.shape
    ks, stride, pad = 3, 2, 1
    xp = jnp.pad(x, ((0, 0), (0, 0), (pad, pad), (pad, pad)),
                 constant_values=-jnp.inf)
    Ho = (H + 2 * pad - ks) // stride + 1
    Wo = (W + 2 * pad - ks) // stride + 1
    taps = []
    for kh in range(ks):
        for kw in range(ks):
            taps.append(jax.lax.slice(
                xp, (0, 0, kh, kw),
                (C, N, kh + stride * (Ho - 1) + 1, kw + stride * (Wo - 1) + 1),
                (1, 1, stride, stride)).reshape(-1))
    L = C * N * Ho * Wo
    lanes = 128
    rows = _round_up(L, lanes) // lanes
    tr = min(256, _round_up(rows, 8))
    rows_p = _round_up(rows, tr)
    Lp = rows_p * lanes
    taps2d = [jnp.pad(t, (0, Lp - L)).reshape(rows_p, lanes) for t in taps]

    out = pl.pallas_call(
        _max9_kernel,
        out_shape=jax.ShapeDtypeStruct((rows_p, lanes), x.dtype),
        grid=(rows_p // tr,),
        in_specs=[pl.BlockSpec((tr, lanes), lambda i: (i, 0))
                  for _ in range(ks * ks)],
        out_specs=pl.BlockSpec((tr, lanes), lambda i: (i, 0)),
        compiler_params=pltpu.CompilerParams(
            dimension_semantics=("parallel",)),
    )(*taps2d)
    return out.reshape(-1)[:L].reshape(C, N, Ho, Wo)


def basic_block(x, bp):
    """BasicBlock: relu(bn2(conv2(relu(bn1(conv1(x))))) + shortcut(x))."""
    stride = bp['stride']
    w1T, b1 = bp['conv1']
    w2T, b2 = bp['conv2']
    out1 = conv_bn(x, w1T, b1, ks=3, stride=stride, relu=True)
    p2T, (N, Ho, Wo) = im2colT(out1, 3, 1, 1)
    if bp['down'] is not None:
        # fuse 1x1 downsample conv+bn with conv2+bn2+add+relu in one kernel
        wdT, bd = bp['down']
        xdT = x[:, :, ::stride, ::stride].reshape(x.shape[0], -1)
        out = gemm_tn(w2T, p2T, b2 + bd, down=(wdT, xdT))
    else:
        res = x.reshape(x.shape[0], -1)
        out = gemm_tn(w2T, p2T, b2, residual=res)
    return out.reshape(w2T.shape[0], N, Ho, Wo)


# ------------------------------- parameters --------------------------------

class KeyGen:
    def __init__(self, key):
        self.key = key

    def __call__(self):
        self.key, sub = jax.random.split(self.key)
        return sub


def init_conv(key, ks, cin, cout):
    fan_in = ks * ks * cin
    return jax.random.normal(key, (ks, ks, cin, cout), jnp.float32) / np.sqrt(fan_in)


def init_bn(key, c, eps=1e-5):
    k1, k2, k3, k4 = jax.random.split(key, 4)
    gamma = 1.0 + 0.1 * jax.random.normal(k1, (c,), jnp.float32)
    beta = 0.1 * jax.random.normal(k2, (c,), jnp.float32)
    mean = 0.1 * jax.random.normal(k3, (c,), jnp.float32)
    var = 1.0 + 0.1 * jnp.abs(jax.random.normal(k4, (c,), jnp.float32))
    scale = gamma / jnp.sqrt(var + eps)       # inference-mode BN fold
    bias = beta - mean * scale
    return scale, bias


def conv_bn_params(kg, ks, cin, cout):
    w = init_conv(kg(), ks, cin, cout)                    # HWIO
    scale, bias = init_bn(kg(), cout)
    w_mat = w.reshape(ks * ks * cin, cout) * scale[None, :]   # fold BN scale
    wT = jnp.asarray(w_mat.T, jnp.bfloat16)               # (Cout, K) bf16
    return wT, bias.astype(jnp.float32)


def make_params(key):
    """Scaled-down deep-stem ResNet-18: stem 3->8->8->16, layers [2,2,2,2]."""
    kg = KeyGen(key)
    p = {}
    c1, c2, c3 = 8, 8, 16
    p['stem1'] = conv_bn_params(kg, 3, 3, c1)    # conv1 (stride 2) + bn1
    p['stem2'] = conv_bn_params(kg, 3, c1, c2)   # conv2 + bn2
    p['stem3'] = conv_bn_params(kg, 3, c2, c3)   # conv3 + bn3
    inplanes = c3
    layer_cfg = [('layer1', 8, 1, 2), ('layer2', 16, 2, 2),
                 ('layer3', 32, 2, 2), ('layer4', 64, 2, 2)]
    for name, planes, stride, nblocks in layer_cfg:
        blocks = []
        for bi in range(nblocks):
            s = stride if bi == 0 else 1
            bp = {
                'stride': s,
                'conv1': conv_bn_params(kg, 3, inplanes, planes),
                'conv2': conv_bn_params(kg, 3, planes, planes),
            }
            if s != 1 or inplanes != planes:
                bp['down'] = conv_bn_params(kg, 1, inplanes, planes)
            else:
                bp['down'] = None
            blocks.append(bp)
            inplanes = planes
        p[name] = blocks
    return p


# -------------------------------- forward ----------------------------------

def resnet_forward(params, x_nchw, return_feature_maps=False):
    # NCHW -> channel-leading (C, N, H, W) bf16 working layout
    x = jnp.transpose(x_nchw, (1, 0, 2, 3)).astype(jnp.bfloat16)
    x = conv_bn(x, *params['stem1'], ks=3, stride=2)     # relu1(bn1(conv1))
    x = conv_bn(x, *params['stem2'], ks=3, stride=1)     # relu2(bn2(conv2))
    x = conv_bn(x, *params['stem3'], ks=3, stride=1)     # relu3(bn3(conv3))
    x = maxpool3x3s2(x)                                   # maxpool
    conv_out = []
    for name in ('layer1', 'layer2', 'layer3', 'layer4'):
        for bp in params[name]:
            x = basic_block(x, bp)
        conv_out.append(jnp.transpose(x, (1, 0, 2, 3)).astype(jnp.float32))
    if return_feature_maps:
        return conv_out
    return [conv_out[-1]]


if __name__ == "__main__":
    key = jax.random.PRNGKey(0)
    pkey, xkey = jax.random.split(key)
    params = make_params(pkey)
    x = jax.random.normal(xkey, (2, 3, 32, 32), jnp.float32)

    fwd_last = jax.jit(lambda inp: resnet_forward(params, inp))
    fwd_all = jax.jit(lambda inp: resnet_forward(params, inp,
                                                 return_feature_maps=True))

    out = jax.block_until_ready(fwd_last(x))
    assert out[0].shape == (2, 64, 1, 1), out[0].shape

    feats = jax.block_until_ready(fwd_all(x))
    assert [tuple(f.shape) for f in feats] == [
        (2, 8, 8, 8), (2, 16, 4, 4), (2, 32, 2, 2), (2, 64, 1, 1)
    ], [f.shape for f in feats]
    assert all(bool(jnp.isfinite(f).all()) for f in feats)

    print("KERNEL_OK")
</pallas_src>

<mosaic_0001>
module attributes {stable_mosaic.version = 11 : i64} {
  func.func @_gemm_bias_kernel(%arg0: i32, %arg1: memref<8x27xbf16, #tpu.memory_space<vmem>>, %arg2: memref<27x256xbf16, #tpu.memory_space<vmem>>, %arg3: memref<8x1xf32, #tpu.memory_space<vmem>>, %arg4: memref<8x256xbf16, #tpu.memory_space<vmem>>) attributes {dimension_semantics = [#tpu.dimension_semantics<parallel>], iteration_bounds = array<i64: 2>, scalar_prefetch = 0 : i64, scratch_operands = 0 : i64, tpu.core_type = #tpu.core_type<tc>, window_params = [{pipeline_mode = #tpu.pipeline_mode<synchronous>, transform_indices = @transform_0, window_bounds = array<i64: 8, 27>}, {transform_indices = @transform_1, window_bounds = array<i64: 27, 256>}, {pipeline_mode = #tpu.pipeline_mode<synchronous>, transform_indices = @transform_2, window_bounds = array<i64: 8, 1>}, {transform_indices = @transform_3, window_bounds = array<i64: 8, 256>}]} {
    %c0 = arith.constant 0 : index
    %c0_0 = arith.constant 0 : index
    %0 = vector.load %arg1[%c0, %c0_0] : memref<8x27xbf16, #tpu.memory_space<vmem>>, vector<8x27xbf16>
    %c0_1 = arith.constant 0 : index
    %c0_2 = arith.constant 0 : index
    %1 = vector.load %arg2[%c0_1, %c0_2] : memref<27x256xbf16, #tpu.memory_space<vmem>>, vector<27x256xbf16>
    %cst = arith.constant dense<0.000000e+00> : vector<8x256xf32>
    %2 = tpu.matmul %0, %1, %cst {dimension_numbers = #tpu.dot_dimension_numbers<[1], [0], [0], [1], [0, 0, 1, 1], [], []>} : vector<8x27xbf16>, vector<27x256xbf16>, vector<8x256xf32> -> vector<8x256xf32>
    %c0_3 = arith.constant 0 : index
    %c0_4 = arith.constant 0 : index
    %3 = vector.load %arg3[%c0_3, %c0_4] : memref<8x1xf32, #tpu.memory_space<vmem>>, vector<8x1xf32>
    %4 = vector.broadcast %3 : vector<8x1xf32> to vector<8x256xf32>
    %5 = arith.addf %2, %4 : vector<8x256xf32>
    %cst_5 = arith.constant 0.000000e+00 : f32
    %6 = vector.broadcast %cst_5 : f32 to vector<8x256xf32>
    %7 = arith.maximumf %5, %6 : vector<8x256xf32>
    %8 = arith.truncf %7 : vector<8x256xf32> to vector<8x256xbf16>
    %c0_6 = arith.constant 0 : index
    %c0_7 = arith.constant 0 : index
    %9 = vector.load %arg4[%c0_6, %c0_7] : memref<8x256xbf16, #tpu.memory_space<vmem>>, vector<8x256xbf16>
    tpu.vector_store %arg4[%c0_6, %c0_7], %8 {strides = array<i32>} : memref<8x256xbf16, #tpu.memory_space<vmem>>, vector<8x256xbf16>,
    return
  }
  func.func @transform_0(%arg0: i32) -> (i32, i32) {
    %c0_i32 = arith.constant 0 : i32
    %c0_i32_0 = arith.constant 0 : i32
    %c0_i32_1 = arith.constant 0 : i32
    return %c0_i32, %c0_i32_0 : i32, i32
  }
  func.func @transform_1(%arg0: i32) -> (i32, i32) {
    %c0_i32 = arith.constant 0 : i32
    %c0_i32_0 = arith.constant 0 : i32
    return %c0_i32, %arg0 : i32, i32
  }
  func.func @transform_2(%arg0: i32) -> (i32, i32) {
    %c0_i32 = arith.constant 0 : i32
    %c0_i32_0 = arith.constant 0 : i32
    %c0_i32_1 = arith.constant 0 : i32
    return %c0_i32, %c0_i32_0 : i32, i32
  }
  func.func @transform_3(%arg0: i32) -> (i32, i32) {
    %c0_i32 = arith.constant 0 : i32
    %c0_i32_0 = arith.constant 0 : i32
    return %c0_i32, %arg0 : i32, i32
  }
}

module attributes {stable_mosaic.version = 11 : i64} {
  func.func @_gemm_bias_kernel(%arg0: i32, %arg1: memref<16x72xbf16, #tpu.memory_space<vmem>>, %arg2: memref<72x256xbf16, #tpu.memory_space<vmem>>, %arg3: memref<16x1xf32, #tpu.memory_space<vmem>>, %arg4: memref<16x256xbf16, #tpu.memory_space<vmem>>) attributes {dimension_semantics = [#tpu.dimension_semantics<parallel>], iteration_bounds = array<i64: 2>, scalar_prefetch = 0 : i64, scratch_operands = 0 : i64, tpu.core_type = #tpu.core_type<tc>, window_params = [{pipeline_mode = #tpu.pipeline_mode<synchronous>, transform_indices = @transform_0, window_bounds = array<i64: 16, 72>}, {transform_indices = @transform_1, window_bounds = array<i64: 72, 256>}, {pipeline_mode = #tpu.pipeline_mode<synchronous>, transform_indices = @transform_2, window_bounds = array<i64: 16, 1>}, {transform_indices = @transform_3, window_bounds = array<i64: 16, 256>}]} {
    %c0 = arith.constant 0 : index
    %c0_0 = arith.constant 0 : index
    %0 = vector.load %arg1[%c0, %c0_0] : memref<16x72xbf16, #tpu.memory_space<vmem>>, vector<16x72xbf16>
    %c0_1 = arith.constant 0 : index
    %c0_2 = arith.constant 0 : index
    %1 = vector.load %arg2[%c0_1, %c0_2] : memref<72x256xbf16, #tpu.memory_space<vmem>>, vector<72x256xbf16>
    %cst = arith.constant dense<0.000000e+00> : vector<16x256xf32>
    %2 = tpu.matmul %0, %1, %cst {dimension_numbers = #tpu.dot_dimension_numbers<[1], [0], [0], [1], [0, 0, 1, 1], [], []>} : vector<16x72xbf16>, vector<72x256xbf16>, vector<16x256xf32> -> vector<16x256xf32>
    %c0_3 = arith.constant 0 : index
    %c0_4 = arith.constant 0 : index
    %3 = vector.load %arg3[%c0_3, %c0_4] : memref<16x1xf32, #tpu.memory_space<vmem>>, vector<16x1xf32>
    %4 = vector.broadcast %3 : vector<16x1xf32> to vector<16x256xf32>
    %5 = arith.addf %2, %4 : vector<16x256xf32>
    %cst_5 = arith.constant 0.000000e+00 : f32
    %6 = vector.broadcast %cst_5 : f32 to vector<16x256xf32>
    %7 = arith.maximumf %5, %6 : vector<16x256xf32>
    %8 = arith.truncf %7 : vector<16x256xf32> to vector<16x256xbf16>
    %c0_6 = arith.constant 0 : index
    %c0_7 = arith.constant 0 : index
    %9 = vector.load %arg4[%c0_6, %c0_7] : memref<16x256xbf16, #tpu.memory_space<vmem>>, vector<16x256xbf16>
    tpu.vector_store %arg4[%c0_6, %c0_7], %8 {strides = array<i32>} : memref<16x256xbf16, #tpu.memory_space<vmem>>, vector<16x256xbf16>,
    return
  }
  func.func @transform_0(%arg0: i32) -> (i32, i32) {
    %c0_i32 = arith.constant 0 : i32
    %c0_i32_0 = arith.constant 0 : i32
    %c0_i32_1 = arith.constant 0 : i32
    return %c0_i32, %c0_i32_0 : i32, i32
  }
  func.func @transform_1(%arg0: i32) -> (i32, i32) {
    %c0_i32 = arith.constant 0 : i32
    %c0_i32_0 = arith.constant 0 : i32
    return %c0_i32, %arg0 : i32, i32
  }
  func.func @transform_2(%arg0: i32) -> (i32, i32) {
    %c0_i32 = arith.constant 0 : i32
    %c0_i32_0 = arith.constant 0 : i32
    %c0_i32_1 = arith.constant 0 : i32
    return %c0_i32, %c0_i32_0 : i32, i32
  }
  func.func @transform_3(%arg0: i32) -> (i32, i32) {
    %c0_i32 = arith.constant 0 : i32
    %c0_i32_0 = arith.constant 0 : i32
    return %c0_i32, %arg0 : i32, i32
  }
}

module attributes {stable_mosaic.version = 11 : i64} {
  func.func @_gemm_bias_kernel(%arg0: i32, %arg1: memref<8x72xbf16, #tpu.memory_space<vmem>>, %arg2: memref<72x256xbf16, #tpu.memory_space<vmem>>, %arg3: memref<8x1xf32, #tpu.memory_space<vmem>>, %arg4: memref<8x256xbf16, #tpu.memory_space<vmem>>) attributes {dimension_semantics = [#tpu.dimension_semantics<parallel>], iteration_bounds = array<i64: 2>, scalar_prefetch = 0 : i64, scratch_operands = 0 : i64, tpu.core_type = #tpu.core_type<tc>, window_params = [{pipeline_mode = #tpu.pipeline_mode<synchronous>, transform_indices = @transform_0, window_bounds = array<i64: 8, 72>}, {transform_indices = @transform_1, window_bounds = array<i64: 72, 256>}, {pipeline_mode = #tpu.pipeline_mode<synchronous>, transform_indices = @transform_2, window_bounds = array<i64: 8, 1>}, {transform_indices = @transform_3, window_bounds = array<i64: 8, 256>}]} {
    %c0 = arith.constant 0 : index
    %c0_0 = arith.constant 0 : index
    %0 = vector.load %arg1[%c0, %c0_0] : memref<8x72xbf16, #tpu.memory_space<vmem>>, vector<8x72xbf16>
    %c0_1 = arith.constant 0 : index
    %c0_2 = arith.constant 0 : index
    %1 = vector.load %arg2[%c0_1, %c0_2] : memref<72x256xbf16, #tpu.memory_space<vmem>>, vector<72x256xbf16>
    %cst = arith.constant dense<0.000000e+00> : vector<8x256xf32>
    %2 = tpu.matmul %0, %1, %cst {dimension_numbers = #tpu.dot_dimension_numbers<[1], [0], [0], [1], [0, 0, 1, 1], [], []>} : vector<8x72xbf16>, vector<72x256xbf16>, vector<8x256xf32> -> vector<8x256xf32>
    %c0_3 = arith.constant 0 : index
    %c0_4 = arith.constant 0 : index
    %3 = vector.load %arg3[%c0_3, %c0_4] : memref<8x1xf32, #tpu.memory_space<vmem>>, vector<8x1xf32>
    %4 = vector.broadcast %3 : vector<8x1xf32> to vector<8x256xf32>
    %5 = arith.addf %2, %4 : vector<8x256xf32>
    %cst_5 = arith.constant 0.000000e+00 : f32
    %6 = vector.broadcast %cst_5 : f32 to vector<8x256xf32>
    %7 = arith.maximumf %5, %6 : vector<8x256xf32>
    %8 = arith.truncf %7 : vector<8x256xf32> to vector<8x256xbf16>
    %c0_6 = arith.constant 0 : index
    %c0_7 = arith.constant 0 : index
    %9 = vector.load %arg4[%c0_6, %c0_7] : memref<8x256xbf16, #tpu.memory_space<vmem>>, vector<8x256xbf16>
    tpu.vector_store %arg4[%c0_6, %c0_7], %8 {strides = array<i32>} : memref<8x256xbf16, #tpu.memory_space<vmem>>, vector<8x256xbf16>,
    return
  }
  func.func @transform_0(%arg0: i32) -> (i32, i32) {
    %c0_i32 = arith.constant 0 : i32
    %c0_i32_0 = arith.constant 0 : i32
    %c0_i32_1 = arith.constant 0 : i32
    return %c0_i32, %c0_i32_0 : i32, i32
  }
  func.func @transform_1(%arg0: i32) -> (i32, i32) {
    %c0_i32 = arith.constant 0 : i32
    %c0_i32_0 = arith.constant 0 : i32
    return %c0_i32, %arg0 : i32, i32
  }
  func.func @transform_2(%arg0: i32) -> (i32, i32) {
    %c0_i32 = arith.constant 0 : i32
    %c0_i32_0 = arith.constant 0 : i32
    %c0_i32_1 = arith.constant 0 : i32
    return %c0_i32, %c0_i32_0 : i32, i32
  }
  func.func @transform_3(%arg0: i32) -> (i32, i32) {
    %c0_i32 = arith.constant 0 : i32
    %c0_i32_0 = arith.constant 0 : i32
    return %c0_i32, %arg0 : i32, i32
  }
}

module attributes {stable_mosaic.version = 11 : i64} {
  func.func @_max9_kernel(%arg0: i32, %arg1: memref<16x128xbf16, #tpu.memory_space<vmem>>, %arg2: memref<16x128xbf16, #tpu.memory_space<vmem>>, %arg3: memref<16x128xbf16, #tpu.memory_space<vmem>>, %arg4: memref<16x128xbf16, #tpu.memory_space<vmem>>, %arg5: memref<16x128xbf16, #tpu.memory_space<vmem>>, %arg6: memref<16x128xbf16, #tpu.memory_space<vmem>>, %arg7: memref<16x128xbf16, #tpu.memory_space<vmem>>, %arg8: memref<16x128xbf16, #tpu.memory_space<vmem>>, %arg9: memref<16x128xbf16, #tpu.memory_space<vmem>>, %arg10: memref<16x128xbf16, #tpu.memory_space<vmem>>) attributes {dimension_semantics = [#tpu.dimension_semantics<parallel>], iteration_bounds = array<i64: 1>, scalar_prefetch = 0 : i64, scratch_operands = 0 : i64, tpu.core_type = #tpu.core_type<tc>, window_params = [{transform_indices = @transform_0, window_bounds = array<i64: 16, 128>}, {transform_indices = @transform_1, window_bounds = array<i64: 16, 128>}, {transform_indices = @transform_2, window_bounds = array<i64: 16, 128>}, {transform_indices = @transform_3, window_bounds = array<i64: 16, 128>}, {transform_indices = @transform_4, window_bounds = array<i64: 16, 128>}, {transform_indices = @transform_5, window_bounds = array<i64: 16, 128>}, {transform_indices = @transform_6, window_bounds = array<i64: 16, 128>}, {transform_indices = @transform_7, window_bounds = array<i64: 16, 128>}, {transform_indices = @transform_8, window_bounds = array<i64: 16, 128>}, {transform_indices = @transform_9, window_bounds = array<i64: 16, 128>}]} {
    %c0 = arith.constant 0 : index
    %c0_0 = arith.constant 0 : index
    %0 = vector.load %arg1[%c0, %c0_0] : memref<16x128xbf16, #tpu.memory_space<vmem>>, vector<16x128xbf16>
    %c0_1 = arith.constant 0 : index
    %c0_2 = arith.constant 0 : index
    %1 = vector.load %arg2[%c0_1, %c0_2] : memref<16x128xbf16, #tpu.memory_space<vmem>>, vector<16x128xbf16>
    %2 = arith.maximumf %0, %1 : vector<16x128xbf16>
    %c0_3 = arith.constant 0 : index
    %c0_4 = arith.constant 0 : index
    %3 = vector.load %arg3[%c0_3, %c0_4] : memref<16x128xbf16, #tpu.memory_space<vmem>>, vector<16x128xbf16>
    %4 = arith.maximumf %2, %3 : vector<16x128xbf16>
    %c0_5 = arith.constant 0 : index
    %c0_6 = arith.constant 0 : index
    %5 = vector.load %arg4[%c0_5, %c0_6] : memref<16x128xbf16, #tpu.memory_space<vmem>>, vector<16x128xbf16>
    %6 = arith.maximumf %4, %5 : vector<16x128xbf16>
    %c0_7 = arith.constant 0 : index
    %c0_8 = arith.constant 0 : index
    %7 = vector.load %arg5[%c0_7, %c0_8] : memref<16x128xbf16, #tpu.memory_space<vmem>>, vector<16x128xbf16>
    %8 = arith.maximumf %6, %7 : vector<16x128xbf16>
    %c0_9 = arith.constant 0 : index
    %c0_10 = arith.constant 0 : index
    %9 = vector.load %arg6[%c0_9, %c0_10] : memref<16x128xbf16, #tpu.memory_space<vmem>>, vector<16x128xbf16>
    %10 = arith.maximumf %8, %9 : vector<16x128xbf16>
    %c0_11 = arith.constant 0 : index
    %c0_12 = arith.constant 0 : index
    %11 = vector.load %arg7[%c0_11, %c0_12] : memref<16x128xbf16, #tpu.memory_space<vmem>>, vector<16x128xbf16>
    %12 = arith.maximumf %10, %11 : vector<16x128xbf16>
    %c0_13 = arith.constant 0 : index
    %c0_14 = arith.constant 0 : index
    %13 = vector.load %arg8[%c0_13, %c0_14] : memref<16x128xbf16, #tpu.memory_space<vmem>>, vector<16x128xbf16>
    %14 = arith.maximumf %12, %13 : vector<16x128xbf16>
    %c0_15 = arith.constant 0 : index
    %c0_16 = arith.constant 0 : index
    %15 = vector.load %arg9[%c0_15, %c0_16] : memref<16x128xbf16, #tpu.memory_space<vmem>>, vector<16x128xbf16>
    %16 = arith.maximumf %14, %15 : vector<16x128xbf16>
    %c0_17 = arith.constant 0 : index
    %c0_18 = arith.constant 0 : index
    %17 = vector.load %arg10[%c0_17, %c0_18] : memref<16x128xbf16, #tpu.memory_space<vmem>>, vector<16x128xbf16>
    tpu.vector_store %arg10[%c0_17, %c0_18], %16 {strides = array<i32>} : memref<16x128xbf16, #tpu.memory_space<vmem>>, vector<16x128xbf16>,
    return
  }
  func.func @transform_0(%arg0: i32) -> (i32, i32) {
    %c0_i32 = arith.constant 0 : i32
    %c0_i32_0 = arith.constant 0 : i32
    return %arg0, %c0_i32 : i32, i32
  }
  func.func @transform_1(%arg0: i32) -> (i32, i32) {
    %c0_i32 = arith.constant 0 : i32
    %c0_i32_0 = arith.constant 0 : i32
    return %arg0, %c0_i32 : i32, i32
  }
  func.func @transform_2(%arg0: i32) -> (i32, i32) {
    %c0_i32 = arith.constant 0 : i32
    %c0_i32_0 = arith.constant 0 : i32
    return %arg0, %c0_i32 : i32, i32
  }
  func.func @transform_3(%arg0: i32) -> (i32, i32) {
    %c0_i32 = arith.constant 0 : i32
    %c0_i32_0 = arith.constant 0 : i32
    return %arg0, %c0_i32 : i32, i32
  }
  func.func @transform_4(%arg0: i32) -> (i32, i32) {
    %c0_i32 = arith.constant 0 : i32
    %c0_i32_0 = arith.constant 0 : i32
    return %arg0, %c0_i32 : i32, i32
  }
  func.func @transform_5(%arg0: i32) -> (i32, i32) {
    %c0_i32 = arith.constant 0 : i32
    %c0_i32_0 = arith.constant 0 : i32
    return %arg0, %c0_i32 : i32, i32
  }
  func.func @transform_6(%arg0: i32) -> (i32, i32) {
    %c0_i32 = arith.constant 0 : i32
    %c0_i32_0 = arith.constant 0 : i32
    return %arg0, %c0_i32 : i32, i32
  }
  func.func @transform_7(%arg0: i32) -> (i32, i32) {
    %c0_i32 = arith.constant 0 : i32
    %c0_i32_0 = arith.constant 0 : i32
    return %arg0, %c0_i32 : i32, i32
  }
  func.func @transform_8(%arg0: i32) -> (i32, i32) {
    %c0_i32 = arith.constant 0 : i32
    %c0_i32_0 = arith.constant 0 : i32
    return %arg0, %c0_i32 : i32, i32
  }
  func.func @transform_9(%arg0: i32) -> (i32, i32) {
    %c0_i32 = arith.constant 0 : i32
    %c0_i32_0 = arith.constant 0 : i32
    return %arg0, %c0_i32 : i32, i32
  }
}

module attributes {stable_mosaic.version = 11 : i64} {
  func.func @_gemm_bias_kernel(%arg0: i32, %arg1: memref<8x144xbf16, #tpu.memory_space<vmem>>, %arg2: memref<144x128xbf16, #tpu.memory_space<vmem>>, %arg3: memref<8x1xf32, #tpu.memory_space<vmem>>, %arg4: memref<8x128xbf16, #tpu.memory_space<vmem>>) attributes {dimension_semantics = [#tpu.dimension_semantics<parallel>], iteration_bounds = array<i64: 1>, scalar_prefetch = 0 : i64, scratch_operands = 0 : i64, tpu.core_type = #tpu.core_type<tc>, window_params = [{pipeline_mode = #tpu.pipeline_mode<synchronous>, transform_indices = @transform_0, window_bounds = array<i64: 8, 144>}, {transform_indices = @transform_1, window_bounds = array<i64: 144, 128>}, {pipeline_mode = #tpu.pipeline_mode<synchronous>, transform_indices = @transform_2, window_bounds = array<i64: 8, 1>}, {transform_indices = @transform_3, window_bounds = array<i64: 8, 128>}]} {
    %c0 = arith.constant 0 : index
    %c0_0 = arith.constant 0 : index
    %0 = vector.load %arg1[%c0, %c0_0] : memref<8x144xbf16, #tpu.memory_space<vmem>>, vector<8x144xbf16>
    %c0_1 = arith.constant 0 : index
    %c0_2 = arith.constant 0 : index
    %1 = vector.load %arg2[%c0_1, %c0_2] : memref<144x128xbf16, #tpu.memory_space<vmem>>, vector<144x128xbf16>
    %cst = arith.constant dense<0.000000e+00> : vector<8x128xf32>
    %2 = tpu.matmul %0, %1, %cst {dimension_numbers = #tpu.dot_dimension_numbers<[1], [0], [0], [1], [0, 0, 1, 1], [], []>} : vector<8x144xbf16>, vector<144x128xbf16>, vector<8x128xf32> -> vector<8x128xf32>
    %c0_3 = arith.constant 0 : index
    %c0_4 = arith.constant 0 : index
    %3 = vector.load %arg3[%c0_3, %c0_4] : memref<8x1xf32, #tpu.memory_space<vmem>>, vector<8x1xf32>
    %4 = vector.broadcast %3 : vector<8x1xf32> to vector<8x128xf32>
    %5 = arith.addf %2, %4 : vector<8x128xf32>
    %cst_5 = arith.constant 0.000000e+00 : f32
    %6 = vector.broadcast %cst_5 : f32 to vector<8x128xf32>
    %7 = arith.maximumf %5, %6 : vector<8x128xf32>
    %8 = arith.truncf %7 : vector<8x128xf32> to vector<8x128xbf16>
    %c0_6 = arith.constant 0 : index
    %c0_7 = arith.constant 0 : index
    %9 = vector.load %arg4[%c0_6, %c0_7] : memref<8x128xbf16, #tpu.memory_space<vmem>>, vector<8x128xbf16>
    tpu.vector_store %arg4[%c0_6, %c0_7], %8 {strides = array<i32>} : memref<8x128xbf16, #tpu.memory_space<vmem>>, vector<8x128xbf16>,
    return
  }
  func.func @transform_0(%arg0: i32) -> (i32, i32) {
    %c0_i32 = arith.constant 0 : i32
    %c0_i32_0 = arith.constant 0 : i32
    %c0_i32_1 = arith.constant 0 : i32
    return %c0_i32, %c0_i32_0 : i32, i32
  }
  func.func @transform_1(%arg0: i32) -> (i32, i32) {
    %c0_i32 = arith.constant 0 : i32
    %c0_i32_0 = arith.constant 0 : i32
    return %c0_i32, %arg0 : i32, i32
  }
  func.func @transform_2(%arg0: i32) -> (i32, i32) {
    %c0_i32 = arith.constant 0 : i32
    %c0_i32_0 = arith.constant 0 : i32
    %c0_i32_1 = arith.constant 0 : i32
    return %c0_i32, %c0_i32_0 : i32, i32
  }
  func.func @transform_3(%arg0: i32) -> (i32, i32) {
    %c0_i32 = arith.constant 0 : i32
    %c0_i32_0 = arith.constant 0 : i32
    return %c0_i32, %arg0 : i32, i32
  }
}

module attributes {stable_mosaic.version = 11 : i64} {
  func.func @_gemm_bias_down_kernel(%arg0: i32, %arg1: memref<8x72xbf16, #tpu.memory_space<vmem>>, %arg2: memref<72x128xbf16, #tpu.memory_space<vmem>>, %arg3: memref<8x1xf32, #tpu.memory_space<vmem>>, %arg4: memref<8x16xbf16, #tpu.memory_space<vmem>>, %arg5: memref<16x128xbf16, #tpu.memory_space<vmem>>, %arg6: memref<8x128xbf16, #tpu.memory_space<vmem>>) attributes {dimension_semantics = [#tpu.dimension_semantics<parallel>], iteration_bounds = array<i64: 1>, scalar_prefetch = 0 : i64, scratch_operands = 0 : i64, tpu.core_type = #tpu.core_type<tc>, window_params = [{pipeline_mode = #tpu.pipeline_mode<synchronous>, transform_indices = @transform_0, window_bounds = array<i64: 8, 72>}, {transform_indices = @transform_1, window_bounds = array<i64: 72, 128>}, {pipeline_mode = #tpu.pipeline_mode<synchronous>, transform_indices = @transform_2, window_bounds = array<i64: 8, 1>}, {pipeline_mode = #tpu.pipeline_mode<synchronous>, transform_indices = @transform_3, window_bounds = array<i64: 8, 16>}, {transform_indices = @transform_4, window_bounds = array<i64: 16, 128>}, {transform_indices = @transform_5, window_bounds = array<i64: 8, 128>}]} {
    %c0 = arith.constant 0 : index
    %c0_0 = arith.constant 0 : index
    %0 = vector.load %arg1[%c0, %c0_0] : memref<8x72xbf16, #tpu.memory_space<vmem>>, vector<8x72xbf16>
    %c0_1 = arith.constant 0 : index
    %c0_2 = arith.constant 0 : index
    %1 = vector.load %arg2[%c0_1, %c0_2] : memref<72x128xbf16, #tpu.memory_space<vmem>>, vector<72x128xbf16>
    %cst = arith.constant dense<0.000000e+00> : vector<8x128xf32>
    %2 = tpu.matmul %0, %1, %cst {dimension_numbers = #tpu.dot_dimension_numbers<[1], [0], [0], [1], [0, 0, 1, 1], [], []>} : vector<8x72xbf16>, vector<72x128xbf16>, vector<8x128xf32> -> vector<8x128xf32>
    %c0_3 = arith.constant 0 : index
    %c0_4 = arith.constant 0 : index
    %3 = vector.load %arg4[%c0_3, %c0_4] : memref<8x16xbf16, #tpu.memory_space<vmem>>, vector<8x16xbf16>
    %c0_5 = arith.constant 0 : index
    %c0_6 = arith.constant 0 : index
    %4 = vector.load %arg5[%c0_5, %c0_6] : memref<16x128xbf16, #tpu.memory_space<vmem>>, vector<16x128xbf16>
    %cst_7 = arith.constant dense<0.000000e+00> : vector<8x128xf32>
    %5 = tpu.matmul %3, %4, %cst_7 {dimension_numbers = #tpu.dot_dimension_numbers<[1], [0], [0], [1], [0, 0, 1, 1], [], []>} : vector<8x16xbf16>, vector<16x128xbf16>, vector<8x128xf32> -> vector<8x128xf32>
    %6 = arith.addf %2, %5 : vector<8x128xf32>
    %c0_8 = arith.constant 0 : index
    %c0_9 = arith.constant 0 : index
    %7 = vector.load %arg3[%c0_8, %c0_9] : memref<8x1xf32, #tpu.memory_space<vmem>>, vector<8x1xf32>
    %8 = vector.broadcast %7 : vector<8x1xf32> to vector<8x128xf32>
    %9 = arith.addf %6, %8 : vector<8x128xf32>
    %cst_10 = arith.constant 0.000000e+00 : f32
    %10 = vector.broadcast %cst_10 : f32 to vector<8x128xf32>
    %11 = arith.maximumf %9, %10 : vector<8x128xf32>
    %12 = arith.truncf %11 : vector<8x128xf32> to vector<8x128xbf16>
    %c0_11 = arith.constant 0 : index
    %c0_12 = arith.constant 0 : index
    %13 = vector.load %arg6[%c0_11, %c0_12] : memref<8x128xbf16, #tpu.memory_space<vmem>>, vector<8x128xbf16>
    tpu.vector_store %arg6[%c0_11, %c0_12], %12 {strides = array<i32>} : memref<8x128xbf16, #tpu.memory_space<vmem>>, vector<8x128xbf16>,
    return
  }
  func.func @transform_0(%arg0: i32) -> (i32, i32) {
    %c0_i32 = arith.constant 0 : i32
    %c0_i32_0 = arith.constant 0 : i32
    %c0_i32_1 = arith.constant 0 : i32
    return %c0_i32, %c0_i32_0 : i32, i32
  }
  func.func @transform_1(%arg0: i32) -> (i32, i32) {
    %c0_i32 = arith.constant 0 : i32
    %c0_i32_0 = arith.constant 0 : i32
    return %c0_i32, %arg0 : i32, i32
  }
  func.func @transform_2(%arg0: i32) -> (i32, i32) {
    %c0_i32 = arith.constant 0 : i32
    %c0_i32_0 = arith.constant 0 : i32
    %c0_i32_1 = arith.constant 0 : i32
    return %c0_i32, %c0_i32_0 : i32, i32
  }
  func.func @transform_3(%arg0: i32) -> (i32, i32) {
    %c0_i32 = arith.constant 0 : i32
    %c0_i32_0 = arith.constant 0 : i32
    %c0_i32_1 = arith.constant 0 : i32
    return %c0_i32, %c0_i32_0 : i32, i32
  }
  func.func @transform_4(%arg0: i32) -> (i32, i32) {
    %c0_i32 = arith.constant 0 : i32
    %c0_i32_0 = arith.constant 0 : i32
    return %c0_i32, %arg0 : i32, i32
  }
  func.func @transform_5(%arg0: i32) -> (i32, i32) {
    %c0_i32 = arith.constant 0 : i32
    %c0_i32_0 = arith.constant 0 : i32
    return %c0_i32, %arg0 : i32, i32
  }
}

module attributes {stable_mosaic.version = 11 : i64} {
  func.func @_gemm_bias_kernel(%arg0: i32, %arg1: memref<8x72xbf16, #tpu.memory_space<vmem>>, %arg2: memref<72x128xbf16, #tpu.memory_space<vmem>>, %arg3: memref<8x1xf32, #tpu.memory_space<vmem>>, %arg4: memref<8x128xbf16, #tpu.memory_space<vmem>>) attributes {dimension_semantics = [#tpu.dimension_semantics<parallel>], iteration_bounds = array<i64: 1>, scalar_prefetch = 0 : i64, scratch_operands = 0 : i64, tpu.core_type = #tpu.core_type<tc>, window_params = [{pipeline_mode = #tpu.pipeline_mode<synchronous>, transform_indices = @transform_0, window_bounds = array<i64: 8, 72>}, {transform_indices = @transform_1, window_bounds = array<i64: 72, 128>}, {pipeline_mode = #tpu.pipeline_mode<synchronous>, transform_indices = @transform_2, window_bounds = array<i64: 8, 1>}, {transform_indices = @transform_3, window_bounds = array<i64: 8, 128>}]} {
    %c0 = arith.constant 0 : index
    %c0_0 = arith.constant 0 : index
    %0 = vector.load %arg1[%c0, %c0_0] : memref<8x72xbf16, #tpu.memory_space<vmem>>, vector<8x72xbf16>
    %c0_1 = arith.constant 0 : index
    %c0_2 = arith.constant 0 : index
    %1 = vector.load %arg2[%c0_1, %c0_2] : memref<72x128xbf16, #tpu.memory_space<vmem>>, vector<72x128xbf16>
    %cst = arith.constant dense<0.000000e+00> : vector<8x128xf32>
    %2 = tpu.matmul %0, %1, %cst {dimension_numbers = #tpu.dot_dimension_numbers<[1], [0], [0], [1], [0, 0, 1, 1], [], []>} : vector<8x72xbf16>, vector<72x128xbf16>, vector<8x128xf32> -> vector<8x128xf32>
    %c0_3 = arith.constant 0 : index
    %c0_4 = arith.constant 0 : index
    %3 = vector.load %arg3[%c0_3, %c0_4] : memref<8x1xf32, #tpu.memory_space<vmem>>, vector<8x1xf32>
    %4 = vector.broadcast %3 : vector<8x1xf32> to vector<8x128xf32>
    %5 = arith.addf %2, %4 : vector<8x128xf32>
    %cst_5 = arith.constant 0.000000e+00 : f32
    %6 = vector.broadcast %cst_5 : f32 to vector<8x128xf32>
    %7 = arith.maximumf %5, %6 : vector<8x128xf32>
    %8 = arith.truncf %7 : vector<8x128xf32> to vector<8x128xbf16>
    %c0_6 = arith.constant 0 : index
    %c0_7 = arith.constant 0 : index
    %9 = vector.load %arg4[%c0_6, %c0_7] : memref<8x128xbf16, #tpu.memory_space<vmem>>, vector<8x128xbf16>
    tpu.vector_store %arg4[%c0_6, %c0_7], %8 {strides = array<i32>} : memref<8x128xbf16, #tpu.memory_space<vmem>>, vector<8x128xbf16>,
    return
  }
  func.func @transform_0(%arg0: i32) -> (i32, i32) {
    %c0_i32 = arith.constant 0 : i32
    %c0_i32_0 = arith.constant 0 : i32
    %c0_i32_1 = arith.constant 0 : i32
    return %c0_i32, %c0_i32_0 : i32, i32
  }
  func.func @transform_1(%arg0: i32) -> (i32, i32) {
    %c0_i32 = arith.constant 0 : i32
    %c0_i32_0 = arith.constant 0 : i32
    return %c0_i32, %arg0 : i32, i32
  }
  func.func @transform_2(%arg0: i32) -> (i32, i32) {
    %c0_i32 = arith.constant 0 : i32
    %c0_i32_0 = arith.constant 0 : i32
    %c0_i32_1 = arith.constant 0 : i32
    return %c0_i32, %c0_i32_0 : i32, i32
  }
  func.func @transform_3(%arg0: i32) -> (i32, i32) {
    %c0_i32 = arith.constant 0 : i32
    %c0_i32_0 = arith.constant 0 : i32
    return %c0_i32, %arg0 : i32, i32
  }
}

module attributes {stable_mosaic.version = 11 : i64} {
  func.func @_gemm_bias_res_kernel(%arg0: i32, %arg1: memref<8x72xbf16, #tpu.memory_space<vmem>>, %arg2: memref<72x128xbf16, #tpu.memory_space<vmem>>, %arg3: memref<8x1xf32, #tpu.memory_space<vmem>>, %arg4: memref<8x128xbf16, #tpu.memory_space<vmem>>, %arg5: memref<8x128xbf16, #tpu.memory_space<vmem>>) attributes {dimension_semantics = [#tpu.dimension_semantics<parallel>], iteration_bounds = array<i64: 1>, scalar_prefetch = 0 : i64, scratch_operands = 0 : i64, tpu.core_type = #tpu.core_type<tc>, window_params = [{pipeline_mode = #tpu.pipeline_mode<synchronous>, transform_indices = @transform_0, window_bounds = array<i64: 8, 72>}, {transform_indices = @transform_1, window_bounds = array<i64: 72, 128>}, {pipeline_mode = #tpu.pipeline_mode<synchronous>, transform_indices = @transform_2, window_bounds = array<i64: 8, 1>}, {transform_indices = @transform_3, window_bounds = array<i64: 8, 128>}, {transform_indices = @transform_4, window_bounds = array<i64: 8, 128>}]} {
    %c0 = arith.constant 0 : index
    %c0_0 = arith.constant 0 : index
    %0 = vector.load %arg1[%c0, %c0_0] : memref<8x72xbf16, #tpu.memory_space<vmem>>, vector<8x72xbf16>
    %c0_1 = arith.constant 0 : index
    %c0_2 = arith.constant 0 : index
    %1 = vector.load %arg2[%c0_1, %c0_2] : memref<72x128xbf16, #tpu.memory_space<vmem>>, vector<72x128xbf16>
    %cst = arith.constant dense<0.000000e+00> : vector<8x128xf32>
    %2 = tpu.matmul %0, %1, %cst {dimension_numbers = #tpu.dot_dimension_numbers<[1], [0], [0], [1], [0, 0, 1, 1], [], []>} : vector<8x72xbf16>, vector<72x128xbf16>, vector<8x128xf32> -> vector<8x128xf32>
    %c0_3 = arith.constant 0 : index
    %c0_4 = arith.constant 0 : index
    %3 = vector.load %arg3[%c0_3, %c0_4] : memref<8x1xf32, #tpu.memory_space<vmem>>, vector<8x1xf32>
    %4 = vector.broadcast %3 : vector<8x1xf32> to vector<8x128xf32>
    %5 = arith.addf %2, %4 : vector<8x128xf32>
    %c0_5 = arith.constant 0 : index
    %c0_6 = arith.constant 0 : index
    %6 = vector.load %arg4[%c0_5, %c0_6] : memref<8x128xbf16, #tpu.memory_space<vmem>>, vector<8x128xbf16>
    %7 = arith.extf %6 : vector<8x128xbf16> to vector<8x128xf32>
    %8 = arith.addf %5, %7 : vector<8x128xf32>
    %cst_7 = arith.constant 0.000000e+00 : f32
    %9 = vector.broadcast %cst_7 : f32 to vector<8x128xf32>
    %10 = arith.maximumf %8, %9 : vector<8x128xf32>
    %11 = arith.truncf %10 : vector<8x128xf32> to vector<8x128xbf16>
    %c0_8 = arith.constant 0 : index
    %c0_9 = arith.constant 0 : index
    %12 = vector.load %arg5[%c0_8, %c0_9] : memref<8x128xbf16, #tpu.memory_space<vmem>>, vector<8x128xbf16>
    tpu.vector_store %arg5[%c0_8, %c0_9], %11 {strides = array<i32>} : memref<8x128xbf16, #tpu.memory_space<vmem>>, vector<8x128xbf16>,
    return
  }
  func.func @transform_0(%arg0: i32) -> (i32, i32) {
    %c0_i32 = arith.constant 0 : i32
    %c0_i32_0 = arith.constant 0 : i32
    %c0_i32_1 = arith.constant 0 : i32
    return %c0_i32, %c0_i32_0 : i32, i32
  }
  func.func @transform_1(%arg0: i32) -> (i32, i32) {
    %c0_i32 = arith.constant 0 : i32
    %c0_i32_0 = arith.constant 0 : i32
    return %c0_i32, %arg0 : i32, i32
  }
  func.func @transform_2(%arg0: i32) -> (i32, i32) {
    %c0_i32 = arith.constant 0 : i32
    %c0_i32_0 = arith.constant 0 : i32
    %c0_i32_1 = arith.constant 0 : i32
    return %c0_i32, %c0_i32_0 : i32, i32
  }
  func.func @transform_3(%arg0: i32) -> (i32, i32) {
    %c0_i32 = arith.constant 0 : i32
    %c0_i32_0 = arith.constant 0 : i32
    return %c0_i32, %arg0 : i32, i32
  }
  func.func @transform_4(%arg0: i32) -> (i32, i32) {
    %c0_i32 = arith.constant 0 : i32
    %c0_i32_0 = arith.constant 0 : i32
    return %c0_i32, %arg0 : i32, i32
  }
}

module attributes {stable_mosaic.version = 11 : i64} {
  func.func @_gemm_bias_kernel(%arg0: i32, %arg1: memref<16x72xbf16, #tpu.memory_space<vmem>>, %arg2: memref<72x128xbf16, #tpu.memory_space<vmem>>, %arg3: memref<16x1xf32, #tpu.memory_space<vmem>>, %arg4: memref<16x128xbf16, #tpu.memory_space<vmem>>) attributes {dimension_semantics = [#tpu.dimension_semantics<parallel>], iteration_bounds = array<i64: 1>, scalar_prefetch = 0 : i64, scratch_operands = 0 : i64, tpu.core_type = #tpu.core_type<tc>, window_params = [{pipeline_mode = #tpu.pipeline_mode<synchronous>, transform_indices = @transform_0, window_bounds = array<i64: 16, 72>}, {transform_indices = @transform_1, window_bounds = array<i64: 72, 128>}, {pipeline_mode = #tpu.pipeline_mode<synchronous>, transform_indices = @transform_2, window_bounds = array<i64: 16, 1>}, {transform_indices = @transform_3, window_bounds = array<i64: 16, 128>}]} {
    %c0 = arith.constant 0 : index
    %c0_0 = arith.constant 0 : index
    %0 = vector.load %arg1[%c0, %c0_0] : memref<16x72xbf16, #tpu.memory_space<vmem>>, vector<16x72xbf16>
    %c0_1 = arith.constant 0 : index
    %c0_2 = arith.constant 0 : index
    %1 = vector.load %arg2[%c0_1, %c0_2] : memref<72x128xbf16, #tpu.memory_space<vmem>>, vector<72x128xbf16>
    %cst = arith.constant dense<0.000000e+00> : vector<16x128xf32>
    %2 = tpu.matmul %0, %1, %cst {dimension_numbers = #tpu.dot_dimension_numbers<[1], [0], [0], [1], [0, 0, 1, 1], [], []>} : vector<16x72xbf16>, vector<72x128xbf16>, vector<16x128xf32> -> vector<16x128xf32>
    %c0_3 = arith.constant 0 : index
    %c0_4 = arith.constant 0 : index
    %3 = vector.load %arg3[%c0_3, %c0_4] : memref<16x1xf32, #tpu.memory_space<vmem>>, vector<16x1xf32>
    %4 = vector.broadcast %3 : vector<16x1xf32> to vector<16x128xf32>
    %5 = arith.addf %2, %4 : vector<16x128xf32>
    %cst_5 = arith.constant 0.000000e+00 : f32
    %6 = vector.broadcast %cst_5 : f32 to vector<16x128xf32>
    %7 = arith.maximumf %5, %6 : vector<16x128xf32>
    %8 = arith.truncf %7 : vector<16x128xf32> to vector<16x128xbf16>
    %c0_6 = arith.constant 0 : index
    %c0_7 = arith.constant 0 : index
    %9 = vector.load %arg4[%c0_6, %c0_7] : memref<16x128xbf16, #tpu.memory_space<vmem>>, vector<16x128xbf16>
    tpu.vector_store %arg4[%c0_6, %c0_7], %8 {strides = array<i32>} : memref<16x128xbf16, #tpu.memory_space<vmem>>, vector<16x128xbf16>,
    return
  }
  func.func @transform_0(%arg0: i32) -> (i32, i32) {
    %c0_i32 = arith.constant 0 : i32
    %c0_i32_0 = arith.constant 0 : i32
    %c0_i32_1 = arith.constant 0 : i32
    return %c0_i32, %c0_i32_0 : i32, i32
  }
  func.func @transform_1(%arg0: i32) -> (i32, i32) {
    %c0_i32 = arith.constant 0 : i32
    %c0_i32_0 = arith.constant 0 : i32
    return %c0_i32, %arg0 : i32, i32
  }
  func.func @transform_2(%arg0: i32) -> (i32, i32) {
    %c0_i32 = arith.constant 0 : i32
    %c0_i32_0 = arith.constant 0 : i32
    %c0_i32_1 = arith.constant 0 : i32
    return %c0_i32, %c0_i32_0 : i32, i32
  }
  func.func @transform_3(%arg0: i32) -> (i32, i32) {
    %c0_i32 = arith.constant 0 : i32
    %c0_i32_0 = arith.constant 0 : i32
    return %c0_i32, %arg0 : i32, i32
  }
}

module attributes {stable_mosaic.version = 11 : i64} {
  func.func @_gemm_bias_down_kernel(%arg0: i32, %arg1: memref<16x144xbf16, #tpu.memory_space<vmem>>, %arg2: memref<144x128xbf16, #tpu.memory_space<vmem>>, %arg3: memref<16x1xf32, #tpu.memory_space<vmem>>, %arg4: memref<16x8xbf16, #tpu.memory_space<vmem>>, %arg5: memref<8x128xbf16, #tpu.memory_space<vmem>>, %arg6: memref<16x128xbf16, #tpu.memory_space<vmem>>) attributes {dimension_semantics = [#tpu.dimension_semantics<parallel>], iteration_bounds = array<i64: 1>, scalar_prefetch = 0 : i64, scratch_operands = 0 : i64, tpu.core_type = #tpu.core_type<tc>, window_params = [{pipeline_mode = #tpu.pipeline_mode<synchronous>, transform_indices = @transform_0, window_bounds = array<i64: 16, 144>}, {transform_indices = @transform_1, window_bounds = array<i64: 144, 128>}, {pipeline_mode = #tpu.pipeline_mode<synchronous>, transform_indices = @transform_2, window_bounds = array<i64: 16, 1>}, {pipeline_mode = #tpu.pipeline_mode<synchronous>, transform_indices = @transform_3, window_bounds = array<i64: 16, 8>}, {transform_indices = @transform_4, window_bounds = array<i64: 8, 128>}, {transform_indices = @transform_5, window_bounds = array<i64: 16, 128>}]} {
    %c0 = arith.constant 0 : index
    %c0_0 = arith.constant 0 : index
    %0 = vector.load %arg1[%c0, %c0_0] : memref<16x144xbf16, #tpu.memory_space<vmem>>, vector<16x144xbf16>
    %c0_1 = arith.constant 0 : index
    %c0_2 = arith.constant 0 : index
    %1 = vector.load %arg2[%c0_1, %c0_2] : memref<144x128xbf16, #tpu.memory_space<vmem>>, vector<144x128xbf16>
    %cst = arith.constant dense<0.000000e+00> : vector<16x128xf32>
    %2 = tpu.matmul %0, %1, %cst {dimension_numbers = #tpu.dot_dimension_numbers<[1], [0], [0], [1], [0, 0, 1, 1], [], []>} : vector<16x144xbf16>, vector<144x128xbf16>, vector<16x128xf32> -> vector<16x128xf32>
    %c0_3 = arith.constant 0 : index
    %c0_4 = arith.constant 0 : index
    %3 = vector.load %arg4[%c0_3, %c0_4] : memref<16x8xbf16, #tpu.memory_space<vmem>>, vector<16x8xbf16>
    %c0_5 = arith.constant 0 : index
    %c0_6 = arith.constant 0 : index
    %4 = vector.load %arg5[%c0_5, %c0_6] : memref<8x128xbf16, #tpu.memory_space<vmem>>, vector<8x128xbf16>
    %cst_7 = arith.constant dense<0.000000e+00> : vector<16x128xf32>
    %5 = tpu.matmul %3, %4, %cst_7 {dimension_numbers = #tpu.dot_dimension_numbers<[1], [0], [0], [1], [0, 0, 1, 1], [], []>} : vector<16x8xbf16>, vector<8x128xbf16>, vector<16x128xf32> -> vector<16x128xf32>
    %6 = arith.addf %2, %5 : vector<16x128xf32>
    %c0_8 = arith.constant 0 : index
    %c0_9 = arith.constant 0 : index
    %7 = vector.load %arg3[%c0_8, %c0_9] : memref<16x1xf32, #tpu.memory_space<vmem>>, vector<16x1xf32>
    %8 = vector.broadcast %7 : vector<16x1xf32> to vector<16x128xf32>
    %9 = arith.addf %6, %8 : vector<16x128xf32>
    %cst_10 = arith.constant 0.000000e+00 : f32
    %10 = vector.broadcast %cst_10 : f32 to vector<16x128xf32>
    %11 = arith.maximumf %9, %10 : vector<16x128xf32>
    %12 = arith.truncf %11 : vector<16x128xf32> to vector<16x128xbf16>
    %c0_11 = arith.constant 0 : index
    %c0_12 = arith.constant 0 : index
    %13 = vector.load %arg6[%c0_11, %c0_12] : memref<16x128xbf16, #tpu.memory_space<vmem>>, vector<16x128xbf16>
    tpu.vector_store %arg6[%c0_11, %c0_12], %12 {strides = array<i32>} : memref<16x128xbf16, #tpu.memory_space<vmem>>, vector<16x128xbf16>,
    return
  }
  func.func @transform_0(%arg0: i32) -> (i32, i32) {
    %c0_i32 = arith.constant 0 : i32
    %c0_i32_0 = arith.constant 0 : i32
    %c0_i32_1 = arith.constant 0 : i32
    return %c0_i32, %c0_i32_0 : i32, i32
  }
  func.func @transform_1(%arg0: i32) -> (i32, i32) {
    %c0_i32 = arith.constant 0 : i32
    %c0_i32_0 = arith.constant 0 : i32
    return %c0_i32, %arg0 : i32, i32
  }
  func.func @transform_2(%arg0: i32) -> (i32, i32) {
    %c0_i32 = arith.constant 0 : i32
    %c0_i32_0 = arith.constant 0 : i32
    %c0_i32_1 = arith.constant 0 : i32
    return %c0_i32, %c0_i32_0 : i32, i32
  }
  func.func @transform_3(%arg0: i32) -> (i32, i32) {
    %c0_i32 = arith.constant 0 : i32
    %c0_i32_0 = arith.constant 0 : i32
    %c0_i32_1 = arith.constant 0 : i32
    return %c0_i32, %c0_i32_0 : i32, i32
  }
  func.func @transform_4(%arg0: i32) -> (i32, i32) {
    %c0_i32 = arith.constant 0 : i32
    %c0_i32_0 = arith.constant 0 : i32
    return %c0_i32, %arg0 : i32, i32
  }
  func.func @transform_5(%arg0: i32) -> (i32, i32) {
    %c0_i32 = arith.constant 0 : i32
    %c0_i32_0 = arith.constant 0 : i32
    return %c0_i32, %arg0 : i32, i32
  }
}

module attributes {stable_mosaic.version = 11 : i64} {
  func.func @_gemm_bias_kernel(%arg0: i32, %arg1: memref<16x144xbf16, #tpu.memory_space<vmem>>, %arg2: memref<144x128xbf16, #tpu.memory_space<vmem>>, %arg3: memref<16x1xf32, #tpu.memory_space<vmem>>, %arg4: memref<16x128xbf16, #tpu.memory_space<vmem>>) attributes {dimension_semantics = [#tpu.dimension_semantics<parallel>], iteration_bounds = array<i64: 1>, scalar_prefetch = 0 : i64, scratch_operands = 0 : i64, tpu.core_type = #tpu.core_type<tc>, window_params = [{pipeline_mode = #tpu.pipeline_mode<synchronous>, transform_indices = @transform_0, window_bounds = array<i64: 16, 144>}, {transform_indices = @transform_1, window_bounds = array<i64: 144, 128>}, {pipeline_mode = #tpu.pipeline_mode<synchronous>, transform_indices = @transform_2, window_bounds = array<i64: 16, 1>}, {transform_indices = @transform_3, window_bounds = array<i64: 16, 128>}]} {
    %c0 = arith.constant 0 : index
    %c0_0 = arith.constant 0 : index
    %0 = vector.load %arg1[%c0, %c0_0] : memref<16x144xbf16, #tpu.memory_space<vmem>>, vector<16x144xbf16>
    %c0_1 = arith.constant 0 : index
    %c0_2 = arith.constant 0 : index
    %1 = vector.load %arg2[%c0_1, %c0_2] : memref<144x128xbf16, #tpu.memory_space<vmem>>, vector<144x128xbf16>
    %cst = arith.constant dense<0.000000e+00> : vector<16x128xf32>
    %2 = tpu.matmul %0, %1, %cst {dimension_numbers = #tpu.dot_dimension_numbers<[1], [0], [0], [1], [0, 0, 1, 1], [], []>} : vector<16x144xbf16>, vector<144x128xbf16>, vector<16x128xf32> -> vector<16x128xf32>
    %c0_3 = arith.constant 0 : index
    %c0_4 = arith.constant 0 : index
    %3 = vector.load %arg3[%c0_3, %c0_4] : memref<16x1xf32, #tpu.memory_space<vmem>>, vector<16x1xf32>
    %4 = vector.broadcast %3 : vector<16x1xf32> to vector<16x128xf32>
    %5 = arith.addf %2, %4 : vector<16x128xf32>
    %cst_5 = arith.constant 0.000000e+00 : f32
    %6 = vector.broadcast %cst_5 : f32 to vector<16x128xf32>
    %7 = arith.maximumf %5, %6 : vector<16x128xf32>
    %8 = arith.truncf %7 : vector<16x128xf32> to vector<16x128xbf16>
    %c0_6 = arith.constant 0 : index
    %c0_7 = arith.constant 0 : index
    %9 = vector.load %arg4[%c0_6, %c0_7] : memref<16x128xbf16, #tpu.memory_space<vmem>>, vector<16x128xbf16>
    tpu.vector_store %arg4[%c0_6, %c0_7], %8 {strides = array<i32>} : memref<16x128xbf16, #tpu.memory_space<vmem>>, vector<16x128xbf16>,
    return
  }
  func.func @transform_0(%arg0: i32) -> (i32, i32) {
    %c0_i32 = arith.constant 0 : i32
    %c0_i32_0 = arith.constant 0 : i32
    %c0_i32_1 = arith.constant 0 : i32
    return %c0_i32, %c0_i32_0 : i32, i32
  }
  func.func @transform_1(%arg0: i32) -> (i32, i32) {
    %c0_i32 = arith.constant 0 : i32
    %c0_i32_0 = arith.constant 0 : i32
    return %c0_i32, %arg0 : i32, i32
  }
  func.func @transform_2(%arg0: i32) -> (i32, i32) {
    %c0_i32 = arith.constant 0 : i32
    %c0_i32_0 = arith.constant 0 : i32
    %c0_i32_1 = arith.constant 0 : i32
    return %c0_i32, %c0_i32_0 : i32, i32
  }
  func.func @transform_3(%arg0: i32) -> (i32, i32) {
    %c0_i32 = arith.constant 0 : i32
    %c0_i32_0 = arith.constant 0 : i32
    return %c0_i32, %arg0 : i32, i32
  }
}

module attributes {stable_mosaic.version = 11 : i64} {
  func.func @_gemm_bias_res_kernel(%arg0: i32, %arg1: memref<16x144xbf16, #tpu.memory_space<vmem>>, %arg2: memref<144x128xbf16, #tpu.memory_space<vmem>>, %arg3: memref<16x1xf32, #tpu.memory_space<vmem>>, %arg4: memref<16x128xbf16, #tpu.memory_space<vmem>>, %arg5: memref<16x128xbf16, #tpu.memory_space<vmem>>) attributes {dimension_semantics = [#tpu.dimension_semantics<parallel>], iteration_bounds = array<i64: 1>, scalar_prefetch = 0 : i64, scratch_operands = 0 : i64, tpu.core_type = #tpu.core_type<tc>, window_params = [{pipeline_mode = #tpu.pipeline_mode<synchronous>, transform_indices = @transform_0, window_bounds = array<i64: 16, 144>}, {transform_indices = @transform_1, window_bounds = array<i64: 144, 128>}, {pipeline_mode = #tpu.pipeline_mode<synchronous>, transform_indices = @transform_2, window_bounds = array<i64: 16, 1>}, {transform_indices = @transform_3, window_bounds = array<i64: 16, 128>}, {transform_indices = @transform_4, window_bounds = array<i64: 16, 128>}]} {
    %c0 = arith.constant 0 : index
    %c0_0 = arith.constant 0 : index
    %0 = vector.load %arg1[%c0, %c0_0] : memref<16x144xbf16, #tpu.memory_space<vmem>>, vector<16x144xbf16>
    %c0_1 = arith.constant 0 : index
    %c0_2 = arith.constant 0 : index
    %1 = vector.load %arg2[%c0_1, %c0_2] : memref<144x128xbf16, #tpu.memory_space<vmem>>, vector<144x128xbf16>
    %cst = arith.constant dense<0.000000e+00> : vector<16x128xf32>
    %2 = tpu.matmul %0, %1, %cst {dimension_numbers = #tpu.dot_dimension_numbers<[1], [0], [0], [1], [0, 0, 1, 1], [], []>} : vector<16x144xbf16>, vector<144x128xbf16>, vector<16x128xf32> -> vector<16x128xf32>
    %c0_3 = arith.constant 0 : index
    %c0_4 = arith.constant 0 : index
    %3 = vector.load %arg3[%c0_3, %c0_4] : memref<16x1xf32, #tpu.memory_space<vmem>>, vector<16x1xf32>
    %4 = vector.broadcast %3 : vector<16x1xf32> to vector<16x128xf32>
    %5 = arith.addf %2, %4 : vector<16x128xf32>
    %c0_5 = arith.constant 0 : index
    %c0_6 = arith.constant 0 : index
    %6 = vector.load %arg4[%c0_5, %c0_6] : memref<16x128xbf16, #tpu.memory_space<vmem>>, vector<16x128xbf16>
    %7 = arith.extf %6 : vector<16x128xbf16> to vector<16x128xf32>
    %8 = arith.addf %5, %7 : vector<16x128xf32>
    %cst_7 = arith.constant 0.000000e+00 : f32
    %9 = vector.broadcast %cst_7 : f32 to vector<16x128xf32>
    %10 = arith.maximumf %8, %9 : vector<16x128xf32>
    %11 = arith.truncf %10 : vector<16x128xf32> to vector<16x128xbf16>
    %c0_8 = arith.constant 0 : index
    %c0_9 = arith.constant 0 : index
    %12 = vector.load %arg5[%c0_8, %c0_9] : memref<16x128xbf16, #tpu.memory_space<vmem>>, vector<16x128xbf16>
    tpu.vector_store %arg5[%c0_8, %c0_9], %11 {strides = array<i32>} : memref<16x128xbf16, #tpu.memory_space<vmem>>, vector<16x128xbf16>,
    return
  }
  func.func @transform_0(%arg0: i32) -> (i32, i32) {
    %c0_i32 = arith.constant 0 : i32
    %c0_i32_0 = arith.constant 0 : i32
    %c0_i32_1 = arith.constant 0 : i32
    return %c0_i32, %c0_i32_0 : i32, i32
  }
  func.func @transform_1(%arg0: i32) -> (i32, i32) {
    %c0_i32 = arith.constant 0 : i32
    %c0_i32_0 = arith.constant 0 : i32
    return %c0_i32, %arg0 : i32, i32
  }
  func.func @transform_2(%arg0: i32) -> (i32, i32) {
    %c0_i32 = arith.constant 0 : i32
    %c0_i32_0 = arith.constant 0 : i32
    %c0_i32_1 = arith.constant 0 : i32
    return %c0_i32, %c0_i32_0 : i32, i32
  }
  func.func @transform_3(%arg0: i32) -> (i32, i32) {
    %c0_i32 = arith.constant 0 : i32
    %c0_i32_0 = arith.constant 0 : i32
    return %c0_i32, %arg0 : i32, i32
  }
  func.func @transform_4(%arg0: i32) -> (i32, i32) {
    %c0_i32 = arith.constant 0 : i32
    %c0_i32_0 = arith.constant 0 : i32
    return %c0_i32, %arg0 : i32, i32
  }
}

module attributes {stable_mosaic.version = 11 : i64} {
  func.func @_gemm_bias_kernel(%arg0: i32, %arg1: memref<32x144xbf16, #tpu.memory_space<vmem>>, %arg2: memref<144x128xbf16, #tpu.memory_space<vmem>>, %arg3: memref<32x1xf32, #tpu.memory_space<vmem>>, %arg4: memref<32x128xbf16, #tpu.memory_space<vmem>>) attributes {dimension_semantics = [#tpu.dimension_semantics<parallel>], iteration_bounds = array<i64: 1>, scalar_prefetch = 0 : i64, scratch_operands = 0 : i64, tpu.core_type = #tpu.core_type<tc>, window_params = [{pipeline_mode = #tpu.pipeline_mode<synchronous>, transform_indices = @transform_0, window_bounds = array<i64: 32, 144>}, {transform_indices = @transform_1, window_bounds = array<i64: 144, 128>}, {pipeline_mode = #tpu.pipeline_mode<synchronous>, transform_indices = @transform_2, window_bounds = array<i64: 32, 1>}, {transform_indices = @transform_3, window_bounds = array<i64: 32, 128>}]} {
    %c0 = arith.constant 0 : index
    %c0_0 = arith.constant 0 : index
    %0 = vector.load %arg1[%c0, %c0_0] : memref<32x144xbf16, #tpu.memory_space<vmem>>, vector<32x144xbf16>
    %c0_1 = arith.constant 0 : index
    %c0_2 = arith.constant 0 : index
    %1 = vector.load %arg2[%c0_1, %c0_2] : memref<144x128xbf16, #tpu.memory_space<vmem>>, vector<144x128xbf16>
    %cst = arith.constant dense<0.000000e+00> : vector<32x128xf32>
    %2 = tpu.matmul %0, %1, %cst {dimension_numbers = #tpu.dot_dimension_numbers<[1], [0], [0], [1], [0, 0, 1, 1], [], []>} : vector<32x144xbf16>, vector<144x128xbf16>, vector<32x128xf32> -> vector<32x128xf32>
    %c0_3 = arith.constant 0 : index
    %c0_4 = arith.constant 0 : index
    %3 = vector.load %arg3[%c0_3, %c0_4] : memref<32x1xf32, #tpu.memory_space<vmem>>, vector<32x1xf32>
    %4 = vector.broadcast %3 : vector<32x1xf32> to vector<32x128xf32>
    %5 = arith.addf %2, %4 : vector<32x128xf32>
    %cst_5 = arith.constant 0.000000e+00 : f32
    %6 = vector.broadcast %cst_5 : f32 to vector<32x128xf32>
    %7 = arith.maximumf %5, %6 : vector<32x128xf32>
    %8 = arith.truncf %7 : vector<32x128xf32> to vector<32x128xbf16>
    %c0_6 = arith.constant 0 : index
    %c0_7 = arith.constant 0 : index
    %9 = vector.load %arg4[%c0_6, %c0_7] : memref<32x128xbf16, #tpu.memory_space<vmem>>, vector<32x128xbf16>
    tpu.vector_store %arg4[%c0_6, %c0_7], %8 {strides = array<i32>} : memref<32x128xbf16, #tpu.memory_space<vmem>>, vector<32x128xbf16>,
    return
  }
  func.func @transform_0(%arg0: i32) -> (i32, i32) {
    %c0_i32 = arith.constant 0 : i32
    %c0_i32_0 = arith.constant 0 : i32
    %c0_i32_1 = arith.constant 0 : i32
    return %c0_i32, %c0_i32_0 : i32, i32
  }
  func.func @transform_1(%arg0: i32) -> (i32, i32) {
    %c0_i32 = arith.constant 0 : i32
    %c0_i32_0 = arith.constant 0 : i32
    return %c0_i32, %arg0 : i32, i32
  }
  func.func @transform_2(%arg0: i32) -> (i32, i32) {
    %c0_i32 = arith.constant 0 : i32
    %c0_i32_0 = arith.constant 0 : i32
    %c0_i32_1 = arith.constant 0 : i32
    return %c0_i32, %c0_i32_0 : i32, i32
  }
  func.func @transform_3(%arg0: i32) -> (i32, i32) {
    %c0_i32 = arith.constant 0 : i32
    %c0_i32_0 = arith.constant 0 : i32
    return %c0_i32, %arg0 : i32, i32
  }
}

module attributes {stable_mosaic.version = 11 : i64} {
  func.func @_gemm_bias_kernel(%arg0: i32, %arg1: memref<32x288xbf16, #tpu.memory_space<vmem>>, %arg2: memref<288x128xbf16, #tpu.memory_space<vmem>>, %arg3: memref<32x1xf32, #tpu.memory_space<vmem>>, %arg4: memref<32x128xbf16, #tpu.memory_space<vmem>>) attributes {dimension_semantics = [#tpu.dimension_semantics<parallel>], iteration_bounds = array<i64: 1>, scalar_prefetch = 0 : i64, scratch_operands = 0 : i64, tpu.core_type = #tpu.core_type<tc>, window_params = [{pipeline_mode = #tpu.pipeline_mode<synchronous>, transform_indices = @transform_0, window_bounds = array<i64: 32, 288>}, {transform_indices = @transform_1, window_bounds = array<i64: 288, 128>}, {pipeline_mode = #tpu.pipeline_mode<synchronous>, transform_indices = @transform_2, window_bounds = array<i64: 32, 1>}, {transform_indices = @transform_3, window_bounds = array<i64: 32, 128>}]} {
    %c0 = arith.constant 0 : index
    %c0_0 = arith.constant 0 : index
    %0 = vector.load %arg1[%c0, %c0_0] : memref<32x288xbf16, #tpu.memory_space<vmem>>, vector<32x288xbf16>
    %c0_1 = arith.constant 0 : index
    %c0_2 = arith.constant 0 : index
    %1 = vector.load %arg2[%c0_1, %c0_2] : memref<288x128xbf16, #tpu.memory_space<vmem>>, vector<288x128xbf16>
    %cst = arith.constant dense<0.000000e+00> : vector<32x128xf32>
    %2 = tpu.matmul %0, %1, %cst {dimension_numbers = #tpu.dot_dimension_numbers<[1], [0], [0], [1], [0, 0, 1, 1], [], []>} : vector<32x288xbf16>, vector<288x128xbf16>, vector<32x128xf32> -> vector<32x128xf32>
    %c0_3 = arith.constant 0 : index
    %c0_4 = arith.constant 0 : index
    %3 = vector.load %arg3[%c0_3, %c0_4] : memref<32x1xf32, #tpu.memory_space<vmem>>, vector<32x1xf32>
    %4 = vector.broadcast %3 : vector<32x1xf32> to vector<32x128xf32>
    %5 = arith.addf %2, %4 : vector<32x128xf32>
    %cst_5 = arith.constant 0.000000e+00 : f32
    %6 = vector.broadcast %cst_5 : f32 to vector<32x128xf32>
    %7 = arith.maximumf %5, %6 : vector<32x128xf32>
    %8 = arith.truncf %7 : vector<32x128xf32> to vector<32x128xbf16>
    %c0_6 = arith.constant 0 : index
    %c0_7 = arith.constant 0 : index
    %9 = vector.load %arg4[%c0_6, %c0_7] : memref<32x128xbf16, #tpu.memory_space<vmem>>, vector<32x128xbf16>
    tpu.vector_store %arg4[%c0_6, %c0_7], %8 {strides = array<i32>} : memref<32x128xbf16, #tpu.memory_space<vmem>>, vector<32x128xbf16>,
    return
  }
  func.func @transform_0(%arg0: i32) -> (i32, i32) {
    %c0_i32 = arith.constant 0 : i32
    %c0_i32_0 = arith.constant 0 : i32
    %c0_i32_1 = arith.constant 0 : i32
    return %c0_i32, %c0_i32_0 : i32, i32
  }
  func.func @transform_1(%arg0: i32) -> (i32, i32) {
    %c0_i32 = arith.constant 0 : i32
    %c0_i32_0 = arith.constant 0 : i32
    return %c0_i32, %arg0 : i32, i32
  }
  func.func @transform_2(%arg0: i32) -> (i32, i32) {
    %c0_i32 = arith.constant 0 : i32
    %c0_i32_0 = arith.constant 0 : i32
    %c0_i32_1 = arith.constant 0 : i32
    return %c0_i32, %c0_i32_0 : i32, i32
  }
  func.func @transform_3(%arg0: i32) -> (i32, i32) {
    %c0_i32 = arith.constant 0 : i32
    %c0_i32_0 = arith.constant 0 : i32
    return %c0_i32, %arg0 : i32, i32
  }
}

module attributes {stable_mosaic.version = 11 : i64} {
  func.func @_gemm_bias_down_kernel(%arg0: i32, %arg1: memref<32x288xbf16, #tpu.memory_space<vmem>>, %arg2: memref<288x128xbf16, #tpu.memory_space<vmem>>, %arg3: memref<32x1xf32, #tpu.memory_space<vmem>>, %arg4: memref<32x16xbf16, #tpu.memory_space<vmem>>, %arg5: memref<16x128xbf16, #tpu.memory_space<vmem>>, %arg6: memref<32x128xbf16, #tpu.memory_space<vmem>>) attributes {dimension_semantics = [#tpu.dimension_semantics<parallel>], iteration_bounds = array<i64: 1>, scalar_prefetch = 0 : i64, scratch_operands = 0 : i64, tpu.core_type = #tpu.core_type<tc>, window_params = [{pipeline_mode = #tpu.pipeline_mode<synchronous>, transform_indices = @transform_0, window_bounds = array<i64: 32, 288>}, {transform_indices = @transform_1, window_bounds = array<i64: 288, 128>}, {pipeline_mode = #tpu.pipeline_mode<synchronous>, transform_indices = @transform_2, window_bounds = array<i64: 32, 1>}, {pipeline_mode = #tpu.pipeline_mode<synchronous>, transform_indices = @transform_3, window_bounds = array<i64: 32, 16>}, {transform_indices = @transform_4, window_bounds = array<i64: 16, 128>}, {transform_indices = @transform_5, window_bounds = array<i64: 32, 128>}]} {
    %c0 = arith.constant 0 : index
    %c0_0 = arith.constant 0 : index
    %0 = vector.load %arg1[%c0, %c0_0] : memref<32x288xbf16, #tpu.memory_space<vmem>>, vector<32x288xbf16>
    %c0_1 = arith.constant 0 : index
    %c0_2 = arith.constant 0 : index
    %1 = vector.load %arg2[%c0_1, %c0_2] : memref<288x128xbf16, #tpu.memory_space<vmem>>, vector<288x128xbf16>
    %cst = arith.constant dense<0.000000e+00> : vector<32x128xf32>
    %2 = tpu.matmul %0, %1, %cst {dimension_numbers = #tpu.dot_dimension_numbers<[1], [0], [0], [1], [0, 0, 1, 1], [], []>} : vector<32x288xbf16>, vector<288x128xbf16>, vector<32x128xf32> -> vector<32x128xf32>
    %c0_3 = arith.constant 0 : index
    %c0_4 = arith.constant 0 : index
    %3 = vector.load %arg4[%c0_3, %c0_4] : memref<32x16xbf16, #tpu.memory_space<vmem>>, vector<32x16xbf16>
    %c0_5 = arith.constant 0 : index
    %c0_6 = arith.constant 0 : index
    %4 = vector.load %arg5[%c0_5, %c0_6] : memref<16x128xbf16, #tpu.memory_space<vmem>>, vector<16x128xbf16>
    %cst_7 = arith.constant dense<0.000000e+00> : vector<32x128xf32>
    %5 = tpu.matmul %3, %4, %cst_7 {dimension_numbers = #tpu.dot_dimension_numbers<[1], [0], [0], [1], [0, 0, 1, 1], [], []>} : vector<32x16xbf16>, vector<16x128xbf16>, vector<32x128xf32> -> vector<32x128xf32>
    %6 = arith.addf %2, %5 : vector<32x128xf32>
    %c0_8 = arith.constant 0 : index
    %c0_9 = arith.constant 0 : index
    %7 = vector.load %arg3[%c0_8, %c0_9] : memref<32x1xf32, #tpu.memory_space<vmem>>, vector<32x1xf32>
    %8 = vector.broadcast %7 : vector<32x1xf32> to vector<32x128xf32>
    %9 = arith.addf %6, %8 : vector<32x128xf32>
    %cst_10 = arith.constant 0.000000e+00 : f32
    %10 = vector.broadcast %cst_10 : f32 to vector<32x128xf32>
    %11 = arith.maximumf %9, %10 : vector<32x128xf32>
    %12 = arith.truncf %11 : vector<32x128xf32> to vector<32x128xbf16>
    %c0_11 = arith.constant 0 : index
    %c0_12 = arith.constant 0 : index
    %13 = vector.load %arg6[%c0_11, %c0_12] : memref<32x128xbf16, #tpu.memory_space<vmem>>, vector<32x128xbf16>
    tpu.vector_store %arg6[%c0_11, %c0_12], %12 {strides = array<i32>} : memref<32x128xbf16, #tpu.memory_space<vmem>>, vector<32x128xbf16>,
    return
  }
  func.func @transform_0(%arg0: i32) -> (i32, i32) {
    %c0_i32 = arith.constant 0 : i32
    %c0_i32_0 = arith.constant 0 : i32
    %c0_i32_1 = arith.constant 0 : i32
    return %c0_i32, %c0_i32_0 : i32, i32
  }
  func.func @transform_1(%arg0: i32) -> (i32, i32) {
    %c0_i32 = arith.constant 0 : i32
    %c0_i32_0 = arith.constant 0 : i32
    return %c0_i32, %arg0 : i32, i32
  }
  func.func @transform_2(%arg0: i32) -> (i32, i32) {
    %c0_i32 = arith.constant 0 : i32
    %c0_i32_0 = arith.constant 0 : i32
    %c0_i32_1 = arith.constant 0 : i32
    return %c0_i32, %c0_i32_0 : i32, i32
  }
  func.func @transform_3(%arg0: i32) -> (i32, i32) {
    %c0_i32 = arith.constant 0 : i32
    %c0_i32_0 = arith.constant 0 : i32
    %c0_i32_1 = arith.constant 0 : i32
    return %c0_i32, %c0_i32_0 : i32, i32
  }
  func.func @transform_4(%arg0: i32) -> (i32, i32) {
    %c0_i32 = arith.constant 0 : i32
    %c0_i32_0 = arith.constant 0 : i32
    return %c0_i32, %arg0 : i32, i32
  }
  func.func @transform_5(%arg0: i32) -> (i32, i32) {
    %c0_i32 = arith.constant 0 : i32
    %c0_i32_0 = arith.constant 0 : i32
    return %c0_i32, %arg0 : i32, i32
  }
}

module attributes {stable_mosaic.version = 11 : i64} {
  func.func @_gemm_bias_res_kernel(%arg0: i32, %arg1: memref<32x288xbf16, #tpu.memory_space<vmem>>, %arg2: memref<288x128xbf16, #tpu.memory_space<vmem>>, %arg3: memref<32x1xf32, #tpu.memory_space<vmem>>, %arg4: memref<32x128xbf16, #tpu.memory_space<vmem>>, %arg5: memref<32x128xbf16, #tpu.memory_space<vmem>>) attributes {dimension_semantics = [#tpu.dimension_semantics<parallel>], iteration_bounds = array<i64: 1>, scalar_prefetch = 0 : i64, scratch_operands = 0 : i64, tpu.core_type = #tpu.core_type<tc>, window_params = [{pipeline_mode = #tpu.pipeline_mode<synchronous>, transform_indices = @transform_0, window_bounds = array<i64: 32, 288>}, {transform_indices = @transform_1, window_bounds = array<i64: 288, 128>}, {pipeline_mode = #tpu.pipeline_mode<synchronous>, transform_indices = @transform_2, window_bounds = array<i64: 32, 1>}, {transform_indices = @transform_3, window_bounds = array<i64: 32, 128>}, {transform_indices = @transform_4, window_bounds = array<i64: 32, 128>}]} {
    %c0 = arith.constant 0 : index
    %c0_0 = arith.constant 0 : index
    %0 = vector.load %arg1[%c0, %c0_0] : memref<32x288xbf16, #tpu.memory_space<vmem>>, vector<32x288xbf16>
    %c0_1 = arith.constant 0 : index
    %c0_2 = arith.constant 0 : index
    %1 = vector.load %arg2[%c0_1, %c0_2] : memref<288x128xbf16, #tpu.memory_space<vmem>>, vector<288x128xbf16>
    %cst = arith.constant dense<0.000000e+00> : vector<32x128xf32>
    %2 = tpu.matmul %0, %1, %cst {dimension_numbers = #tpu.dot_dimension_numbers<[1], [0], [0], [1], [0, 0, 1, 1], [], []>} : vector<32x288xbf16>, vector<288x128xbf16>, vector<32x128xf32> -> vector<32x128xf32>
    %c0_3 = arith.constant 0 : index
    %c0_4 = arith.constant 0 : index
    %3 = vector.load %arg3[%c0_3, %c0_4] : memref<32x1xf32, #tpu.memory_space<vmem>>, vector<32x1xf32>
    %4 = vector.broadcast %3 : vector<32x1xf32> to vector<32x128xf32>
    %5 = arith.addf %2, %4 : vector<32x128xf32>
    %c0_5 = arith.constant 0 : index
    %c0_6 = arith.constant 0 : index
    %6 = vector.load %arg4[%c0_5, %c0_6] : memref<32x128xbf16, #tpu.memory_space<vmem>>, vector<32x128xbf16>
    %7 = arith.extf %6 : vector<32x128xbf16> to vector<32x128xf32>
    %8 = arith.addf %5, %7 : vector<32x128xf32>
    %cst_7 = arith.constant 0.000000e+00 : f32
    %9 = vector.broadcast %cst_7 : f32 to vector<32x128xf32>
    %10 = arith.maximumf %8, %9 : vector<32x128xf32>
    %11 = arith.truncf %10 : vector<32x128xf32> to vector<32x128xbf16>
    %c0_8 = arith.constant 0 : index
    %c0_9 = arith.constant 0 : index
    %12 = vector.load %arg5[%c0_8, %c0_9] : memref<32x128xbf16, #tpu.memory_space<vmem>>, vector<32x128xbf16>
    tpu.vector_store %arg5[%c0_8, %c0_9], %11 {strides = array<i32>} : memref<32x128xbf16, #tpu.memory_space<vmem>>, vector<32x128xbf16>,
    return
  }
  func.func @transform_0(%arg0: i32) -> (i32, i32) {
    %c0_i32 = arith.constant 0 : i32
    %c0_i32_0 = arith.constant 0 : i32
    %c0_i32_1 = arith.constant 0 : i32
    return %c0_i32, %c0_i32_0 : i32, i32
  }
  func.func @transform_1(%arg0: i32) -> (i32, i32) {
    %c0_i32 = arith.constant 0 : i32
    %c0_i32_0 = arith.constant 0 : i32
    return %c0_i32, %arg0 : i32, i32
  }
  func.func @transform_2(%arg0: i32) -> (i32, i32) {
    %c0_i32 = arith.constant 0 : i32
    %c0_i32_0 = arith.constant 0 : i32
    %c0_i32_1 = arith.constant 0 : i32
    return %c0_i32, %c0_i32_0 : i32, i32
  }
  func.func @transform_3(%arg0: i32) -> (i32, i32) {
    %c0_i32 = arith.constant 0 : i32
    %c0_i32_0 = arith.constant 0 : i32
    return %c0_i32, %arg0 : i32, i32
  }
  func.func @transform_4(%arg0: i32) -> (i32, i32) {
    %c0_i32 = arith.constant 0 : i32
    %c0_i32_0 = arith.constant 0 : i32
    return %c0_i32, %arg0 : i32, i32
  }
}

module attributes {stable_mosaic.version = 11 : i64} {
  func.func @_gemm_bias_kernel(%arg0: i32, %arg1: memref<64x288xbf16, #tpu.memory_space<vmem>>, %arg2: memref<288x128xbf16, #tpu.memory_space<vmem>>, %arg3: memref<64x1xf32, #tpu.memory_space<vmem>>, %arg4: memref<64x128xbf16, #tpu.memory_space<vmem>>) attributes {dimension_semantics = [#tpu.dimension_semantics<parallel>], iteration_bounds = array<i64: 1>, scalar_prefetch = 0 : i64, scratch_operands = 0 : i64, tpu.core_type = #tpu.core_type<tc>, window_params = [{pipeline_mode = #tpu.pipeline_mode<synchronous>, transform_indices = @transform_0, window_bounds = array<i64: 64, 288>}, {transform_indices = @transform_1, window_bounds = array<i64: 288, 128>}, {pipeline_mode = #tpu.pipeline_mode<synchronous>, transform_indices = @transform_2, window_bounds = array<i64: 64, 1>}, {transform_indices = @transform_3, window_bounds = array<i64: 64, 128>}]} {
    %c0 = arith.constant 0 : index
    %c0_0 = arith.constant 0 : index
    %0 = vector.load %arg1[%c0, %c0_0] : memref<64x288xbf16, #tpu.memory_space<vmem>>, vector<64x288xbf16>
    %c0_1 = arith.constant 0 : index
    %c0_2 = arith.constant 0 : index
    %1 = vector.load %arg2[%c0_1, %c0_2] : memref<288x128xbf16, #tpu.memory_space<vmem>>, vector<288x128xbf16>
    %cst = arith.constant dense<0.000000e+00> : vector<64x128xf32>
    %2 = tpu.matmul %0, %1, %cst {dimension_numbers = #tpu.dot_dimension_numbers<[1], [0], [0], [1], [0, 0, 1, 1], [], []>} : vector<64x288xbf16>, vector<288x128xbf16>, vector<64x128xf32> -> vector<64x128xf32>
    %c0_3 = arith.constant 0 : index
    %c0_4 = arith.constant 0 : index
    %3 = vector.load %arg3[%c0_3, %c0_4] : memref<64x1xf32, #tpu.memory_space<vmem>>, vector<64x1xf32>
    %4 = vector.broadcast %3 : vector<64x1xf32> to vector<64x128xf32>
    %5 = arith.addf %2, %4 : vector<64x128xf32>
    %cst_5 = arith.constant 0.000000e+00 : f32
    %6 = vector.broadcast %cst_5 : f32 to vector<64x128xf32>
    %7 = arith.maximumf %5, %6 : vector<64x128xf32>
    %8 = arith.truncf %7 : vector<64x128xf32> to vector<64x128xbf16>
    %c0_6 = arith.constant 0 : index
    %c0_7 = arith.constant 0 : index
    %9 = vector.load %arg4[%c0_6, %c0_7] : memref<64x128xbf16, #tpu.memory_space<vmem>>, vector<64x128xbf16>
    tpu.vector_store %arg4[%c0_6, %c0_7], %8 {strides = array<i32>} : memref<64x128xbf16, #tpu.memory_space<vmem>>, vector<64x128xbf16>,
    return
  }
  func.func @transform_0(%arg0: i32) -> (i32, i32) {
    %c0_i32 = arith.constant 0 : i32
    %c0_i32_0 = arith.constant 0 : i32
    %c0_i32_1 = arith.constant 0 : i32
    return %c0_i32, %c0_i32_0 : i32, i32
  }
  func.func @transform_1(%arg0: i32) -> (i32, i32) {
    %c0_i32 = arith.constant 0 : i32
    %c0_i32_0 = arith.constant 0 : i32
    return %c0_i32, %arg0 : i32, i32
  }
  func.func @transform_2(%arg0: i32) -> (i32, i32) {
    %c0_i32 = arith.constant 0 : i32
    %c0_i32_0 = arith.constant 0 : i32
    %c0_i32_1 = arith.constant 0 : i32
    return %c0_i32, %c0_i32_0 : i32, i32
  }
  func.func @transform_3(%arg0: i32) -> (i32, i32) {
    %c0_i32 = arith.constant 0 : i32
    %c0_i32_0 = arith.constant 0 : i32
    return %c0_i32, %arg0 : i32, i32
  }
}

module attributes {stable_mosaic.version = 11 : i64} {
  func.func @_gemm_bias_down_kernel(%arg0: i32, %arg1: memref<64x576xbf16, #tpu.memory_space<vmem>>, %arg2: memref<576x128xbf16, #tpu.memory_space<vmem>>, %arg3: memref<64x1xf32, #tpu.memory_space<vmem>>, %arg4: memref<64x32xbf16, #tpu.memory_space<vmem>>, %arg5: memref<32x128xbf16, #tpu.memory_space<vmem>>, %arg6: memref<64x128xbf16, #tpu.memory_space<vmem>>) attributes {dimension_semantics = [#tpu.dimension_semantics<parallel>], iteration_bounds = array<i64: 1>, scalar_prefetch = 0 : i64, scratch_operands = 0 : i64, tpu.core_type = #tpu.core_type<tc>, window_params = [{pipeline_mode = #tpu.pipeline_mode<synchronous>, transform_indices = @transform_0, window_bounds = array<i64: 64, 576>}, {transform_indices = @transform_1, window_bounds = array<i64: 576, 128>}, {pipeline_mode = #tpu.pipeline_mode<synchronous>, transform_indices = @transform_2, window_bounds = array<i64: 64, 1>}, {pipeline_mode = #tpu.pipeline_mode<synchronous>, transform_indices = @transform_3, window_bounds = array<i64: 64, 32>}, {transform_indices = @transform_4, window_bounds = array<i64: 32, 128>}, {transform_indices = @transform_5, window_bounds = array<i64: 64, 128>}]} {
    %c0 = arith.constant 0 : index
    %c0_0 = arith.constant 0 : index
    %0 = vector.load %arg1[%c0, %c0_0] : memref<64x576xbf16, #tpu.memory_space<vmem>>, vector<64x576xbf16>
    %c0_1 = arith.constant 0 : index
    %c0_2 = arith.constant 0 : index
    %1 = vector.load %arg2[%c0_1, %c0_2] : memref<576x128xbf16, #tpu.memory_space<vmem>>, vector<576x128xbf16>
    %cst = arith.constant dense<0.000000e+00> : vector<64x128xf32>
    %2 = tpu.matmul %0, %1, %cst {dimension_numbers = #tpu.dot_dimension_numbers<[1], [0], [0], [1], [0, 0, 1, 1], [], []>} : vector<64x576xbf16>, vector<576x128xbf16>, vector<64x128xf32> -> vector<64x128xf32>
    %c0_3 = arith.constant 0 : index
    %c0_4 = arith.constant 0 : index
    %3 = vector.load %arg4[%c0_3, %c0_4] : memref<64x32xbf16, #tpu.memory_space<vmem>>, vector<64x32xbf16>
    %c0_5 = arith.constant 0 : index
    %c0_6 = arith.constant 0 : index
    %4 = vector.load %arg5[%c0_5, %c0_6] : memref<32x128xbf16, #tpu.memory_space<vmem>>, vector<32x128xbf16>
    %cst_7 = arith.constant dense<0.000000e+00> : vector<64x128xf32>
    %5 = tpu.matmul %3, %4, %cst_7 {dimension_numbers = #tpu.dot_dimension_numbers<[1], [0], [0], [1], [0, 0, 1, 1], [], []>} : vector<64x32xbf16>, vector<32x128xbf16>, vector<64x128xf32> -> vector<64x128xf32>
    %6 = arith.addf %2, %5 : vector<64x128xf32>
    %c0_8 = arith.constant 0 : index
    %c0_9 = arith.constant 0 : index
    %7 = vector.load %arg3[%c0_8, %c0_9] : memref<64x1xf32, #tpu.memory_space<vmem>>, vector<64x1xf32>
    %8 = vector.broadcast %7 : vector<64x1xf32> to vector<64x128xf32>
    %9 = arith.addf %6, %8 : vector<64x128xf32>
    %cst_10 = arith.constant 0.000000e+00 : f32
    %10 = vector.broadcast %cst_10 : f32 to vector<64x128xf32>
    %11 = arith.maximumf %9, %10 : vector<64x128xf32>
    %12 = arith.truncf %11 : vector<64x128xf32> to vector<64x128xbf16>
    %c0_11 = arith.constant 0 : index
    %c0_12 = arith.constant 0 : index
    %13 = vector.load %arg6[%c0_11, %c0_12] : memref<64x128xbf16, #tpu.memory_space<vmem>>, vector<64x128xbf16>
    tpu.vector_store %arg6[%c0_11, %c0_12], %12 {strides = array<i32>} : memref<64x128xbf16, #tpu.memory_space<vmem>>, vector<64x128xbf16>,
    return
  }
  func.func @transform_0(%arg0: i32) -> (i32, i32) {
    %c0_i32 = arith.constant 0 : i32
    %c0_i32_0 = arith.constant 0 : i32
    %c0_i32_1 = arith.constant 0 : i32
    return %c0_i32, %c0_i32_0 : i32, i32
  }
  func.func @transform_1(%arg0: i32) -> (i32, i32) {
    %c0_i32 = arith.constant 0 : i32
    %c0_i32_0 = arith.constant 0 : i32
    return %c0_i32, %arg0 : i32, i32
  }
  func.func @transform_2(%arg0: i32) -> (i32, i32) {
    %c0_i32 = arith.constant 0 : i32
    %c0_i32_0 = arith.constant 0 : i32
    %c0_i32_1 = arith.constant 0 : i32
    return %c0_i32, %c0_i32_0 : i32, i32
  }
  func.func @transform_3(%arg0: i32) -> (i32, i32) {
    %c0_i32 = arith.constant 0 : i32
    %c0_i32_0 = arith.constant 0 : i32
    %c0_i32_1 = arith.constant 0 : i32
    return %c0_i32, %c0_i32_0 : i32, i32
  }
  func.func @transform_4(%arg0: i32) -> (i32, i32) {
    %c0_i32 = arith.constant 0 : i32
    %c0_i32_0 = arith.constant 0 : i32
    return %c0_i32, %arg0 : i32, i32
  }
  func.func @transform_5(%arg0: i32) -> (i32, i32) {
    %c0_i32 = arith.constant 0 : i32
    %c0_i32_0 = arith.constant 0 : i32
    return %c0_i32, %arg0 : i32, i32
  }
}

module attributes {stable_mosaic.version = 11 : i64} {
  func.func @_gemm_bias_kernel(%arg0: i32, %arg1: memref<64x576xbf16, #tpu.memory_space<vmem>>, %arg2: memref<576x128xbf16, #tpu.memory_space<vmem>>, %arg3: memref<64x1xf32, #tpu.memory_space<vmem>>, %arg4: memref<64x128xbf16, #tpu.memory_space<vmem>>) attributes {dimension_semantics = [#tpu.dimension_semantics<parallel>], iteration_bounds = array<i64: 1>, scalar_prefetch = 0 : i64, scratch_operands = 0 : i64, tpu.core_type = #tpu.core_type<tc>, window_params = [{pipeline_mode = #tpu.pipeline_mode<synchronous>, transform_indices = @transform_0, window_bounds = array<i64: 64, 576>}, {transform_indices = @transform_1, window_bounds = array<i64: 576, 128>}, {pipeline_mode = #tpu.pipeline_mode<synchronous>, transform_indices = @transform_2, window_bounds = array<i64: 64, 1>}, {transform_indices = @transform_3, window_bounds = array<i64: 64, 128>}]} {
    %c0 = arith.constant 0 : index
    %c0_0 = arith.constant 0 : index
    %0 = vector.load %arg1[%c0, %c0_0] : memref<64x576xbf16, #tpu.memory_space<vmem>>, vector<64x576xbf16>
    %c0_1 = arith.constant 0 : index
    %c0_2 = arith.constant 0 : index
    %1 = vector.load %arg2[%c0_1, %c0_2] : memref<576x128xbf16, #tpu.memory_space<vmem>>, vector<576x128xbf16>
    %cst = arith.constant dense<0.000000e+00> : vector<64x128xf32>
    %2 = tpu.matmul %0, %1, %cst {dimension_numbers = #tpu.dot_dimension_numbers<[1], [0], [0], [1], [0, 0, 1, 1], [], []>} : vector<64x576xbf16>, vector<576x128xbf16>, vector<64x128xf32> -> vector<64x128xf32>
    %c0_3 = arith.constant 0 : index
    %c0_4 = arith.constant 0 : index
    %3 = vector.load %arg3[%c0_3, %c0_4] : memref<64x1xf32, #tpu.memory_space<vmem>>, vector<64x1xf32>
    %4 = vector.broadcast %3 : vector<64x1xf32> to vector<64x128xf32>
    %5 = arith.addf %2, %4 : vector<64x128xf32>
    %cst_5 = arith.constant 0.000000e+00 : f32
    %6 = vector.broadcast %cst_5 : f32 to vector<64x128xf32>
    %7 = arith.maximumf %5, %6 : vector<64x128xf32>
    %8 = arith.truncf %7 : vector<64x128xf32> to vector<64x128xbf16>
    %c0_6 = arith.constant 0 : index
    %c0_7 = arith.constant 0 : index
    %9 = vector.load %arg4[%c0_6, %c0_7] : memref<64x128xbf16, #tpu.memory_space<vmem>>, vector<64x128xbf16>
    tpu.vector_store %arg4[%c0_6, %c0_7], %8 {strides = array<i32>} : memref<64x128xbf16, #tpu.memory_space<vmem>>, vector<64x128xbf16>,
    return
  }
  func.func @transform_0(%arg0: i32) -> (i32, i32) {
    %c0_i32 = arith.constant 0 : i32
    %c0_i32_0 = arith.constant 0 : i32
    %c0_i32_1 = arith.constant 0 : i32
    return %c0_i32, %c0_i32_0 : i32, i32
  }
  func.func @transform_1(%arg0: i32) -> (i32, i32) {
    %c0_i32 = arith.constant 0 : i32
    %c0_i32_0 = arith.constant 0 : i32
    return %c0_i32, %arg0 : i32, i32
  }
  func.func @transform_2(%arg0: i32) -> (i32, i32) {
    %c0_i32 = arith.constant 0 : i32
    %c0_i32_0 = arith.constant 0 : i32
    %c0_i32_1 = arith.constant 0 : i32
    return %c0_i32, %c0_i32_0 : i32, i32
  }
  func.func @transform_3(%arg0: i32) -> (i32, i32) {
    %c0_i32 = arith.constant 0 : i32
    %c0_i32_0 = arith.constant 0 : i32
    return %c0_i32, %arg0 : i32, i32
  }
}

module attributes {stable_mosaic.version = 11 : i64} {
  func.func @_gemm_bias_res_kernel(%arg0: i32, %arg1: memref<64x576xbf16, #tpu.memory_space<vmem>>, %arg2: memref<576x128xbf16, #tpu.memory_space<vmem>>, %arg3: memref<64x1xf32, #tpu.memory_space<vmem>>, %arg4: memref<64x128xbf16, #tpu.memory_space<vmem>>, %arg5: memref<64x128xbf16, #tpu.memory_space<vmem>>) attributes {dimension_semantics = [#tpu.dimension_semantics<parallel>], iteration_bounds = array<i64: 1>, scalar_prefetch = 0 : i64, scratch_operands = 0 : i64, tpu.core_type = #tpu.core_type<tc>, window_params = [{pipeline_mode = #tpu.pipeline_mode<synchronous>, transform_indices = @transform_0, window_bounds = array<i64: 64, 576>}, {transform_indices = @transform_1, window_bounds = array<i64: 576, 128>}, {pipeline_mode = #tpu.pipeline_mode<synchronous>, transform_indices = @transform_2, window_bounds = array<i64: 64, 1>}, {transform_indices = @transform_3, window_bounds = array<i64: 64, 128>}, {transform_indices = @transform_4, window_bounds = array<i64: 64, 128>}]} {
    %c0 = arith.constant 0 : index
    %c0_0 = arith.constant 0 : index
    %0 = vector.load %arg1[%c0, %c0_0] : memref<64x576xbf16, #tpu.memory_space<vmem>>, vector<64x576xbf16>
    %c0_1 = arith.constant 0 : index
    %c0_2 = arith.constant 0 : index
    %1 = vector.load %arg2[%c0_1, %c0_2] : memref<576x128xbf16, #tpu.memory_space<vmem>>, vector<576x128xbf16>
    %cst = arith.constant dense<0.000000e+00> : vector<64x128xf32>
    %2 = tpu.matmul %0, %1, %cst {dimension_numbers = #tpu.dot_dimension_numbers<[1], [0], [0], [1], [0, 0, 1, 1], [], []>} : vector<64x576xbf16>, vector<576x128xbf16>, vector<64x128xf32> -> vector<64x128xf32>
    %c0_3 = arith.constant 0 : index
    %c0_4 = arith.constant 0 : index
    %3 = vector.load %arg3[%c0_3, %c0_4] : memref<64x1xf32, #tpu.memory_space<vmem>>, vector<64x1xf32>
    %4 = vector.broadcast %3 : vector<64x1xf32> to vector<64x128xf32>
    %5 = arith.addf %2, %4 : vector<64x128xf32>
    %c0_5 = arith.constant 0 : index
    %c0_6 = arith.constant 0 : index
    %6 = vector.load %arg4[%c0_5, %c0_6] : memref<64x128xbf16, #tpu.memory_space<vmem>>, vector<64x128xbf16>
    %7 = arith.extf %6 : vector<64x128xbf16> to vector<64x128xf32>
    %8 = arith.addf %5, %7 : vector<64x128xf32>
    %cst_7 = arith.constant 0.000000e+00 : f32
    %9 = vector.broadcast %cst_7 : f32 to vector<64x128xf32>
    %10 = arith.maximumf %8, %9 : vector<64x128xf32>
    %11 = arith.truncf %10 : vector<64x128xf32> to vector<64x128xbf16>
    %c0_8 = arith.constant 0 : index
    %c0_9 = arith.constant 0 : index
    %12 = vector.load %arg5[%c0_8, %c0_9] : memref<64x128xbf16, #tpu.memory_space<vmem>>, vector<64x128xbf16>
    tpu.vector_store %arg5[%c0_8, %c0_9], %11 {strides = array<i32>} : memref<64x128xbf16, #tpu.memory_space<vmem>>, vector<64x128xbf16>,
    return
  }
  func.func @transform_0(%arg0: i32) -> (i32, i32) {
    %c0_i32 = arith.constant 0 : i32
    %c0_i32_0 = arith.constant 0 : i32
    %c0_i32_1 = arith.constant 0 : i32
    return %c0_i32, %c0_i32_0 : i32, i32
  }
  func.func @transform_1(%arg0: i32) -> (i32, i32) {
    %c0_i32 = arith.constant 0 : i32
    %c0_i32_0 = arith.constant 0 : i32
    return %c0_i32, %arg0 : i32, i32
  }
  func.func @transform_2(%arg0: i32) -> (i32, i32) {
    %c0_i32 = arith.constant 0 : i32
    %c0_i32_0 = arith.constant 0 : i32
    %c0_i32_1 = arith.constant 0 : i32
    return %c0_i32, %c0_i32_0 : i32, i32
  }
  func.func @transform_3(%arg0: i32) -> (i32, i32) {
    %c0_i32 = arith.constant 0 : i32
    %c0_i32_0 = arith.constant 0 : i32
    return %c0_i32, %arg0 : i32, i32
  }
  func.func @transform_4(%arg0: i32) -> (i32, i32) {
    %c0_i32 = arith.constant 0 : i32
    %c0_i32_0 = arith.constant 0 : i32
    return %c0_i32, %arg0 : i32, i32
  }
}

</mosaic_0001>

<bundles_post_ra>
// kernel: _lambda_.20
= control target key start
LH: loop header
LB: loop body
LE: loop exit
PB: predicated region body
PF: predicated region fallthrough
CT: control target
= control target key end

     0   :  { %s466_s12 = smov 0   ;;  %s468_s13 = smov 0   ;;  %s524_s0 = inlined_call_operand.vmem [shape: bf16[8,27], index: 0, kind: input, shape index: {}]   ;;  %s525_s1 = inlined_call_operand.vmem [shape: bf16[27,512], index: 1, kind: input, shape index: {}]   ;;  %s526_s2 = inlined_call_operand.vmem [shape: f32[8,1], index: 2, kind: input, shape index: {}]   ;;  %s527_s3 = inlined_call_operand.vmem [shape: bf16[8,512], index: 3, kind: output, shape index: {}]  }
   0x1   :  { %s470_s14 = smov 0  }
   0x2 LB: > { %s357_s15 = sadd.s32 4294967295, %s442_s14   ;;  %s483_s16 = sadd.s32 1, %s442_s14   ;;  %s442_s14 = sphi %s470_s14, %s530_s14   ;;  %s438_s13 = sphi %s468_s13, %s529_s13   ;;  %s434_s12 = sphi %s466_s12, %s528_s12  }
   0x3   : > { %s38_s17 = ssub.s32 %s442_s14, %s483_s16  ;;  %s41_s18 = sadd.s32 1, %s438_s13 }
   0x4   : > { %p39_p0 = scmp.eq.s32.totalorder %s38_s17, 0  ;;  %p48_p1 = scmp.ne.s32.totalorder %s438_s13, %s434_s12 }
   0x5   : > { %p49_p2 = scmp.eq.s32.totalorder %s442_s14, 0  ;;  %p360_p4 = scmp.ge.s32.totalorder %s442_s14, 2 }
   0x6   : > { %s492_s19 = scalar_select %p39_p0, %s438_s13, %s41_s18  }
   0x7   : > { %p50_p3 = por %p49_p2, %p48_p1  ;;  %127 = sbr.rel (%p360_p4) target bundleno = 20 (0x14), region = 24 }
   0xc   : > { %130 = sbr.rel (!%p50_p3) target bundleno = 20 (0x14), region = 28  ;;  %s132_s20 = sand.u32 (%p50_p3), 1, %s438_s13  }
   0xd   : > { %s388_s21 = sshll.u32 (%p50_p3), %s442_s14, 3  ;;  %s361_s22 = sshll.u32 (%p50_p3), %s132_s20, 5 }
   0xe   : > { %s137_s25 = scalar_lea.vmem (%p50_p3), %s525_s1, %s388_s21  ;;  %s134_s26 = scalar_lea.vmem (%p50_p3), [#allocation2], %s361_s22 }
   0xf   : > { %v172_v0 = vld [vmem:[%s137_s25] sm:$0xff] (%p50_p3)  ;;  %v174_v1 = vld [vmem:[%s137_s25 + $0x10] sm:$0xff] (%p50_p3) }
  0x10   : > { %v176_v2 = vld [vmem:[%s137_s25 + $0x20] sm:$0xff] (%p50_p3)  ;;  %173 = vst [vmem:[%s134_s26] sm:$0xff] (%p50_p3), %v172_v0  ;;  %v178_v3 = vld [vmem:[%s137_s25 + $0x30] sm:$0xff] (%p50_p3) }
  0x11   : > { %175 = vst [vmem:[%s134_s26 + $0x8] sm:$0xff] %v174_v1 }
  0x12   : > { %177 = vst [vmem:[%s134_s26 + $0x10] sm:$0xff] %v176_v2 }
  0x13   : > { %179 = vst [vmem:[%s134_s26 + $0x18] sm:$0xff] %v178_v3 }
  0x14 PF: > { %p364_p5 = scmp.ge.s32.totalorder %s442_s14, 1  ;;  %p184_p6 = scmp.lt.s32.totalorder %s442_s14, 3 }
  0x16   : > { %p185_p7 = pnand %p364_p5, %p184_p6 }
  0x17   : > { %s191_s27 = sand.u32 (!%p185_p7), 1, %s434_s12   ;;  %s366_s7 = sshll.u32 (!%p185_p7), %s357_s15, 1 }
  0x18   : > { %188 = sbr.rel (%p185_p7) target bundleno = 177 (0xb1), region = 66  ;;  %s365_s28 = sshll.u32 (!%p185_p7), %s191_s27, 5 }
  0x19   : > { %s193_s4 = scalar_lea.vmem (!%p185_p7), [#allocation2], %s365_s28  ;;  %p216_p8 = scmp.lt.s32.totalorder (!%p185_p7), %s366_s7, 3 }
  0x1d   : > { %vm255_vm0 = vcmask 1044480   ;;  %vm256_vm1 = vcmask 1045504   ;;  %v444_v4 = vmov 65535   ;;  %v227_v6 = vld [vmem:[%s526_s2] sm:$0xff]  ;;  %v445_v8 = vmov 0   ;;  %s532_s7 = smov (!%p216_p8, %s366_s7), 3 }
  0x1e   : > { %v257_v5 = vsel %vm255_vm0, 4294967295, %v444_v4  ;;  %419 = vset.pattern.permute.xlu0 %v445_v8  ;;  %v378_v9 = vld [vmem:[%s193_s4 + $0x10] sm:$0xf]  ;;  %v392_v10 = vld [vmem:[%s193_s4 + $0x14] sm:$0x30]  ;;  %vm251_vm2 = vcmask 220160  }
  0x1f   : > { %v258_v7 = vsel %vm256_vm1, %v257_v5, 0  ;;  %v391_v11 = vld [vmem:[%s193_s4 + $0x14] sm:$0xf]  ;;  %230 = vperm.xlu0 %419, %v227_v6   ;;  %v379_v12 = vor.u32 %v392_v10, %v378_v9  ;;  %v380_v13 = vld [vmem:[%s193_s4 + $0x18] sm:$0x30]  ;;  %s367_s8 = sshll.u32 %s532_s7, 2 }
  0x20   : > { %v383_v14 = vor.u32 %v391_v11, %v380_v13  ;;  %v370_v15 = vld [vmem:[%s193_s4] sm:$0xf]  ;;  %v390_v16 = vld [vmem:[%s193_s4 + $0x4] sm:$0xf0]  ;;  %v389_v18 = vld [vmem:[%s193_s4 + $0x4] sm:$0xf]  ;;  %s219_s11 = scalar_lea.vmem %s527_s3, %s367_s8 }
  0x21   : > { %v260_v17 = vand.u32 %v379_v12, %v258_v7  ;;  %v372_v19 = vld [vmem:[%s193_s4 + $0x8] sm:$0xf0]  ;;  %v371_v21 = vor.u32 %v390_v16, %v370_v15  ;;  %v222_v23 = vld [vmem:[%s524_s0] sm:$0xf] }
  0x22   : > { %v263_v20 = vand.u32 %v383_v14, %v258_v7  ;;  %v375_v22 = vor.u32 %v389_v18, %v372_v19 }
  0x23   : > { %271 = vmatpush.bf16.msra.mxu0 %v260_v17 }
  0x24   : > { %284 = vmatpush.bf16.msra.mxu1 %v263_v20 }
  0x27   : > { %272 = vmatpush.bf16.msra.mxu0 %v371_v21 }
  0x28   : > { %285 = vmatpush.bf16.msra.mxu1 %v375_v22 }
  0x2a   : > { %384 = vmatmul.msk.bf16.vlgmr.msra.gmra.mxu0 %vm251_vm2, %v222_v23 }
  0x2b   : > { %385 = vmatmul.msk.bf16.vlgmr.msra.gmra.mxu1 %vm251_vm2, %v222_v23 }
  0x91   : > { %v231_v24 = vpop.permute.xlu0 %230 }
  0xa7   : > { %v274_v25 = vpop.f32.mrf.mxu0 }
  0xa8   : > { %v275_v26 = vadd.f32 %v274_v25, %v231_v24  ;;  %v287_v27 = vpop.f32.mrf.mxu1 }
  0xa9   : > { %v288_v28 = vadd.f32 %v287_v27, %v231_v24 }
  0xaa   : > { %v291_v29 = vmax.f32 %v275_v26, 0.0 }
  0xab   : > { %v292_v30 = vmax.f32 %v288_v28, 0.0 }
  0xad   : > { %v293_v31 = vpack.c.bf16 %v292_v30, %v291_v29 }
  0xaf   : > { %294 = vst [vmem:[%s219_s11] sm:$0xff] %v293_v31  ;;  %v276_v32 = vpop.f32.mrf.mxu0 }
  0xb0   : > { %v289_v33 = vpop.f32.mrf.mxu1 }
  0xb1 PF: > { %p10_p9 = scmp.ge.s32.totalorder %s483_s16, 4   ;;  %s528_s12 = smov %s438_s13 }
  0xb2   : > { %s529_s13 = smov %s492_s19  ;;  %s530_s14 = smov %s483_s16 }
  0xb3   :  { %12 = sbr.rel (!%p10_p9) target bundleno = 2 (0x2), region = 105 }

// kernel: _lambda_.22
= control target key start
LH: loop header
LB: loop body
LE: loop exit
PB: predicated region body
PF: predicated region fallthrough
CT: control target
= control target key end

     0   :  { %s594_s12 = smov 0   ;;  %s596_s13 = smov 0   ;;  %s686_s0 = inlined_call_operand.vmem [shape: bf16[16,72], index: 0, kind: input, shape index: {}]   ;;  %s687_s1 = inlined_call_operand.vmem [shape: bf16[72,512], index: 1, kind: input, shape index: {}]   ;;  %s688_s2 = inlined_call_operand.vmem [shape: f32[16,1], index: 2, kind: input, shape index: {}]   ;;  %s689_s3 = inlined_call_operand.vmem [shape: bf16[16,512], index: 3, kind: output, shape index: {}]  }
   0x1   :  { %s598_s14 = smov 0  }
   0x2 LB: > { %s459_s15 = sadd.s32 4294967295, %s571_s14   ;;  %s611_s16 = sadd.s32 1, %s571_s14   ;;  %s571_s14 = sphi %s598_s14, %s693_s14   ;;  %s567_s13 = sphi %s596_s13, %s692_s13   ;;  %s563_s12 = sphi %s594_s12, %s691_s12  }
   0x3   : > { %s38_s17 = ssub.s32 %s571_s14, %s611_s16  ;;  %s41_s18 = sadd.s32 1, %s567_s13 }
   0x4   : > { %p39_p0 = scmp.eq.s32.totalorder %s38_s17, 0  ;;  %p48_p1 = scmp.ne.s32.totalorder %s567_s13, %s563_s12 }
   0x5   : > { %p49_p2 = scmp.eq.s32.totalorder %s571_s14, 0  ;;  %p99_p3 = scmp.eq.s32.totalorder %s459_s15, 1 }
   0x6   : > { %s622_s19 = scalar_select %p39_p0, %s567_s13, %s41_s18  }
   0x7   : > { %p50_p4 = por %p49_p2, %p48_p1  ;;  %p624_p5 = por %p99_p3, %p48_p1 }
   0x8   : > { %p462_p6 = scmp.ge.s32.totalorder %s571_s14, 2 }
   0xa   : > { %127 = sbr.rel (%p462_p6) target bundleno = 28 (0x1c), region = 24 }
   0xf   : > { %130 = sbr.rel (!%p50_p4) target bundleno = 28 (0x1c), region = 28  ;;  %s132_s21 = sand.u32 (%p50_p4), 1, %s567_s13  }
  0x10   : > { %s510_s22 = sshll.u32 (%p50_p4), %s571_s14, 3  ;;  %s521_s23 = smul.u32 (%p50_p4), 72, %s132_s21 }
  0x11   : > { %s137_s26 = scalar_lea.vmem (%p50_p4), %s687_s1, %s510_s22 }
  0x12   : > { %v182_v0 = vld [vmem:[%s137_s26] sm:$0xff] (%p50_p4)  ;;  %v184_v1 = vld [vmem:[%s137_s26 + $0x10] sm:$0xff] (%p50_p4)  ;;  %s134_s27 = scalar_lea.vmem (%p50_p4), [#allocation2], %s521_s23 }
  0x13   : > { %v186_v2 = vld [vmem:[%s137_s26 + $0x20] sm:$0xff] (%p50_p4)  ;;  %183 = vst [vmem:[%s134_s27] sm:$0xff] (%p50_p4), %v182_v0  ;;  %v188_v3 = vld [vmem:[%s137_s26 + $0x30] sm:$0xff] (%p50_p4) }
  0x14   : > { %185 = vst [vmem:[%s134_s27 + $0x8] sm:$0xff] %v184_v1  ;;  %v190_v4 = vld [vmem:[%s137_s26 + $0x40] sm:$0xff]  ;;  %v192_v5 = vld [vmem:[%s137_s26 + $0x50] sm:$0xff] }
  0x15   : > { %187 = vst [vmem:[%s134_s27 + $0x10] sm:$0xff] %v186_v2  ;;  %v194_v6 = vld [vmem:[%s137_s26 + $0x60] sm:$0xff]  ;;  %v196_v7 = vld [vmem:[%s137_s26 + $0x70] sm:$0xff] }
  0x16   : > { %189 = vst [vmem:[%s134_s27 + $0x18] sm:$0xff] %v188_v3  ;;  %v198_v8 = vld [vmem:[%s137_s26 + $0x80] sm:$0xff] }
  0x17   : > { %191 = vst [vmem:[%s134_s27 + $0x20] sm:$0xff] %v190_v4 }
  0x18   : > { %193 = vst [vmem:[%s134_s27 + $0x28] sm:$0xff] %v192_v5 }
  0x19   : > { %195 = vst [vmem:[%s134_s27 + $0x30] sm:$0xff] %v194_v6 }
  0x1a   : > { %197 = vst [vmem:[%s134_s27 + $0x38] sm:$0xff] %v196_v7 }
  0x1b   : > { %199 = vst [vmem:[%s134_s27 + $0x40] sm:$0xff] %v198_v8 }
  0x1c PF: > { %p465_p7 = scmp.ge.s32.totalorder %s571_s14, 1  ;;  %p204_p8 = scmp.lt.s32.totalorder %s571_s14, 3 }
  0x1e   : > { %p205_p9 = pnand %p465_p7, %p204_p8 }
  0x1f   : > { %s211_s28 = sand.u32 (!%p205_p9), 1, %s563_s12  }
  0x20   : > { %208 = sbr.rel (%p205_p9) target bundleno = 212 (0xd4), region = 66  ;;  %s466_s10 = sshll.u32 (!%p205_p9), %s211_s28, 4 }
  0x21   : > { %s522_s4 = smul.u32 (!%p205_p9), 72, %s211_s28  ;;  %s232_s11 = scalar_lea.vmem (!%p205_p9), [#allocation3], %s466_s10 }
  0x23   : > { %s642_s5 = scalar_lea.vmem (!%p205_p9), [#allocation2], %s522_s4 }
  0x25   : > { %v247_v9 = vld [vmem:[%s688_s2] sm:$0xff]  ;;  %v573_v10 = vmov 0   ;;  %vm313_vm0 = vcmask 1043456   ;;  %v497_v14 = vld [vmem:[%s642_s5 + $0x30] sm:$0xf]  ;;  %v248_v20 = vld [vmem:[%s688_s2 + $0x8] sm:$0xff] }
  0x26   : > { %548 = vset.pattern.permute.xlu0 %v573_v10  ;;  %v246_v11 = vld [vmem:[%s642_s5 + $0x40] sm:$0xff]  ;;  %v519_v17 = vld [vmem:[%s642_s5 + $0x34] sm:$0xf0]  ;;  %v518_v18 = vld [vmem:[%s642_s5 + $0x34] sm:$0xf]  ;;  %vm309_vm1 = vcmask 588800  }
  0x27   : > { %251 = vperm.xlu0 %548, %v247_v9   ;;  %v289_v12 = vunpack.c.l.b16 %v246_v11  ;;  %v290_v13 = vunpack.c.h.b16 %v246_v11  ;;  %v499_v19 = vld [vmem:[%s642_s5 + $0x38] sm:$0xf0]  ;;  %v498_v23 = vor.u32 %v519_v17, %v497_v14  ;;  %v489_v25 = vld [vmem:[%s642_s5 + $0x20] sm:$0xf]  ;;  %v517_v26 = vld [vmem:[%s642_s5 + $0x24] sm:$0xf0] }
  0x28   : > { %v502_v24 = vor.u32 %v518_v18, %v499_v19  ;;  %v516_v27 = vld [vmem:[%s642_s5 + $0x24] sm:$0xf]  ;;  %v491_v28 = vld [vmem:[%s642_s5 + $0x28] sm:$0xf0]  ;;  %v490_v29 = vor.u32 %v517_v26, %v489_v25  ;;  %v481_v31 = vld [vmem:[%s642_s5 + $0x10] sm:$0xf] }
  0x29   : > { %v299_v15 = vpack.c.b16 %v289_v12, %v289_v12  ;;  %v300_v16 = vpack.c.b16 %v290_v13, %v290_v13  ;;  %v494_v30 = vor.u32 %v516_v27, %v491_v28  ;;  %v515_v32 = vld [vmem:[%s642_s5 + $0x14] sm:$0xf0]  ;;  %v514_v33 = vld [vmem:[%s642_s5 + $0x14] sm:$0xf]  ;;  %v483_v34 = vld [vmem:[%s642_s5 + $0x18] sm:$0xf0] }
  0x2a   : > { %v482_v35 = vor.u32 %v515_v32, %v481_v31  ;;  %v486_v36 = vor.u32 %v514_v33, %v483_v34  ;;  %v473_v37 = vld [vmem:[%s642_s5] sm:$0xf]  ;;  %v513_v38 = vld [vmem:[%s642_s5 + $0x4] sm:$0xf0]  ;;  %v512_v39 = vld [vmem:[%s642_s5 + $0x4] sm:$0xf] }
  0x2b   : > { %v315_v21 = vsel %vm313_vm0, %v299_v15, 0  ;;  %v318_v22 = vsel %vm313_vm0, %v300_v16, 0  ;;  %v475_v40 = vld [vmem:[%s642_s5 + $0x8] sm:$0xf0]  ;;  %v474_v41 = vor.u32 %v513_v38, %v473_v37  ;;  %v511_v43 = vld [vmem:[%s686_s0] sm:$0xff]  ;;  %s520_s12 = sshll.u32 (%p624_p5), %s459_s15, 3 }
  0x2c   : > { %323 = vmatpush.bf16.msra.mxu0 %v315_v21  ;;  %337 = vmatpush.bf16.msra.mxu1 %v318_v22  ;;  %v478_v42 = vor.u32 %v512_v39, %v475_v40  ;;  %s365_s21 = scalar_lea.vmem (%p624_p5), %s689_s3, %s520_s12 }
  0x2f   : > { %256 = vperm.xlu0 %548, %v248_v20  }
  0x30   : > { %324 = vmatpush.bf16.msra.mxu0 %v498_v23  ;;  %338 = vmatpush.bf16.msra.mxu1 %v502_v24 }
  0x34   : > { %325 = vmatpush.bf16.msra.mxu0 %v490_v29  ;;  %339 = vmatpush.bf16.msra.mxu1 %v494_v30 }
  0x38   : > { %326 = vmatpush.bf16.msra.mxu0 %v482_v35  ;;  %340 = vmatpush.bf16.msra.mxu1 %v486_v36 }
  0x3c   : > { %327 = vmatpush.bf16.msra.mxu0 %v474_v41  ;;  %341 = vmatpush.bf16.msra.mxu1 %v478_v42 }
  0x3f   : > { %503 = vmatmul.msk.bf16.vlgmr.msra.gmra.mxu0 %vm309_vm1, %v511_v43  ;;  %504 = vmatmul.msk.bf16.vlgmr.msra.gmra.mxu1 %vm309_vm1, %v511_v43 }
  0x99   : > { %v252_v44 = vpop.permute.xlu0 %251 }
  0xa1   : > { %v257_v52 = vpop.permute.xlu0 %256 }
  0xbc   : > { %v329_v45 = vpop.f32.mrf.mxu0  ;;  %v343_v46 = vpop.f32.mrf.mxu1 }
  0xbd   : > { %v330_v47 = vadd.f32 %v329_v45, %v252_v44  ;;  %v344_v48 = vadd.f32 %v343_v46, %v252_v44 }
  0xbf   : > { %v348_v49 = vmax.f32 %v330_v47, 0.0  ;;  %v349_v50 = vmax.f32 %v344_v48, 0.0 }
  0xc1   : > { %v352_v51 = vpack.c.bf16 %v349_v50, %v348_v49 }
  0xc3   : > { %354 = vst [vmem:[%s232_s11] sm:$0xff] %v352_v51 }
  0xc4   : > { %v331_v53 = vpop.f32.mrf.mxu0  ;;  %v345_v54 = vpop.f32.mrf.mxu1 }
  0xc5   : > { %v332_v55 = vadd.f32 %v331_v53, %v257_v52  ;;  %v346_v56 = vadd.f32 %v345_v54, %v257_v52 }
  0xc7   : > { %v350_v57 = vmax.f32 %v332_v55, 0.0  ;;  %v351_v58 = vmax.f32 %v346_v56, 0.0  ;;  %362 = sbr.rel (!%p624_p5) target bundleno = 212 (0xd4), region = 74 }
  0xc9   : > { %v353_v59 = vpack.c.bf16 %v351_v58, %v350_v57 }
  0xca   : > { %v396_v60 = vld [vmem:[%s232_s11] sm:$0xff] (%p624_p5) }
  0xcb   : > { %355 = vst [vmem:[%s232_s11 + $0x8] sm:$0xff] %v353_v59 }
  0xcc   : > { %397 = vst [vmem:[%s365_s21] sm:$0xff] %v396_v60 }
  0xd2   : > { %v398_v61 = vld [vmem:[%s232_s11 + $0x8] sm:$0xff] }
  0xd3   : > { %399 = vst [vmem:[%s365_s21 + $0x10] sm:$0xff] %v398_v61 }
  0xd4 PF: > { %p10_p10 = scmp.ge.s32.totalorder %s611_s16, 4   ;;  %s691_s12 = smov %s567_s13 }
  0xd5   : > { %s692_s13 = smov %s622_s19  ;;  %s693_s14 = smov %s611_s16 }
  0xd6   :  { %12 = sbr.rel (!%p10_p10) target bundleno = 2 (0x2), region = 143 }

// kernel: _lambda_.21
= control target key start
LH: loop header
LB: loop body
LE: loop exit
PB: predicated region body
PF: predicated region fallthrough
CT: control target
= control target key end

     0   :  { %s533_s12 = smov 0   ;;  %s535_s13 = smov 0   ;;  %s610_s0 = inlined_call_operand.vmem [shape: bf16[8,72], index: 0, kind: input, shape index: {}]   ;;  %s611_s1 = inlined_call_operand.vmem [shape: bf16[72,512], index: 1, kind: input, shape index: {}]   ;;  %s612_s2 = inlined_call_operand.vmem [shape: f32[8,1], index: 2, kind: input, shape index: {}]   ;;  %s613_s3 = inlined_call_operand.vmem [shape: bf16[8,512], index: 3, kind: output, shape index: {}]  }
   0x1   :  { %s537_s14 = smov 0  }
   0x2 LB: > { %s406_s15 = sadd.s32 4294967295, %s510_s14   ;;  %s550_s16 = sadd.s32 1, %s510_s14   ;;  %s510_s14 = sphi %s537_s14, %s616_s14   ;;  %s506_s13 = sphi %s535_s13, %s615_s13   ;;  %s502_s12 = sphi %s533_s12, %s614_s12  }
   0x3   : > { %s38_s17 = ssub.s32 %s510_s14, %s550_s16  ;;  %s41_s18 = sadd.s32 1, %s506_s13 }
   0x4   : > { %p39_p0 = scmp.eq.s32.totalorder %s38_s17, 0  ;;  %p48_p1 = scmp.ne.s32.totalorder %s506_s13, %s502_s12 }
   0x5   : > { %p49_p2 = scmp.eq.s32.totalorder %s510_s14, 0  ;;  %p409_p4 = scmp.ge.s32.totalorder %s510_s14, 2 }
   0x6   : > { %s559_s19 = scalar_select %p39_p0, %s506_s13, %s41_s18  }
   0x7   : > { %p50_p3 = por %p49_p2, %p48_p1  ;;  %127 = sbr.rel (%p409_p4) target bundleno = 25 (0x19), region = 24 }
   0xc   : > { %130 = sbr.rel (!%p50_p3) target bundleno = 25 (0x19), region = 28  ;;  %s132_s20 = sand.u32 (%p50_p3), 1, %s506_s13  }
   0xd   : > { %s451_s21 = sshll.u32 (%p50_p3), %s510_s14, 3  ;;  %s460_s22 = smul.u32 (%p50_p3), 72, %s132_s20 }
   0xe   : > { %s137_s25 = scalar_lea.vmem (%p50_p3), %s611_s1, %s451_s21 }
   0xf   : > { %v182_v0 = vld [vmem:[%s137_s25] sm:$0xff] (%p50_p3)  ;;  %v184_v1 = vld [vmem:[%s137_s25 + $0x10] sm:$0xff] (%p50_p3)  ;;  %s134_s26 = scalar_lea.vmem (%p50_p3), [#allocation2], %s460_s22 }
  0x10   : > { %v186_v2 = vld [vmem:[%s137_s25 + $0x20] sm:$0xff] (%p50_p3)  ;;  %183 = vst [vmem:[%s134_s26] sm:$0xff] (%p50_p3), %v182_v0  ;;  %v188_v3 = vld [vmem:[%s137_s25 + $0x30] sm:$0xff] (%p50_p3) }
  0x11   : > { %185 = vst [vmem:[%s134_s26 + $0x8] sm:$0xff] %v184_v1  ;;  %v190_v4 = vld [vmem:[%s137_s25 + $0x40] sm:$0xff]  ;;  %v192_v5 = vld [vmem:[%s137_s25 + $0x50] sm:$0xff] }
  0x12   : > { %187 = vst [vmem:[%s134_s26 + $0x10] sm:$0xff] %v186_v2  ;;  %v194_v6 = vld [vmem:[%s137_s25 + $0x60] sm:$0xff]  ;;  %v196_v7 = vld [vmem:[%s137_s25 + $0x70] sm:$0xff] }
  0x13   : > { %189 = vst [vmem:[%s134_s26 + $0x18] sm:$0xff] %v188_v3  ;;  %v198_v8 = vld [vmem:[%s137_s25 + $0x80] sm:$0xff] }
  0x14   : > { %191 = vst [vmem:[%s134_s26 + $0x20] sm:$0xff] %v190_v4 }
  0x15   : > { %193 = vst [vmem:[%s134_s26 + $0x28] sm:$0xff] %v192_v5 }
  0x16   : > { %195 = vst [vmem:[%s134_s26 + $0x30] sm:$0xff] %v194_v6 }
  0x17   : > { %197 = vst [vmem:[%s134_s26 + $0x38] sm:$0xff] %v196_v7 }
  0x18   : > { %199 = vst [vmem:[%s134_s26 + $0x40] sm:$0xff] %v198_v8 }
  0x19 PF: > { %p412_p5 = scmp.ge.s32.totalorder %s510_s14, 1  ;;  %p204_p6 = scmp.lt.s32.totalorder %s510_s14, 3 }
  0x1b   : > { %p205_p7 = pnand %p412_p5, %p204_p6 }
  0x1c   : > { %s211_s27 = sand.u32 (!%p205_p7), 1, %s502_s12   ;;  %s413_s7 = sshll.u32 (!%p205_p7), %s406_s15, 1 }
  0x1d   : > { %208 = sbr.rel (%p205_p7) target bundleno = 194 (0xc2), region = 66  ;;  %p236_p8 = scmp.lt.s32.totalorder (!%p205_p7), %s413_s7, 3 }
  0x1e   : > { %s461_s28 = smul.u32 (!%p205_p7), 72, %s211_s27 }
  0x20   : > { %s573_s4 = scalar_lea.vmem (!%p205_p7), [#allocation2], %s461_s28 }
  0x22   : > { %v512_v9 = vmov 0   ;;  %v252_v10 = vld [vmem:[%s612_s2] sm:$0xff]  ;;  %vm307_vm0 = vcmask 1043456   ;;  %v441_v14 = vld [vmem:[%s573_s4 + $0x30] sm:$0xf]  ;;  %vm303_vm1 = vcmask 588800  }
  0x23   : > { %487 = vset.pattern.permute.xlu0 %v512_v9  ;;  %v251_v11 = vld [vmem:[%s573_s4 + $0x40] sm:$0xff]  ;;  %v459_v17 = vld [vmem:[%s573_s4 + $0x34] sm:$0xf0]  ;;  %v458_v18 = vld [vmem:[%s573_s4 + $0x34] sm:$0xf]  ;;  %s618_s7 = smov (!%p236_p8, %s413_s7), 3 }
  0x24   : > { %255 = vperm.xlu0 %487, %v252_v10   ;;  %v283_v12 = vunpack.c.l.b16 %v251_v11  ;;  %v284_v13 = vunpack.c.h.b16 %v251_v11  ;;  %v443_v19 = vld [vmem:[%s573_s4 + $0x38] sm:$0xf0]  ;;  %v442_v22 = vor.u32 %v459_v17, %v441_v14  ;;  %v433_v24 = vld [vmem:[%s573_s4 + $0x20] sm:$0xf]  ;;  %v457_v25 = vld [vmem:[%s573_s4 + $0x24] sm:$0xf0] }
  0x25   : > { %v446_v23 = vor.u32 %v458_v18, %v443_v19  ;;  %v456_v26 = vld [vmem:[%s573_s4 + $0x24] sm:$0xf]  ;;  %v435_v27 = vld [vmem:[%s573_s4 + $0x28] sm:$0xf0]  ;;  %v434_v28 = vor.u32 %v457_v25, %v433_v24  ;;  %v425_v30 = vld [vmem:[%s573_s4 + $0x10] sm:$0xf] }
  0x26   : > { %v293_v15 = vpack.c.b16 %v283_v12, %v283_v12  ;;  %v294_v16 = vpack.c.b16 %v284_v13, %v284_v13  ;;  %v438_v29 = vor.u32 %v456_v26, %v435_v27  ;;  %v455_v31 = vld [vmem:[%s573_s4 + $0x14] sm:$0xf0]  ;;  %v454_v32 = vld [vmem:[%s573_s4 + $0x14] sm:$0xf]  ;;  %v427_v33 = vld [vmem:[%s573_s4 + $0x18] sm:$0xf0] }
  0x27   : > { %v426_v34 = vor.u32 %v455_v31, %v425_v30  ;;  %v430_v35 = vor.u32 %v454_v32, %v427_v33  ;;  %v417_v36 = vld [vmem:[%s573_s4] sm:$0xf]  ;;  %v453_v37 = vld [vmem:[%s573_s4 + $0x4] sm:$0xf0]  ;;  %v452_v38 = vld [vmem:[%s573_s4 + $0x4] sm:$0xf] }
  0x28   : > { %v309_v20 = vsel %vm307_vm0, %v293_v15, 0  ;;  %v312_v21 = vsel %vm307_vm0, %v294_v16, 0  ;;  %v419_v39 = vld [vmem:[%s573_s4 + $0x8] sm:$0xf0]  ;;  %v418_v40 = vor.u32 %v453_v37, %v417_v36  ;;  %v242_v42 = vld [vmem:[%s610_s0] sm:$0xf] }
  0x29   : > { %317 = vmatpush.bf16.msra.mxu0 %v309_v20  ;;  %330 = vmatpush.bf16.msra.mxu1 %v312_v21  ;;  %v422_v41 = vor.u32 %v452_v38, %v419_v39  ;;  %s414_s8 = sshll.u32 %s618_s7, 2 }
  0x2a   : > { %s239_s11 = scalar_lea.vmem %s613_s3, %s414_s8 }
  0x2d   : > { %318 = vmatpush.bf16.msra.mxu0 %v442_v22  ;;  %331 = vmatpush.bf16.msra.mxu1 %v446_v23 }
  0x31   : > { %319 = vmatpush.bf16.msra.mxu0 %v434_v28  ;;  %332 = vmatpush.bf16.msra.mxu1 %v438_v29 }
  0x35   : > { %320 = vmatpush.bf16.msra.mxu0 %v426_v34  ;;  %333 = vmatpush.bf16.msra.mxu1 %v430_v35 }
  0x39   : > { %321 = vmatpush.bf16.msra.mxu0 %v418_v40  ;;  %334 = vmatpush.bf16.msra.mxu1 %v422_v41 }
  0x3c   : > { %447 = vmatmul.msk.bf16.vlgmr.msra.gmra.mxu0 %vm303_vm1, %v242_v42  ;;  %448 = vmatmul.msk.bf16.vlgmr.msra.gmra.mxu1 %vm303_vm1, %v242_v42 }
  0x96   : > { %v256_v43 = vpop.permute.xlu0 %255 }
  0xb9   : > { %v323_v44 = vpop.f32.mrf.mxu0  ;;  %v336_v45 = vpop.f32.mrf.mxu1 }
  0xba   : > { %v324_v46 = vadd.f32 %v323_v44, %v256_v43  ;;  %v337_v47 = vadd.f32 %v336_v45, %v256_v43 }
  0xbc   : > { %v340_v48 = vmax.f32 %v324_v46, 0.0  ;;  %v341_v49 = vmax.f32 %v337_v47, 0.0 }
  0xbe   : > { %v342_v50 = vpack.c.bf16 %v341_v49, %v340_v48 }
  0xc0   : > { %343 = vst [vmem:[%s239_s11] sm:$0xff] %v342_v50 }
  0xc1   : > { %v325_v51 = vpop.f32.mrf.mxu0  ;;  %v338_v52 = vpop.f32.mrf.mxu1 }
  0xc2 PF: > { %p10_p9 = scmp.ge.s32.totalorder %s550_s16, 4   ;;  %s614_s12 = smov %s506_s13 }
  0xc3   : > { %s615_s13 = smov %s559_s19  ;;  %s616_s14 = smov %s550_s16 }
  0xc4   :  { %12 = sbr.rel (!%p10_p9) target bundleno = 2 (0x2), region = 105 }

// kernel: _lambda_.23
= control target key start
LH: loop header
LB: loop body
LE: loop exit
PB: predicated region body
PF: predicated region fallthrough
CT: control target
= control target key end

     0   :  { %s241_s0 = inlined_call_operand.vmem [shape: bf16[16,128], index: 0, kind: input, shape index: {}]   ;;  %s242_s1 = inlined_call_operand.vmem [shape: bf16[16,128], index: 1, kind: input, shape index: {}]   ;;  %s243_s2 = inlined_call_operand.vmem [shape: bf16[16,128], index: 2, kind: input, shape index: {}]   ;;  %s244_s3 = inlined_call_operand.vmem [shape: bf16[16,128], index: 3, kind: input, shape index: {}]   ;;  %s245_s4 = inlined_call_operand.vmem [shape: bf16[16,128], index: 4, kind: input, shape index: {}]   ;;  %s246_s5 = inlined_call_operand.vmem [shape: bf16[16,128], index: 5, kind: input, shape index: {}]   ;;  %s247_s6 = inlined_call_operand.vmem [shape: bf16[16,128], index: 6, kind: input, shape index: {}]   ;;  %s248_s7 = inlined_call_operand.vmem [shape: bf16[16,128], index: 7, kind: input, shape index: {}]   ;;  %s249_s8 = inlined_call_operand.vmem [shape: bf16[16,128], index: 8, kind: input, shape index: {}]   ;;  %s250_s9 = inlined_call_operand.vmem [shape: bf16[16,128], index: 9, kind: output, shape index: {}]  }
   0x1   :  { %v121_v0 = vld [vmem:[%s241_s0] sm:$0xff]  }
   0x2   :  { %v125_v1 = vld [vmem:[%s242_s1] sm:$0xff]   ;;  %v122_v3 = vunpack.c.l.bf16 %v121_v0  ;;  %v123_v4 = vunpack.c.h.bf16 %v121_v0 }
   0x3   :  { %v129_v2 = vld [vmem:[%s243_s2] sm:$0xff]   ;;  %v126_v5 = vunpack.c.l.bf16 %v125_v1  ;;  %v127_v6 = vunpack.c.h.bf16 %v125_v1 }
   0x4   :  { %v133_v7 = vld [vmem:[%s244_s3] sm:$0xff]   ;;  %v130_v8 = vunpack.c.l.bf16 %v129_v2  ;;  %v131_v9 = vunpack.c.h.bf16 %v129_v2 }
   0x5   :  { %v137_v10 = vld [vmem:[%s245_s4] sm:$0xff]   ;;  %v40_v11 = vmax.f32 %v122_v3, %v126_v5  ;;  %v41_v12 = vmax.f32 %v123_v4, %v127_v6  ;;  %v134_v13 = vunpack.c.l.bf16 %v133_v7  ;;  %v135_v14 = vunpack.c.h.bf16 %v133_v7 }
   0x6   :  { %v141_v15 = vld [vmem:[%s246_s5] sm:$0xff]   ;;  %v138_v18 = vunpack.c.l.bf16 %v137_v10  ;;  %v139_v19 = vunpack.c.h.bf16 %v137_v10 }
   0x7   :  { %v50_v16 = vmax.f32 %v40_v11, %v130_v8  ;;  %v51_v17 = vmax.f32 %v41_v12, %v131_v9  ;;  %v145_v20 = vld [vmem:[%s247_s6] sm:$0xff]   ;;  %v142_v23 = vunpack.c.l.bf16 %v141_v15  ;;  %v143_v24 = vunpack.c.h.bf16 %v141_v15 }
   0x8   :  { %v149_v25 = vld [vmem:[%s248_s7] sm:$0xff]   ;;  %v146_v28 = vunpack.c.l.bf16 %v145_v20  ;;  %v147_v29 = vunpack.c.h.bf16 %v145_v20 }
   0x9   :  { %v60_v21 = vmax.f32 %v50_v16, %v134_v13  ;;  %v61_v22 = vmax.f32 %v51_v17, %v135_v14  ;;  %v153_v30 = vld [vmem:[%s249_s8] sm:$0xff]   ;;  %v150_v33 = vunpack.c.l.bf16 %v149_v25  ;;  %v151_v34 = vunpack.c.h.bf16 %v149_v25 }
   0xa   :  { %v154_v37 = vunpack.c.l.bf16 %v153_v30  ;;  %v155_v38 = vunpack.c.h.bf16 %v153_v30 }
   0xb   :  { %v70_v26 = vmax.f32 %v60_v21, %v138_v18  ;;  %v71_v27 = vmax.f32 %v61_v22, %v139_v19 }
   0xd   :  { %v80_v31 = vmax.f32 %v70_v26, %v142_v23  ;;  %v81_v32 = vmax.f32 %v71_v27, %v143_v24 }
   0xf   :  { %v90_v35 = vmax.f32 %v80_v31, %v146_v28  ;;  %v91_v36 = vmax.f32 %v81_v32, %v147_v29 }
  0x11   :  { %v100_v39 = vmax.f32 %v90_v35, %v150_v33  ;;  %v101_v40 = vmax.f32 %v91_v36, %v151_v34 }
  0x13   :  { %v110_v41 = vmax.f32 %v100_v39, %v154_v37  ;;  %v111_v42 = vmax.f32 %v101_v40, %v155_v38 }
  0x15   :  { %v159_v43 = vpack.c.bf16 %v111_v42, %v110_v41 }
  0x17   :  { %160 = vst [vmem:[%s250_s9] sm:$0xff] %v159_v43  }

// kernel: _lambda_.24
= control target key start
LH: loop header
LB: loop body
LE: loop exit
PB: predicated region body
PF: predicated region fallthrough
CT: control target
= control target key end

     0   :  { %v185_v4 = vmov 0   ;;  %vm100_vm0 = vcmask 130048   ;;  %s242_s1 = inlined_call_operand.vmem [shape: bf16[144,128], index: 1, kind: input, shape index: {}]   ;;  %s243_s0 = inlined_call_operand.vmem [shape: bf16[8,144], index: 0, kind: input, shape index: {}]   ;;  %s244_s2 = inlined_call_operand.vmem [shape: f32[8,1], index: 2, kind: input, shape index: {}]   ;;  %s245_s3 = inlined_call_operand.vmem [shape: bf16[8,128], index: 3, kind: output, shape index: {}]  }
   0x1   :  { %v181_v0 = vld [vmem:[%s242_s1 + $0x38] sm:$0xff]  ;;  %v180_v1 = vld [vmem:[%s242_s1 + $0x30] sm:$0xff]  ;;  %v182_v2 = vld [vmem:[%s242_s1 + $0x40] sm:$0xff]  ;;  %184 = vset.pattern.permute.xlu0 %v185_v4 }
   0x2   :  { %104 = vmatpush.bf16.msra.mxu0 %v181_v0  ;;  %v15_v3 = vld [vmem:[%s243_s0] sm:$0xff]  ;;  %124 = vmatpush.bf16.msra.mxu1 %v182_v2  ;;  %v179_v8 = vld [vmem:[%s242_s1 + $0x28] sm:$0xff]  ;;  %v177_v10 = vld [vmem:[%s242_s1 + $0x18] sm:$0xff] }
   0x3   :  { %v42_v5 = vunpack.c.h.b16 %v15_v3  ;;  %v34_v6 = vld [vmem:[%s244_s2] sm:$0xff]  ;;  %v176_v11 = vld [vmem:[%s242_s1 + $0x10] sm:$0xff]  ;;  %v175_v12 = vld [vmem:[%s242_s1 + $0x8] sm:$0xff]  ;;  %v41_v13 = vunpack.c.l.b16 %v15_v3 }
   0x4   :  { %37 = vperm.xlu0 %184, %v34_v6   ;;  %v178_v9 = vld [vmem:[%s242_s1 + $0x20] sm:$0xff] }
   0x5   :  { %v44_v7 = vpack.c.b16 %v42_v5, %v42_v5  ;;  %v174_v14 = vld [vmem:[%s242_s1] sm:$0xff]  ;;  %v43_v15 = vpack.c.b16 %v41_v13, %v41_v13 }
   0x6   :  { %105 = vmatpush.bf16.msra.mxu0 %v180_v1 }
   0x7   :  { %173 = vmatmul.msk.bf16.vlgmr.msra.gmra.mxu1 %vm100_vm0, %v44_v7 }
   0xa   :  { %106 = vmatpush.bf16.msra.mxu0 %v179_v8 }
   0xe   :  { %107 = vmatpush.bf16.msra.mxu0 %v178_v9 }
  0x12   :  { %108 = vmatpush.bf16.msra.mxu0 %v177_v10 }
  0x16   :  { %109 = vmatpush.bf16.msra.mxu0 %v176_v11 }
  0x1a   :  { %110 = vmatpush.bf16.msra.mxu0 %v175_v12 }
  0x1e   :  { %111 = vmatpush.bf16.msra.mxu0 %v174_v14 }
  0x21   :  { %112 = vmatmul.bf16.vlgmr.msra.gmra.mxu0 %v43_v15 }
  0x76   :  { %v38_v18 = vpop.permute.xlu0 %37 }
  0x84   :  { %v126_v16 = vpop.f32.mrf.mxu1 }
  0x8c   :  { %v128_v17 = vpop.f32.mrf.mxu1 }
  0x9e   :  { %v113_v19 = vpop.f32.mrf.mxu0 }
  0x9f   :  { %v114_v20 = vadd.f32 %v113_v19, %v38_v18 }
  0xa1   :  { %v127_v21 = vadd.f32 %v126_v16, %v114_v20 }
  0xa3   :  { %v130_v22 = vmax.f32 %v127_v21, 0.0 }
  0xa5   :  { %v131_v23 = vpack.c.bf16 %v130_v22, %v130_v22 }
  0xa6   :  { %v115_v24 = vpop.f32.mrf.mxu0 }
  0xa7   :  { %132 = vst [vmem:[%s245_s3] sm:$0xf] %v131_v23 }

// kernel: _lambda_.26
= control target key start
LH: loop header
LB: loop body
LE: loop exit
PB: predicated region body
PF: predicated region fallthrough
CT: control target
= control target key end

     0   :  { %v109_v1 = vmov 0   ;;  %vm62_vm0 = vcmask 1043456   ;;  %vm58_vm1 = vcmask 588800   ;;  %s154_s1 = inlined_call_operand.vmem [shape: bf16[72,128], index: 1, kind: input, shape index: {}]   ;;  %s155_s2 = inlined_call_operand.vmem [shape: f32[8,1], index: 2, kind: input, shape index: {}]   ;;  %s156_s0 = inlined_call_operand.vmem [shape: bf16[8,72], index: 0, kind: input, shape index: {}]   ;;  %s157_s3 = inlined_call_operand.vmem [shape: bf16[8,128], index: 3, kind: output, shape index: {}]  }
   0x1   :  { %v24_v0 = vld [vmem:[%s154_s1 + $0x20] sm:$0xf]  ;;  %108 = vset.pattern.permute.xlu0 %v109_v1  ;;  %v106_v6 = vld [vmem:[%s154_s1 + $0x18] sm:$0xff]  ;;  %v105_v7 = vld [vmem:[%s154_s1 + $0x10] sm:$0xff] }
   0x2   :  { %v48_v2 = vunpack.c.l.b16 %v24_v0  ;;  %v25_v3 = vld [vmem:[%s155_s2] sm:$0xff]  ;;  %v104_v8 = vld [vmem:[%s154_s1 + $0x8] sm:$0xff] }
   0x3   :  { %28 = vperm.xlu0 %108, %v25_v3   ;;  %v103_v9 = vld [vmem:[%s154_s1] sm:$0xff] }
   0x4   :  { %v53_v4 = vpack.c.b16 %v48_v2, %v48_v2  ;;  %v15_v10 = vld [vmem:[%s156_s0] sm:$0xf] }
   0x6   :  { %v64_v5 = vsel %vm62_vm0, %v53_v4, 0 }
   0x7   :  { %69 = vmatpush.bf16.msra.mxu0 %v64_v5 }
   0xb   :  { %70 = vmatpush.bf16.msra.mxu0 %v106_v6 }
   0xf   :  { %71 = vmatpush.bf16.msra.mxu0 %v105_v7 }
  0x13   :  { %72 = vmatpush.bf16.msra.mxu0 %v104_v8 }
  0x17   :  { %73 = vmatpush.bf16.msra.mxu0 %v103_v9 }
  0x1a   :  { %102 = vmatmul.msk.bf16.vlgmr.msra.gmra.mxu0 %vm58_vm1, %v15_v10 }
  0x75   :  { %v29_v11 = vpop.permute.xlu0 %28 }
  0x97   :  { %v75_v12 = vpop.f32.mrf.mxu0 }
  0x98   :  { %v76_v13 = vadd.f32 %v75_v12, %v29_v11 }
  0x9a   :  { %v79_v14 = vmax.f32 %v76_v13, 0.0 }
  0x9c   :  { %v80_v15 = vpack.c.bf16 %v79_v14, %v79_v14 }
  0x9e   :  { %81 = vst [vmem:[%s157_s3] sm:$0xf] %v80_v15 }
  0x9f   :  { %v77_v16 = vpop.f32.mrf.mxu0 }

// kernel: _lambda_.25
= control target key start
LH: loop header
LB: loop body
LE: loop exit
PB: predicated region body
PF: predicated region fallthrough
CT: control target
= control target key end

     0   :  { %v148_v2 = vmov 0   ;;  %vm88_vm0 = vcmask 1043456   ;;  %vm40_vm1 = vcmask 130048   ;;  %vm84_vm2 = vcmask 588800   ;;  %s209_s1 = inlined_call_operand.vmem [shape: bf16[72,128], index: 1, kind: input, shape index: {}]   ;;  %s210_s4 = inlined_call_operand.vmem [shape: bf16[16,128], index: 4, kind: input, shape index: {}]   ;;  %s211_s3 = inlined_call_operand.vmem [shape: bf16[8,16], index: 3, kind: input, shape index: {}]   ;;  %s212_s2 = inlined_call_operand.vmem [shape: f32[8,1], index: 2, kind: input, shape index: {}]   ;;  %s213_s0 = inlined_call_operand.vmem [shape: bf16[8,72], index: 0, kind: input, shape index: {}]   ;;  %s214_s5 = inlined_call_operand.vmem [shape: bf16[8,128], index: 5, kind: output, shape index: {}]  }
   0x1   :  { %v30_v0 = vld [vmem:[%s209_s1 + $0x20] sm:$0xf]  ;;  %147 = vset.pattern.permute.xlu0 %v148_v2  ;;  %v144_v8 = vld [vmem:[%s209_s1 + $0x18] sm:$0xff]  ;;  %v143_v9 = vld [vmem:[%s209_s1 + $0x10] sm:$0xff] }
   0x2   :  { %v145_v1 = vld [vmem:[%s210_s4] sm:$0xff]  ;;  %v74_v3 = vunpack.c.l.b16 %v30_v0  ;;  %v142_v10 = vld [vmem:[%s209_s1 + $0x8] sm:$0xff] }
   0x3   :  { %51 = vmatpush.bf16.msra.mxu0 %v145_v1  ;;  %v31_v4 = vld [vmem:[%s211_s3] sm:$0xf] }
   0x4   :  { %v105_v5 = vld [vmem:[%s212_s2] sm:$0xff]  ;;  %v79_v6 = vpack.c.b16 %v74_v3, %v74_v3 }
   0x5   :  { %108 = vperm.xlu0 %147, %v105_v5   ;;  %v141_v11 = vld [vmem:[%s209_s1] sm:$0xff] }
   0x6   :  { %v90_v7 = vsel %vm88_vm0, %v79_v6, 0  ;;  %123 = vmatmul.msk.bf16.vlgmr.msra.gmra.mxu0 %vm40_vm1, %v31_v4  ;;  %v21_v12 = vld [vmem:[%s213_s0] sm:$0xf] }
   0x7   :  { %95 = vmatpush.bf16.msra.mxu1 %v90_v7 }
   0xb   :  { %96 = vmatpush.bf16.msra.mxu1 %v144_v8 }
   0xf   :  { %97 = vmatpush.bf16.msra.mxu1 %v143_v9 }
  0x13   :  { %98 = vmatpush.bf16.msra.mxu1 %v142_v10 }
  0x17   :  { %99 = vmatpush.bf16.msra.mxu1 %v141_v11 }
  0x1a   :  { %140 = vmatmul.msk.bf16.vlgmr.msra.gmra.mxu1 %vm84_vm2, %v21_v12 }
  0x77   :  { %v109_v16 = vpop.permute.xlu0 %108 }
  0x83   :  { %v53_v13 = vpop.f32.mrf.mxu0 }
  0x8b   :  { %v55_v14 = vpop.f32.mrf.mxu0 }
  0x97   :  { %v101_v15 = vpop.f32.mrf.mxu1 }
  0x98   :  { %v102_v17 = vadd.f32 %v101_v15, %v53_v13 }
  0x9a   :  { %v111_v18 = vadd.f32 %v109_v16, %v102_v17 }
  0x9c   :  { %v112_v19 = vmax.f32 %v111_v18, 0.0 }
  0x9e   :  { %v113_v20 = vpack.c.bf16 %v112_v19, %v112_v19 }
  0x9f   :  { %v103_v21 = vpop.f32.mrf.mxu1 }
  0xa0   :  { %114 = vst [vmem:[%s214_s5] sm:$0xf] %v113_v20 }

// kernel: _lambda_.27
= control target key start
LH: loop header
LB: loop body
LE: loop exit
PB: predicated region body
PF: predicated region fallthrough
CT: control target
= control target key end

     0   :  { %v115_v1 = vmov 0   ;;  %vm65_vm0 = vcmask 1043456   ;;  %vm61_vm1 = vcmask 588800   ;;  %s168_s1 = inlined_call_operand.vmem [shape: bf16[72,128], index: 1, kind: input, shape index: {}]   ;;  %s169_s2 = inlined_call_operand.vmem [shape: f32[8,1], index: 2, kind: input, shape index: {}]   ;;  %s170_s0 = inlined_call_operand.vmem [shape: bf16[8,72], index: 0, kind: input, shape index: {}]   ;;  %s171_s3 = inlined_call_operand.vmem [shape: bf16[8,128], index: 3, kind: input, shape index: {}]   ;;  %s172_s4 = inlined_call_operand.vmem [shape: bf16[8,128], index: 4, kind: output, shape index: {}]  }
   0x1   :  { %v27_v0 = vld [vmem:[%s168_s1 + $0x20] sm:$0xf]  ;;  %114 = vset.pattern.permute.xlu0 %v115_v1  ;;  %v112_v6 = vld [vmem:[%s168_s1 + $0x18] sm:$0xff]  ;;  %v111_v7 = vld [vmem:[%s168_s1 + $0x10] sm:$0xff] }
   0x2   :  { %v51_v2 = vunpack.c.l.b16 %v27_v0  ;;  %v28_v3 = vld [vmem:[%s169_s2] sm:$0xff]  ;;  %v110_v8 = vld [vmem:[%s168_s1 + $0x8] sm:$0xff] }
   0x3   :  { %31 = vperm.xlu0 %114, %v28_v3   ;;  %v109_v9 = vld [vmem:[%s168_s1] sm:$0xff] }
   0x4   :  { %v56_v4 = vpack.c.b16 %v51_v2, %v51_v2  ;;  %v18_v10 = vld [vmem:[%s170_s0] sm:$0xf] }
   0x5   :  { %v82_v11 = vld [vmem:[%s171_s3] sm:$0xf] }
   0x6   :  { %v67_v5 = vsel %vm65_vm0, %v56_v4, 0  ;;  %v83_v13 = vunpack.c.l.bf16 %v82_v11 }
   0x7   :  { %72 = vmatpush.bf16.msra.mxu0 %v67_v5 }
   0xb   :  { %73 = vmatpush.bf16.msra.mxu0 %v112_v6 }
   0xf   :  { %74 = vmatpush.bf16.msra.mxu0 %v111_v7 }
  0x13   :  { %75 = vmatpush.bf16.msra.mxu0 %v110_v8 }
  0x17   :  { %76 = vmatpush.bf16.msra.mxu0 %v109_v9 }
  0x1a   :  { %108 = vmatmul.msk.bf16.vlgmr.msra.gmra.mxu0 %vm61_vm1, %v18_v10 }
  0x75   :  { %v32_v12 = vpop.permute.xlu0 %31 }
  0x97   :  { %v78_v14 = vpop.f32.mrf.mxu0 }
  0x98   :  { %v79_v15 = vadd.f32 %v78_v14, %v32_v12 }
  0x9a   :  { %v84_v16 = vadd.f32 %v83_v13, %v79_v15 }
  0x9c   :  { %v85_v17 = vmax.f32 %v84_v16, 0.0 }
  0x9e   :  { %v86_v18 = vpack.c.bf16 %v85_v17, %v85_v17 }
  0x9f   :  { %v80_v19 = vpop.f32.mrf.mxu0 }
  0xa0   :  { %87 = vst [vmem:[%s172_s4] sm:$0xf] %v86_v18 }

// kernel: _lambda_.28
= control target key start
LH: loop header
LB: loop body
LE: loop exit
PB: predicated region body
PF: predicated region fallthrough
CT: control target
= control target key end

     0   :  { %v135_v1 = vmov 0   ;;  %vm74_vm0 = vcmask 1043456   ;;  %vm70_vm1 = vcmask 588800   ;;  %s183_s1 = inlined_call_operand.vmem [shape: bf16[72,128], index: 1, kind: input, shape index: {}]   ;;  %s184_s2 = inlined_call_operand.vmem [shape: f32[16,1], index: 2, kind: input, shape index: {}]   ;;  %s185_s0 = inlined_call_operand.vmem [shape: bf16[16,72], index: 0, kind: input, shape index: {}]   ;;  %s186_s3 = inlined_call_operand.vmem [shape: bf16[16,128], index: 3, kind: output, shape index: {}]  }
   0x1   :  { %v25_v0 = vld [vmem:[%s183_s1 + $0x20] sm:$0xf]  ;;  %134 = vset.pattern.permute.xlu0 %v135_v1  ;;  %v127_v6 = vld [vmem:[%s183_s1 + $0x18] sm:$0xff]  ;;  %v27_v7 = vld [vmem:[%s184_s2 + $0x8] sm:$0xff] }
   0x2   :  { %v60_v2 = vunpack.c.l.b16 %v25_v0  ;;  %v26_v3 = vld [vmem:[%s184_s2] sm:$0xff]  ;;  %v126_v8 = vld [vmem:[%s183_s1 + $0x10] sm:$0xff]  ;;  %v125_v9 = vld [vmem:[%s183_s1 + $0x8] sm:$0xff] }
   0x3   :  { %30 = vperm.xlu0 %134, %v26_v3   ;;  %v124_v10 = vld [vmem:[%s183_s1] sm:$0xff] }
   0x4   :  { %v65_v4 = vpack.c.b16 %v60_v2, %v60_v2  ;;  %v123_v11 = vld [vmem:[%s185_s0] sm:$0xff] }
   0x6   :  { %v76_v5 = vsel %vm74_vm0, %v65_v4, 0 }
   0x7   :  { %81 = vmatpush.bf16.msra.mxu0 %v76_v5 }
   0xb   :  { %82 = vmatpush.bf16.msra.mxu0 %v127_v6  ;;  %35 = vperm.xlu0 %134, %v27_v7  }
   0xf   :  { %83 = vmatpush.bf16.msra.mxu0 %v126_v8 }
  0x13   :  { %84 = vmatpush.bf16.msra.mxu0 %v125_v9 }
  0x17   :  { %85 = vmatpush.bf16.msra.mxu0 %v124_v10 }
  0x1a   :  { %122 = vmatmul.msk.bf16.vlgmr.msra.gmra.mxu0 %vm70_vm1, %v123_v11 }
  0x75   :  { %v31_v12 = vpop.permute.xlu0 %30 }
  0x7d   :  { %v36_v15 = vpop.permute.xlu0 %35 }
  0x97   :  { %v87_v13 = vpop.f32.mrf.mxu0 }
  0x98   :  { %v88_v14 = vadd.f32 %v87_v13, %v31_v12 }
  0x9a   :  { %v92_v18 = vmax.f32 %v88_v14, 0.0 }
  0x9f   :  { %v89_v16 = vpop.f32.mrf.mxu0 }
  0xa0   :  { %v90_v17 = vadd.f32 %v89_v16, %v36_v15 }
  0xa2   :  { %v93_v19 = vmax.f32 %v90_v17, 0.0 }
  0xa4   :  { %v131_v20 = vpack.c.bf16 %v93_v19, %v92_v18 }
  0xa6   :  { %132 = vst [vmem:[%s186_s3] sm:$0xff] %v131_v20  }

// kernel: _lambda_.29
= control target key start
LH: loop header
LB: loop body
LE: loop exit
PB: predicated region body
PF: predicated region fallthrough
CT: control target
= control target key end

     0   :  { %vm53_vm0 = vcmask 1043456   ;;  %v259_v6 = vmov 0   ;;  %vm134_vm1 = vcmask 130048   ;;  %vm49_vm2 = vcmask 64512   ;;  %s344_s1 = inlined_call_operand.vmem [shape: bf16[144,128], index: 1, kind: input, shape index: {}]   ;;  %s345_s0 = inlined_call_operand.vmem [shape: bf16[16,144], index: 0, kind: input, shape index: {}]   ;;  %s346_s4 = inlined_call_operand.vmem [shape: bf16[8,128], index: 4, kind: input, shape index: {}]   ;;  %s347_s3 = inlined_call_operand.vmem [shape: bf16[16,8], index: 3, kind: input, shape index: {}]   ;;  %s348_s2 = inlined_call_operand.vmem [shape: f32[16,1], index: 2, kind: input, shape index: {}]   ;;  %s349_s5 = inlined_call_operand.vmem [shape: bf16[16,128], index: 5, kind: output, shape index: {}]  }
   0x1   :  { %v249_v0 = vld [vmem:[%s344_s1 + $0x38] sm:$0xff]  ;;  %v248_v1 = vld [vmem:[%s344_s1 + $0x30] sm:$0xff]  ;;  %v250_v2 = vld [vmem:[%s344_s1 + $0x40] sm:$0xff]  ;;  %258 = vset.pattern.permute.xlu0 %v259_v6 }
   0x2   :  { %138 = vmatpush.bf16.msra.mxu1 %v249_v0  ;;  %v240_v3 = vld [vmem:[%s345_s0 + $0x4] sm:$0xf]  ;;  %v199_v4 = vld [vmem:[%s345_s0 + $0x8] sm:$0xf0]  ;;  %v43_v5 = vld [vmem:[%s346_s4] sm:$0xf]  ;;  %159 = vmatpush.bf16.msra.mxu2 %v250_v2 }
   0x3   :  { %v202_v7 = vor.u32 %v240_v3, %v199_v4  ;;  %v55_v8 = vsel %vm53_vm0, %v43_v5, 0  ;;  %v251_v9 = vld [vmem:[%s347_s3] sm:$0xff]  ;;  %v247_v11 = vld [vmem:[%s344_s1 + $0x28] sm:$0xff]  ;;  %v245_v14 = vld [vmem:[%s344_s1 + $0x18] sm:$0xff] }
   0x4   :  { %64 = vmatpush.bf16.msra.mxu0 %v55_v8  ;;  %v166_v10 = vld [vmem:[%s348_s2] sm:$0xff]  ;;  %v167_v13 = vld [vmem:[%s348_s2 + $0x8] sm:$0xff]  ;;  %v244_v15 = vld [vmem:[%s344_s1 + $0x10] sm:$0xff] }
   0x5   :  { %239 = vmatmul.msk.bf16.vlgmr.msra.gmra.mxu2 %vm134_vm1, %v202_v7  ;;  %170 = vperm.xlu0 %258, %v166_v10   ;;  %v246_v12 = vld [vmem:[%s344_s1 + $0x20] sm:$0xff]  ;;  %v243_v16 = vld [vmem:[%s344_s1 + $0x8] sm:$0xff] }
   0x6   :  { %139 = vmatpush.bf16.msra.mxu1 %v248_v1  ;;  %v242_v17 = vld [vmem:[%s344_s1] sm:$0xff]  ;;  %v241_v19 = vld [vmem:[%s345_s0 + $0x4] sm:$0xf0] }
   0x7   :  { %194 = vmatmul.msk.bf16.vlgmr.msra.gmra.mxu0 %vm49_vm2, %v251_v9  ;;  %v197_v18 = vld [vmem:[%s345_s0] sm:$0xf] }
   0x8   :  { %v198_v20 = vor.u32 %v241_v19, %v197_v18 }
   0xa   :  { %140 = vmatpush.bf16.msra.mxu1 %v247_v11 }
   0xd   :  { %175 = vperm.xlu0 %258, %v167_v13  }
   0xe   :  { %141 = vmatpush.bf16.msra.mxu1 %v246_v12 }
  0x12   :  { %142 = vmatpush.bf16.msra.mxu1 %v245_v14 }
  0x16   :  { %143 = vmatpush.bf16.msra.mxu1 %v244_v15 }
  0x1a   :  { %144 = vmatpush.bf16.msra.mxu1 %v243_v16 }
  0x1e   :  { %145 = vmatpush.bf16.msra.mxu1 %v242_v17 }
  0x21   :  { %146 = vmatmul.bf16.vlgmr.msra.gmra.mxu1 %v198_v20 }
  0x77   :  { %v171_v24 = vpop.permute.xlu0 %170 }
  0x7f   :  { %v176_v33 = vpop.permute.xlu0 %175 }
  0x84   :  { %v66_v21 = vpop.f32.mrf.mxu0 }
  0x88   :  { %v161_v22 = vpop.f32.mrf.mxu2 }
  0x8c   :  { %v68_v27 = vpop.f32.mrf.mxu0 }
  0x90   :  { %v163_v30 = vpop.f32.mrf.mxu2 }
  0x9e   :  { %v147_v23 = vpop.f32.mrf.mxu1 }
  0x9f   :  { %v148_v25 = vadd.f32 %v147_v23, %v66_v21 }
  0xa1   :  { %v162_v26 = vadd.f32 %v161_v22, %v148_v25 }
  0xa3   :  { %v178_v31 = vadd.f32 %v171_v24, %v162_v26 }
  0xa5   :  { %v180_v35 = vmax.f32 %v178_v31, 0.0 }
  0xa6   :  { %v149_v28 = vpop.f32.mrf.mxu1 }
  0xa7   :  { %v150_v29 = vadd.f32 %v149_v28, %v68_v27 }
  0xa9   :  { %v164_v32 = vadd.f32 %v163_v30, %v150_v29 }
  0xab   :  { %v179_v34 = vadd.f32 %v176_v33, %v164_v32 }
  0xad   :  { %v181_v36 = vmax.f32 %v179_v34, 0.0 }
  0xaf   :  { %v255_v37 = vpack.c.bf16 %v181_v36, %v180_v35 }
  0xb1   :  { %256 = vst [vmem:[%s349_s5] sm:$0xff] %v255_v37  }

// kernel: _lambda_.30
= control target key start
LH: loop header
LB: loop body
LE: loop exit
PB: predicated region body
PF: predicated region fallthrough
CT: control target
= control target key end

     0   :  { %v215_v4 = vmov 0   ;;  %vm110_vm0 = vcmask 130048   ;;  %s284_s1 = inlined_call_operand.vmem [shape: bf16[144,128], index: 1, kind: input, shape index: {}]   ;;  %s285_s0 = inlined_call_operand.vmem [shape: bf16[16,144], index: 0, kind: input, shape index: {}]   ;;  %s286_s2 = inlined_call_operand.vmem [shape: f32[16,1], index: 2, kind: input, shape index: {}]   ;;  %s287_s3 = inlined_call_operand.vmem [shape: bf16[16,128], index: 3, kind: output, shape index: {}]  }
   0x1   :  { %v206_v0 = vld [vmem:[%s284_s1 + $0x38] sm:$0xff]  ;;  %v205_v1 = vld [vmem:[%s284_s1 + $0x30] sm:$0xff]  ;;  %v207_v2 = vld [vmem:[%s284_s1 + $0x40] sm:$0xff]  ;;  %214 = vset.pattern.permute.xlu0 %v215_v4 }
   0x2   :  { %114 = vmatpush.bf16.msra.mxu0 %v206_v0  ;;  %v197_v3 = vld [vmem:[%s285_s0 + $0x4] sm:$0xf]  ;;  %v156_v5 = vld [vmem:[%s285_s0 + $0x8] sm:$0xf0]  ;;  %135 = vmatpush.bf16.msra.mxu1 %v207_v2  ;;  %v202_v11 = vld [vmem:[%s284_s1 + $0x18] sm:$0xff] }
   0x3   :  { %v159_v6 = vor.u32 %v197_v3, %v156_v5  ;;  %v35_v7 = vld [vmem:[%s286_s2] sm:$0xff]  ;;  %v204_v8 = vld [vmem:[%s284_s1 + $0x28] sm:$0xff]  ;;  %v201_v12 = vld [vmem:[%s284_s1 + $0x10] sm:$0xff] }
   0x4   :  { %39 = vperm.xlu0 %214, %v35_v7   ;;  %v203_v9 = vld [vmem:[%s284_s1 + $0x20] sm:$0xff]  ;;  %v36_v10 = vld [vmem:[%s286_s2 + $0x8] sm:$0xff] }
   0x5   :  { %196 = vmatmul.msk.bf16.vlgmr.msra.gmra.mxu1 %vm110_vm0, %v159_v6  ;;  %v200_v13 = vld [vmem:[%s284_s1 + $0x8] sm:$0xff]  ;;  %v199_v14 = vld [vmem:[%s284_s1] sm:$0xff] }
   0x6   :  { %115 = vmatpush.bf16.msra.mxu0 %v205_v1  ;;  %v154_v15 = vld [vmem:[%s285_s0] sm:$0xf]  ;;  %v198_v16 = vld [vmem:[%s285_s0 + $0x4] sm:$0xf0] }
   0x7   :  { %v155_v17 = vor.u32 %v198_v16, %v154_v15 }
   0xa   :  { %116 = vmatpush.bf16.msra.mxu0 %v204_v8 }
   0xc   :  { %44 = vperm.xlu0 %214, %v36_v10  }
   0xe   :  { %117 = vmatpush.bf16.msra.mxu0 %v203_v9 }
  0x12   :  { %118 = vmatpush.bf16.msra.mxu0 %v202_v11 }
  0x16   :  { %119 = vmatpush.bf16.msra.mxu0 %v201_v12 }
  0x1a   :  { %120 = vmatpush.bf16.msra.mxu0 %v200_v13 }
  0x1e   :  { %121 = vmatpush.bf16.msra.mxu0 %v199_v14 }
  0x21   :  { %122 = vmatmul.bf16.vlgmr.msra.gmra.mxu0 %v155_v17 }
  0x76   :  { %v40_v18 = vpop.permute.xlu0 %39 }
  0x7e   :  { %v45_v22 = vpop.permute.xlu0 %44 }
  0x82   :  { %v137_v19 = vpop.f32.mrf.mxu1 }
  0x8a   :  { %v139_v26 = vpop.f32.mrf.mxu1 }
  0x9e   :  { %v123_v20 = vpop.f32.mrf.mxu0 }
  0x9f   :  { %v124_v21 = vadd.f32 %v123_v20, %v40_v18 }
  0xa1   :  { %v138_v24 = vadd.f32 %v137_v19, %v124_v21 }
  0xa3   :  { %v142_v28 = vmax.f32 %v138_v24, 0.0 }
  0xa6   :  { %v125_v23 = vpop.f32.mrf.mxu0 }
  0xa7   :  { %v126_v25 = vadd.f32 %v125_v23, %v45_v22 }
  0xa9   :  { %v140_v27 = vadd.f32 %v139_v26, %v126_v25 }
  0xab   :  { %v143_v29 = vmax.f32 %v140_v27, 0.0 }
  0xad   :  { %v211_v30 = vpack.c.bf16 %v143_v29, %v142_v28 }
  0xaf   :  { %212 = vst [vmem:[%s287_s3] sm:$0xff] %v211_v30  }

// kernel: _lambda_.31
= control target key start
LH: loop header
LB: loop body
LE: loop exit
PB: predicated region body
PF: predicated region fallthrough
CT: control target
= control target key end

     0   :  { %v228_v4 = vmov 0   ;;  %vm113_vm0 = vcmask 130048   ;;  %s305_s1 = inlined_call_operand.vmem [shape: bf16[144,128], index: 1, kind: input, shape index: {}]   ;;  %s306_s0 = inlined_call_operand.vmem [shape: bf16[16,144], index: 0, kind: input, shape index: {}]   ;;  %s307_s2 = inlined_call_operand.vmem [shape: f32[16,1], index: 2, kind: input, shape index: {}]   ;;  %s308_s3 = inlined_call_operand.vmem [shape: bf16[16,128], index: 3, kind: input, shape index: {}]   ;;  %s309_s4 = inlined_call_operand.vmem [shape: bf16[16,128], index: 4, kind: output, shape index: {}]  }
   0x1   :  { %v215_v0 = vld [vmem:[%s305_s1 + $0x38] sm:$0xff]  ;;  %v214_v1 = vld [vmem:[%s305_s1 + $0x30] sm:$0xff]  ;;  %v216_v2 = vld [vmem:[%s305_s1 + $0x40] sm:$0xff]  ;;  %227 = vset.pattern.permute.xlu0 %v228_v4 }
   0x2   :  { %117 = vmatpush.bf16.msra.mxu0 %v215_v0  ;;  %v206_v3 = vld [vmem:[%s306_s0 + $0x4] sm:$0xf]  ;;  %v165_v5 = vld [vmem:[%s306_s0 + $0x8] sm:$0xf0]  ;;  %138 = vmatpush.bf16.msra.mxu1 %v216_v2  ;;  %v211_v11 = vld [vmem:[%s305_s1 + $0x18] sm:$0xff] }
   0x3   :  { %v168_v6 = vor.u32 %v206_v3, %v165_v5  ;;  %v38_v7 = vld [vmem:[%s307_s2] sm:$0xff]  ;;  %v213_v8 = vld [vmem:[%s305_s1 + $0x28] sm:$0xff]  ;;  %v210_v12 = vld [vmem:[%s305_s1 + $0x10] sm:$0xff] }
   0x4   :  { %42 = vperm.xlu0 %227, %v38_v7   ;;  %v212_v9 = vld [vmem:[%s305_s1 + $0x20] sm:$0xff]  ;;  %v39_v10 = vld [vmem:[%s307_s2 + $0x8] sm:$0xff] }
   0x5   :  { %205 = vmatmul.msk.bf16.vlgmr.msra.gmra.mxu1 %vm113_vm0, %v168_v6  ;;  %v209_v13 = vld [vmem:[%s305_s1 + $0x8] sm:$0xff]  ;;  %v208_v14 = vld [vmem:[%s305_s1] sm:$0xff] }
   0x6   :  { %118 = vmatpush.bf16.msra.mxu0 %v214_v1  ;;  %v163_v15 = vld [vmem:[%s306_s0] sm:$0xf]  ;;  %v207_v16 = vld [vmem:[%s306_s0 + $0x4] sm:$0xf0] }
   0x7   :  { %v164_v17 = vor.u32 %v207_v16, %v163_v15  ;;  %v218_v22 = vld [vmem:[%s308_s3] sm:$0xff]  }
   0x8   :  { %v219_v24 = vunpack.c.l.bf16 %v218_v22  ;;  %v220_v28 = vunpack.c.h.bf16 %v218_v22 }
   0xa   :  { %119 = vmatpush.bf16.msra.mxu0 %v213_v8 }
   0xc   :  { %47 = vperm.xlu0 %227, %v39_v10  }
   0xe   :  { %120 = vmatpush.bf16.msra.mxu0 %v212_v9 }
  0x12   :  { %121 = vmatpush.bf16.msra.mxu0 %v211_v11 }
  0x16   :  { %122 = vmatpush.bf16.msra.mxu0 %v210_v12 }
  0x1a   :  { %123 = vmatpush.bf16.msra.mxu0 %v209_v13 }
  0x1e   :  { %124 = vmatpush.bf16.msra.mxu0 %v208_v14 }
  0x21   :  { %125 = vmatmul.bf16.vlgmr.msra.gmra.mxu0 %v164_v17 }
  0x76   :  { %v43_v18 = vpop.permute.xlu0 %42 }
  0x7e   :  { %v48_v25 = vpop.permute.xlu0 %47 }
  0x82   :  { %v140_v19 = vpop.f32.mrf.mxu1 }
  0x8a   :  { %v142_v29 = vpop.f32.mrf.mxu1 }
  0x9e   :  { %v126_v20 = vpop.f32.mrf.mxu0 }
  0x9f   :  { %v127_v21 = vadd.f32 %v126_v20, %v43_v18 }
  0xa1   :  { %v141_v23 = vadd.f32 %v140_v19, %v127_v21 }
  0xa3   :  { %v149_v30 = vadd.f32 %v219_v24, %v141_v23 }
  0xa5   :  { %v151_v33 = vmax.f32 %v149_v30, 0.0 }
  0xa6   :  { %v128_v26 = vpop.f32.mrf.mxu0 }
  0xa7   :  { %v129_v27 = vadd.f32 %v128_v26, %v48_v25 }
  0xa9   :  { %v143_v31 = vadd.f32 %v142_v29, %v129_v27 }
  0xab   :  { %v150_v32 = vadd.f32 %v220_v28, %v143_v31 }
  0xad   :  { %v152_v34 = vmax.f32 %v150_v32, 0.0 }
  0xaf   :  { %v224_v35 = vpack.c.bf16 %v152_v34, %v151_v33 }
  0xb1   :  { %225 = vst [vmem:[%s309_s4] sm:$0xff] %v224_v35  }

// kernel: _lambda_.32
= control target key start
LH: loop header
LB: loop body
LE: loop exit
PB: predicated region body
PF: predicated region fallthrough
CT: control target
= control target key end

     0   :  { %v283_v6 = vmov 0   ;;  %vm133_vm0 = vcmask 130048   ;;  %s375_s1 = inlined_call_operand.vmem [shape: bf16[144,128], index: 1, kind: input, shape index: {}]   ;;  %s376_s0 = inlined_call_operand.vmem [shape: bf16[32,144], index: 0, kind: input, shape index: {}]   ;;  %s377_s2 = inlined_call_operand.vmem [shape: f32[32,1], index: 2, kind: input, shape index: {}]   ;;  %s378_s3 = inlined_call_operand.vmem [shape: bf16[32,128], index: 3, kind: output, shape index: {}]  }
   0x1   :  { %v259_v0 = vld [vmem:[%s375_s1 + $0x38] sm:$0xff]  ;;  %v260_v1 = vld [vmem:[%s375_s1 + $0x40] sm:$0xff]  ;;  %v258_v3 = vld [vmem:[%s375_s1 + $0x30] sm:$0xff]  ;;  %282 = vset.pattern.permute.xlu1 %v283_v6  ;;  %281 = vset.pattern.permute.xlu0 %v283_v6 }
   0x2   :  { %v248_v2 = vld [vmem:[%s376_s0 + $0x4] sm:$0xf]  ;;  %140 = vmatpush.bf16.msra.mxu0 %v259_v0  ;;  %272 = vmatpush.bf16.msra.mxu2 %v259_v0  ;;  %v198_v4 = vld [vmem:[%s376_s0 + $0x8] sm:$0xf0]  ;;  %v39_v7 = vld [vmem:[%s377_s2 + $0x10] sm:$0xff] }
   0x3   :  { %166 = vmatpush.bf16.msra.mxu1 %v260_v1  ;;  %v201_v5 = vor.u32 %v248_v2, %v198_v4  ;;  %v257_v8 = vld [vmem:[%s375_s1 + $0x28] sm:$0xff]  ;;  %v37_v9 = vld [vmem:[%s377_s2] sm:$0xff]  ;;  %53 = vperm.xlu1 %282, %v39_v7   ;;  %v40_v11 = vld [vmem:[%s377_s2 + $0x18] sm:$0xff] }
   0x4   :  { %43 = vperm.xlu0 %281, %v37_v9   ;;  %v256_v10 = vld [vmem:[%s375_s1 + $0x20] sm:$0xff]  ;;  %v38_v12 = vld [vmem:[%s377_s2 + $0x8] sm:$0xff]  ;;  %v255_v13 = vld [vmem:[%s375_s1 + $0x18] sm:$0xff] }
   0x5   :  { %v250_v14 = vld [vmem:[%s376_s0 + $0x14] sm:$0xf]  ;;  %v206_v15 = vld [vmem:[%s376_s0 + $0x18] sm:$0xf0]  ;;  %v253_v18 = vld [vmem:[%s375_s1 + $0x8] sm:$0xff] }
   0x6   :  { %141 = vmatpush.bf16.msra.mxu0 %v258_v3  ;;  %273 = vmatpush.bf16.msra.mxu2 %v258_v3  ;;  %v254_v16 = vld [vmem:[%s375_s1 + $0x10] sm:$0xff]  ;;  %v209_v17 = vor.u32 %v250_v14, %v206_v15  ;;  %v252_v19 = vld [vmem:[%s375_s1] sm:$0xff]  ;;  %v249_v21 = vld [vmem:[%s376_s0 + $0x4] sm:$0xf0] }
   0x7   :  { %246 = vmatmul.msk.bf16.vlgmr.msra.gmra.mxu1 %vm133_vm0, %v201_v5  ;;  %v196_v20 = vld [vmem:[%s376_s0] sm:$0xf]  ;;  %v204_v22 = vld [vmem:[%s376_s0 + $0x10] sm:$0xf]  ;;  %v251_v23 = vld [vmem:[%s376_s0 + $0x14] sm:$0xf0] }
   0x8   :  { %v197_v24 = vor.u32 %v249_v21, %v196_v20  ;;  %v205_v25 = vor.u32 %v251_v23, %v204_v22 }
   0xa   :  { %142 = vmatpush.bf16.msra.mxu0 %v257_v8  ;;  %274 = vmatpush.bf16.msra.mxu2 %v257_v8 }
   0xb   :  { %58 = vperm.xlu1 %282, %v40_v11  }
   0xc   :  { %48 = vperm.xlu0 %281, %v38_v12  }
   0xe   :  { %143 = vmatpush.bf16.msra.mxu0 %v256_v10  ;;  %275 = vmatpush.bf16.msra.mxu2 %v256_v10 }
  0x12   :  { %144 = vmatpush.bf16.msra.mxu0 %v255_v13  ;;  %276 = vmatpush.bf16.msra.mxu2 %v255_v13 }
  0x16   :  { %145 = vmatpush.bf16.msra.mxu0 %v254_v16  ;;  %277 = vmatpush.bf16.msra.mxu2 %v254_v16 }
  0x17   :  { %247 = vmatmul.msk.bf16.gmra.mxu1 %vm133_vm0, %v209_v17 }
  0x1a   :  { %146 = vmatpush.bf16.msra.mxu0 %v253_v18  ;;  %278 = vmatpush.bf16.msra.mxu2 %v253_v18 }
  0x1e   :  { %147 = vmatpush.bf16.msra.mxu0 %v252_v19  ;;  %279 = vmatpush.bf16.msra.mxu2 %v252_v19 }
  0x21   :  { %148 = vmatmul.bf16.vlgmr.msra.gmra.mxu0 %v197_v24  ;;  %153 = vmatmul.bf16.vlgmr.msra.gmra.mxu2 %v205_v25 }
  0x75   :  { %v54_v30 = vpop.permute.xlu1 %53 }
  0x76   :  { %v44_v28 = vpop.permute.xlu0 %43 }
  0x7d   :  { %v59_v42 = vpop.permute.xlu1 %58 }
  0x7e   :  { %v49_v34 = vpop.permute.xlu0 %48 }
  0x84   :  { %v168_v26 = vpop.f32.mrf.mxu1 }
  0x8c   :  { %v170_v27 = vpop.f32.mrf.mxu1 }
  0x94   :  { %v173_v32 = vpop.f32.mrf.mxu1 }
  0x9c   :  { %v175_v47 = vpop.f32.mrf.mxu1 }
  0x9e   :  { %v149_v29 = vpop.f32.mrf.mxu0 }
  0x9f   :  { %v150_v31 = vadd.f32 %v149_v29, %v44_v28 }
  0xa1   :  { %v169_v36 = vadd.f32 %v168_v26, %v150_v31 }
  0xa3   :  { %v178_v40 = vmax.f32 %v169_v36, 0.0 }
  0xa4   :  { %v154_v33 = vpop.f32.mrf.mxu2 }
  0xa5   :  { %v155_v38 = vadd.f32 %v154_v33, %v54_v30 }
  0xa6   :  { %v151_v35 = vpop.f32.mrf.mxu0 }
  0xa7   :  { %v152_v37 = vadd.f32 %v151_v35, %v49_v34  ;;  %v174_v44 = vadd.f32 %v173_v32, %v155_v38 }
  0xa9   :  { %v171_v39 = vadd.f32 %v170_v27, %v152_v37  ;;  %v180_v49 = vmax.f32 %v174_v44, 0.0 }
  0xab   :  { %v179_v41 = vmax.f32 %v171_v39, 0.0 }
  0xac   :  { %v156_v43 = vpop.f32.mrf.mxu2 }
  0xad   :  { %v264_v45 = vpack.c.bf16 %v179_v41, %v178_v40  ;;  %v157_v46 = vadd.f32 %v156_v43, %v59_v42 }
  0xaf   :  { %265 = vst [vmem:[%s378_s3] sm:$0xff] %v264_v45   ;;  %v176_v48 = vadd.f32 %v175_v47, %v157_v46 }
  0xb1   :  { %v181_v50 = vmax.f32 %v176_v48, 0.0 }
  0xb3   :  { %v269_v51 = vpack.c.bf16 %v181_v50, %v180_v49 }
  0xb5   :  { %271 = vst [vmem:[%s378_s3 + $0x8] sm:$0xff] %v269_v51  }

// kernel: _lambda_.34
= control target key start
LH: loop header
LB: loop body
LE: loop exit
PB: predicated region body
PF: predicated region fallthrough
CT: control target
= control target key end

     0   :  { %v445_v5 = vmov 0   ;;  %vm221_vm0 = vcmask 261120   ;;  %s576_s1 = inlined_call_operand.vmem [shape: bf16[288,128], index: 1, kind: input, shape index: {}]   ;;  %s577_s0 = inlined_call_operand.vmem [shape: bf16[32,288], index: 0, kind: input, shape index: {}]   ;;  %s578_s2 = inlined_call_operand.vmem [shape: f32[32,1], index: 2, kind: input, shape index: {}]   ;;  %s579_s3 = inlined_call_operand.vmem [shape: bf16[32,128], index: 3, kind: output, shape index: {}]  }
   0x1   :  { %v412_v0 = vld [vmem:[%s576_s1 + $0x38] sm:$0xff]  ;;  %v411_v2 = vld [vmem:[%s576_s1 + $0x30] sm:$0xff]  ;;  %v422_v3 = vld [vmem:[%s576_s1 + $0x88] sm:$0xff]  ;;  %443 = vset.pattern.permute.xlu0 %v445_v5  ;;  %444 = vset.pattern.permute.xlu1 %v445_v5 }
   0x2   :  { %v420_v1 = vld [vmem:[%s576_s1 + $0x78] sm:$0xff]  ;;  %228 = vmatpush.bf16.msra.mxu0 %v412_v0  ;;  %434 = vmatpush.bf16.msra.mxu3 %v412_v0  ;;  %v419_v4 = vld [vmem:[%s576_s1 + $0x70] sm:$0xff]  ;;  %v421_v6 = vld [vmem:[%s576_s1 + $0x80] sm:$0xff] }
   0x3   :  { %247 = vmatpush.bf16.msra.mxu1 %v420_v1  ;;  %272 = vmatpush.bf16.msra.mxu2 %v422_v3  ;;  %v311_v7 = vld [vmem:[%s577_s0 + $0x8] sm:$0xf]  ;;  %v401_v8 = vld [vmem:[%s577_s0 + $0x10] sm:$0xf0]  ;;  %v59_v12 = vld [vmem:[%s578_s2] sm:$0xff] }
   0x4   :  { %v410_v9 = vld [vmem:[%s576_s1 + $0x28] sm:$0xff]  ;;  %v312_v11 = vor.u32 %v401_v8, %v311_v7  ;;  %v409_v13 = vld [vmem:[%s576_s1 + $0x20] sm:$0xff]  ;;  %65 = vperm.xlu0 %443, %v59_v12   ;;  %v408_v15 = vld [vmem:[%s576_s1 + $0x18] sm:$0xff] }
   0x5   :  { %v418_v10 = vld [vmem:[%s576_s1 + $0x68] sm:$0xff]  ;;  %v417_v14 = vld [vmem:[%s576_s1 + $0x60] sm:$0xff]  ;;  %v416_v16 = vld [vmem:[%s576_s1 + $0x58] sm:$0xff] }
   0x6   :  { %229 = vmatpush.bf16.msra.mxu0 %v411_v2  ;;  %435 = vmatpush.bf16.msra.mxu3 %v411_v2  ;;  %v407_v17 = vld [vmem:[%s576_s1 + $0x10] sm:$0xff]  ;;  %v60_v19 = vld [vmem:[%s578_s2 + $0x8] sm:$0xff]  ;;  %v323_v21 = vld [vmem:[%s577_s0 + $0x20] sm:$0xf] }
   0x7   :  { %248 = vmatpush.bf16.msra.mxu1 %v419_v4  ;;  %273 = vmatpush.bf16.msra.mxu2 %v421_v6  ;;  %v61_v18 = vld [vmem:[%s578_s2 + $0x10] sm:$0xff]  ;;  %v404_v22 = vld [vmem:[%s577_s0 + $0x28] sm:$0xf0]  ;;  %v405_v26 = vld [vmem:[%s576_s1] sm:$0xff] }
   0x8   :  { %v415_v20 = vld [vmem:[%s576_s1 + $0x50] sm:$0xff]  ;;  %75 = vperm.xlu1 %444, %v61_v18   ;;  %v406_v23 = vld [vmem:[%s576_s1 + $0x8] sm:$0xff]  ;;  %v324_v25 = vor.u32 %v404_v22, %v323_v21  ;;  %v303_v27 = vld [vmem:[%s577_s0] sm:$0xf] }
   0x9   :  { %v414_v24 = vld [vmem:[%s576_s1 + $0x48] sm:$0xff]  ;;  %v62_v28 = vld [vmem:[%s578_s2 + $0x18] sm:$0xff]  ;;  %v403_v31 = vld [vmem:[%s577_s0 + $0x20] sm:$0xf0] }
   0xa   :  { %230 = vmatpush.bf16.msra.mxu0 %v410_v9  ;;  %436 = vmatpush.bf16.msra.mxu3 %v410_v9  ;;  %v400_v29 = vld [vmem:[%s577_s0 + $0x8] sm:$0xf0]  ;;  %v315_v30 = vld [vmem:[%s577_s0 + $0x18] sm:$0xf]  ;;  %v413_v32 = vld [vmem:[%s576_s1 + $0x40] sm:$0xff] }
   0xb   :  { %249 = vmatpush.bf16.msra.mxu1 %v418_v10  ;;  %397 = vmatmul.msk.bf16.vlgmr.msra.gmra.mxu2 %vm221_vm0, %v312_v11  ;;  %v399_v33 = vld [vmem:[%s577_s0 + $0x4] sm:$0xf]  ;;  %v305_v34 = vld [vmem:[%s577_s0 + $0xc] sm:$0xf0]  ;;  %v304_v35 = vor.u32 %v400_v29, %v303_v27  ;;  %v316_v36 = vor.u32 %v403_v31, %v315_v30  ;;  %v402_v38 = vld [vmem:[%s577_s0 + $0x1c] sm:$0xf] }
   0xc   :  { %70 = vperm.xlu0 %443, %v60_v19   ;;  %v308_v37 = vor.u32 %v399_v33, %v305_v34  ;;  %v317_v39 = vld [vmem:[%s577_s0 + $0x24] sm:$0xf0] }
   0xd   :  { %v320_v40 = vor.u32 %v402_v38, %v317_v39 }
   0xe   :  { %231 = vmatpush.bf16.msra.mxu0 %v409_v13  ;;  %437 = vmatpush.bf16.msra.mxu3 %v409_v13 }
   0xf   :  { %250 = vmatpush.bf16.msra.mxu1 %v417_v14 }
  0x10   :  { %80 = vperm.xlu1 %444, %v62_v28  }
  0x12   :  { %232 = vmatpush.bf16.msra.mxu0 %v408_v15  ;;  %438 = vmatpush.bf16.msra.mxu3 %v408_v15 }
  0x13   :  { %251 = vmatpush.bf16.msra.mxu1 %v416_v16 }
  0x16   :  { %233 = vmatpush.bf16.msra.mxu0 %v407_v17  ;;  %439 = vmatpush.bf16.msra.mxu3 %v407_v17 }
  0x17   :  { %252 = vmatpush.bf16.msra.mxu1 %v415_v20 }
  0x1a   :  { %234 = vmatpush.bf16.msra.mxu0 %v406_v23  ;;  %440 = vmatpush.bf16.msra.mxu3 %v406_v23 }
  0x1b   :  { %253 = vmatpush.bf16.msra.mxu1 %v414_v24  ;;  %398 = vmatmul.msk.bf16.gmra.mxu2 %vm221_vm0, %v324_v25 }
  0x1e   :  { %235 = vmatpush.bf16.msra.mxu0 %v405_v26  ;;  %441 = vmatpush.bf16.msra.mxu3 %v405_v26 }
  0x1f   :  { %254 = vmatpush.bf16.msra.mxu1 %v413_v32 }
  0x21   :  { %236 = vmatmul.bf16.vlgmr.msra.gmra.mxu0 %v304_v35  ;;  %241 = vmatmul.bf16.vlgmr.msra.gmra.mxu3 %v316_v36 }
  0x22   :  { %255 = vmatmul.bf16.vlgmr.msra.gmra.mxu1 %v308_v37 }
  0x32   :  { %260 = vmatmul.bf16.gmra.mxu1 %v320_v40 }
  0x76   :  { %v66_v41 = vpop.permute.xlu0 %65 }
  0x7a   :  { %v76_v53 = vpop.permute.xlu1 %75 }
  0x7e   :  { %v71_v46 = vpop.permute.xlu0 %70 }
  0x82   :  { %v81_v63 = vpop.permute.xlu1 %80 }
  0x8e   :  { %v275_v42 = vpop.f32.mrf.mxu2 }
  0x96   :  { %v277_v48 = vpop.f32.mrf.mxu2 }
  0x9e   :  { %v237_v43 = vpop.f32.mrf.mxu0  ;;  %v280_v60 = vpop.f32.mrf.mxu2 }
  0x9f   :  { %v256_v44 = vpop.f32.mrf.mxu1  ;;  %v238_v45 = vadd.f32 %v237_v43, %v66_v41 }
  0xa1   :  { %v257_v47 = vadd.f32 %v256_v44, %v238_v45 }
  0xa3   :  { %v276_v52 = vadd.f32 %v275_v42, %v257_v47 }
  0xa4   :  { %v242_v54 = vpop.f32.mrf.mxu3 }
  0xa5   :  { %v285_v57 = vmax.f32 %v276_v52, 0.0  ;;  %v243_v62 = vadd.f32 %v242_v54, %v76_v53 }
  0xa6   :  { %v239_v49 = vpop.f32.mrf.mxu0  ;;  %v282_v6 = vpop.f32.mrf.mxu2 }
  0xa7   :  { %v240_v50 = vadd.f32 %v239_v49, %v71_v46  ;;  %v258_v51 = vpop.f32.mrf.mxu1 }
  0xa9   :  { %v259_v55 = vadd.f32 %v258_v51, %v240_v50 }
  0xab   :  { %v278_v56 = vadd.f32 %v277_v48, %v259_v55 }
  0xac   :  { %v244_v0 = vpop.f32.mrf.mxu3 }
  0xad   :  { %v286_v58 = vmax.f32 %v278_v56, 0.0  ;;  %v245_v2 = vadd.f32 %v244_v0, %v81_v63 }
  0xaf   :  { %v426_v59 = vpack.c.bf16 %v286_v58, %v285_v57  ;;  %v261_v61 = vpop.f32.mrf.mxu1 }
  0xb0   :  { %v262_v1 = vadd.f32 %v261_v61, %v243_v62 }
  0xb1   :  { %427 = vst [vmem:[%s579_s3] sm:$0xff] %v426_v59  }
  0xb2   :  { %v281_v4 = vadd.f32 %v280_v60, %v262_v1 }
  0xb4   :  { %v287_v8 = vmax.f32 %v281_v4, 0.0 }
  0xb7   :  { %v263_v3 = vpop.f32.mrf.mxu1 }
  0xb8   :  { %v264_v5 = vadd.f32 %v263_v3, %v245_v2 }
  0xba   :  { %v283_v7 = vadd.f32 %v282_v6, %v264_v5 }
  0xbc   :  { %v288_v9 = vmax.f32 %v283_v7, 0.0 }
  0xbe   :  { %v431_v10 = vpack.c.bf16 %v288_v9, %v287_v8 }
  0xc0   :  { %433 = vst [vmem:[%s579_s3 + $0x8] sm:$0xff] %v431_v10  }

// kernel: _lambda_.35
= control target key start
LH: loop header
LB: loop body
LE: loop exit
PB: predicated region body
PF: predicated region fallthrough
CT: control target
= control target key end

     0   :  { %v469_v5 = vmov 0   ;;  %vm224_vm0 = vcmask 261120   ;;  %s611_s1 = inlined_call_operand.vmem [shape: bf16[288,128], index: 1, kind: input, shape index: {}]   ;;  %s612_s0 = inlined_call_operand.vmem [shape: bf16[32,288], index: 0, kind: input, shape index: {}]   ;;  %s613_s2 = inlined_call_operand.vmem [shape: f32[32,1], index: 2, kind: input, shape index: {}]   ;;  %s614_s3 = inlined_call_operand.vmem [shape: bf16[32,128], index: 3, kind: input, shape index: {}]   ;;  %s615_s4 = inlined_call_operand.vmem [shape: bf16[32,128], index: 4, kind: output, shape index: {}]  }
   0x1   :  { %v427_v0 = vld [vmem:[%s611_s1 + $0x38] sm:$0xff]  ;;  %v426_v2 = vld [vmem:[%s611_s1 + $0x30] sm:$0xff]  ;;  %v437_v3 = vld [vmem:[%s611_s1 + $0x88] sm:$0xff]  ;;  %467 = vset.pattern.permute.xlu0 %v469_v5  ;;  %468 = vset.pattern.permute.xlu1 %v469_v5 }
   0x2   :  { %v435_v1 = vld [vmem:[%s611_s1 + $0x78] sm:$0xff]  ;;  %231 = vmatpush.bf16.msra.mxu0 %v427_v0  ;;  %458 = vmatpush.bf16.msra.mxu3 %v427_v0  ;;  %v434_v4 = vld [vmem:[%s611_s1 + $0x70] sm:$0xff]  ;;  %v436_v6 = vld [vmem:[%s611_s1 + $0x80] sm:$0xff] }
   0x3   :  { %250 = vmatpush.bf16.msra.mxu1 %v435_v1  ;;  %275 = vmatpush.bf16.msra.mxu2 %v437_v3  ;;  %v326_v7 = vld [vmem:[%s612_s0 + $0x8] sm:$0xf]  ;;  %v416_v8 = vld [vmem:[%s612_s0 + $0x10] sm:$0xf0]  ;;  %v62_v12 = vld [vmem:[%s613_s2] sm:$0xff] }
   0x4   :  { %v425_v9 = vld [vmem:[%s611_s1 + $0x28] sm:$0xff]  ;;  %v327_v11 = vor.u32 %v416_v8, %v326_v7  ;;  %v424_v13 = vld [vmem:[%s611_s1 + $0x20] sm:$0xff]  ;;  %68 = vperm.xlu0 %467, %v62_v12   ;;  %v423_v15 = vld [vmem:[%s611_s1 + $0x18] sm:$0xff] }
   0x5   :  { %v433_v10 = vld [vmem:[%s611_s1 + $0x68] sm:$0xff]  ;;  %v432_v14 = vld [vmem:[%s611_s1 + $0x60] sm:$0xff]  ;;  %v431_v16 = vld [vmem:[%s611_s1 + $0x58] sm:$0xff] }
   0x6   :  { %232 = vmatpush.bf16.msra.mxu0 %v426_v2  ;;  %459 = vmatpush.bf16.msra.mxu3 %v426_v2  ;;  %v422_v17 = vld [vmem:[%s611_s1 + $0x10] sm:$0xff]  ;;  %v63_v19 = vld [vmem:[%s613_s2 + $0x8] sm:$0xff]  ;;  %v338_v21 = vld [vmem:[%s612_s0 + $0x20] sm:$0xf] }
   0x7   :  { %251 = vmatpush.bf16.msra.mxu1 %v434_v4  ;;  %276 = vmatpush.bf16.msra.mxu2 %v436_v6  ;;  %v64_v18 = vld [vmem:[%s613_s2 + $0x10] sm:$0xff]  ;;  %v419_v22 = vld [vmem:[%s612_s0 + $0x28] sm:$0xf0]  ;;  %v420_v26 = vld [vmem:[%s611_s1] sm:$0xff] }
   0x8   :  { %v430_v20 = vld [vmem:[%s611_s1 + $0x50] sm:$0xff]  ;;  %78 = vperm.xlu1 %468, %v64_v18   ;;  %v421_v23 = vld [vmem:[%s611_s1 + $0x8] sm:$0xff]  ;;  %v339_v25 = vor.u32 %v419_v22, %v338_v21  ;;  %v318_v27 = vld [vmem:[%s612_s0] sm:$0xf] }
   0x9   :  { %v429_v24 = vld [vmem:[%s611_s1 + $0x48] sm:$0xff]  ;;  %v65_v28 = vld [vmem:[%s613_s2 + $0x18] sm:$0xff]  ;;  %v418_v31 = vld [vmem:[%s612_s0 + $0x20] sm:$0xf0] }
   0xa   :  { %233 = vmatpush.bf16.msra.mxu0 %v425_v9  ;;  %460 = vmatpush.bf16.msra.mxu3 %v425_v9  ;;  %v415_v29 = vld [vmem:[%s612_s0 + $0x8] sm:$0xf0]  ;;  %v330_v30 = vld [vmem:[%s612_s0 + $0x18] sm:$0xf]  ;;  %v428_v32 = vld [vmem:[%s611_s1 + $0x40] sm:$0xff] }
   0xb   :  { %252 = vmatpush.bf16.msra.mxu1 %v433_v10  ;;  %412 = vmatmul.msk.bf16.vlgmr.msra.gmra.mxu2 %vm224_vm0, %v327_v11  ;;  %v414_v33 = vld [vmem:[%s612_s0 + $0x4] sm:$0xf]  ;;  %v320_v34 = vld [vmem:[%s612_s0 + $0xc] sm:$0xf0]  ;;  %v319_v35 = vor.u32 %v415_v29, %v318_v27  ;;  %v331_v36 = vor.u32 %v418_v31, %v330_v30  ;;  %v417_v38 = vld [vmem:[%s612_s0 + $0x1c] sm:$0xf] }
   0xc   :  { %73 = vperm.xlu0 %467, %v63_v19   ;;  %v323_v37 = vor.u32 %v414_v33, %v320_v34  ;;  %v332_v39 = vld [vmem:[%s612_s0 + $0x24] sm:$0xf0]  ;;  %v439_v47 = vld [vmem:[%s614_s3] sm:$0xff]  }
   0xd   :  { %v335_v40 = vor.u32 %v417_v38, %v332_v39  ;;  %v440_v52 = vunpack.c.l.bf16 %v439_v47  ;;  %v441_v58 = vunpack.c.h.bf16 %v439_v47  ;;  %v456_v7 = vld [vmem:[%s614_s3 + $0x8] sm:$0xff]  }
   0xe   :  { %234 = vmatpush.bf16.msra.mxu0 %v424_v13  ;;  %461 = vmatpush.bf16.msra.mxu3 %v424_v13  ;;  %v444_v10 = vunpack.c.l.bf16 %v456_v7  ;;  %v445_v13 = vunpack.c.h.bf16 %v456_v7 }
   0xf   :  { %253 = vmatpush.bf16.msra.mxu1 %v432_v14 }
  0x10   :  { %83 = vperm.xlu1 %468, %v65_v28  }
  0x12   :  { %235 = vmatpush.bf16.msra.mxu0 %v423_v15  ;;  %462 = vmatpush.bf16.msra.mxu3 %v423_v15 }
  0x13   :  { %254 = vmatpush.bf16.msra.mxu1 %v431_v16 }
  0x16   :  { %236 = vmatpush.bf16.msra.mxu0 %v422_v17  ;;  %463 = vmatpush.bf16.msra.mxu3 %v422_v17 }
  0x17   :  { %255 = vmatpush.bf16.msra.mxu1 %v430_v20 }
  0x1a   :  { %237 = vmatpush.bf16.msra.mxu0 %v421_v23  ;;  %464 = vmatpush.bf16.msra.mxu3 %v421_v23 }
  0x1b   :  { %256 = vmatpush.bf16.msra.mxu1 %v429_v24  ;;  %413 = vmatmul.msk.bf16.gmra.mxu2 %vm224_vm0, %v339_v25 }
  0x1e   :  { %238 = vmatpush.bf16.msra.mxu0 %v420_v26  ;;  %465 = vmatpush.bf16.msra.mxu3 %v420_v26 }
  0x1f   :  { %257 = vmatpush.bf16.msra.mxu1 %v428_v32 }
  0x21   :  { %239 = vmatmul.bf16.vlgmr.msra.gmra.mxu0 %v319_v35  ;;  %244 = vmatmul.bf16.vlgmr.msra.gmra.mxu3 %v331_v36 }
  0x22   :  { %258 = vmatmul.bf16.vlgmr.msra.gmra.mxu1 %v323_v37 }
  0x32   :  { %263 = vmatmul.bf16.gmra.mxu1 %v335_v40 }
  0x76   :  { %v69_v41 = vpop.permute.xlu0 %68 }
  0x7a   :  { %v79_v55 = vpop.permute.xlu1 %78 }
  0x7e   :  { %v74_v48 = vpop.permute.xlu0 %73 }
  0x82   :  { %v84_v5 = vpop.permute.xlu1 %83 }
  0x8e   :  { %v278_v42 = vpop.f32.mrf.mxu2 }
  0x96   :  { %v280_v49 = vpop.f32.mrf.mxu2 }
  0x9e   :  { %v240_v43 = vpop.f32.mrf.mxu0  ;;  %v283_v1 = vpop.f32.mrf.mxu2 }
  0x9f   :  { %v241_v44 = vadd.f32 %v240_v43, %v69_v41  ;;  %v259_v45 = vpop.f32.mrf.mxu1 }
  0xa1   :  { %v260_v46 = vadd.f32 %v259_v45, %v241_v44 }
  0xa3   :  { %v279_v51 = vadd.f32 %v278_v42, %v260_v46 }
  0xa4   :  { %v245_v56 = vpop.f32.mrf.mxu3 }
  0xa5   :  { %v296_v59 = vadd.f32 %v440_v52, %v279_v51  ;;  %v246_v62 = vadd.f32 %v245_v56, %v79_v55 }
  0xa6   :  { %v242_v50 = vpop.f32.mrf.mxu0  ;;  %v285_v14 = vpop.f32.mrf.mxu2 }
  0xa7   :  { %v243_v53 = vadd.f32 %v242_v50, %v74_v48  ;;  %v261_v54 = vpop.f32.mrf.mxu1  ;;  %v300_v63 = vmax.f32 %v296_v59, 0.0 }
  0xa9   :  { %v262_v57 = vadd.f32 %v261_v54, %v243_v53 }
  0xab   :  { %v281_v60 = vadd.f32 %v280_v49, %v262_v57 }
  0xac   :  { %v247_v6 = vpop.f32.mrf.mxu3 }
  0xad   :  { %v297_v61 = vadd.f32 %v441_v58, %v281_v60  ;;  %v248_v8 = vadd.f32 %v247_v6, %v84_v5 }
  0xaf   :  { %v301_v0 = vmax.f32 %v297_v61, 0.0  ;;  %v264_v2 = vpop.f32.mrf.mxu1 }
  0xb0   :  { %v265_v4 = vadd.f32 %v264_v2, %v246_v62 }
  0xb1   :  { %v449_v3 = vpack.c.bf16 %v301_v0, %v300_v63 }
  0xb2   :  { %v284_v9 = vadd.f32 %v283_v1, %v265_v4 }
  0xb3   :  { %450 = vst [vmem:[%s615_s4] sm:$0xff] %v449_v3  }
  0xb4   :  { %v298_v15 = vadd.f32 %v444_v10, %v284_v9 }
  0xb6   :  { %v302_v18 = vmax.f32 %v298_v15, 0.0 }
  0xb7   :  { %v266_v11 = vpop.f32.mrf.mxu1 }
  0xb8   :  { %v267_v12 = vadd.f32 %v266_v11, %v248_v8 }
  0xba   :  { %v286_v16 = vadd.f32 %v285_v14, %v267_v12 }
  0xbc   :  { %v299_v17 = vadd.f32 %v445_v13, %v286_v16 }
  0xbe   :  { %v303_v19 = vmax.f32 %v299_v17, 0.0 }
  0xc0   :  { %v454_v20 = vpack.c.bf16 %v303_v19, %v302_v18 }
  0xc2   :  { %457 = vst [vmem:[%s615_s4 + $0x8] sm:$0xff] %v454_v20  }

// kernel: _lambda_.33
= control target key start
LH: loop header
LB: loop body
LE: loop exit
PB: predicated region body
PF: predicated region fallthrough
CT: control target
= control target key end

     0   :  { %vm87_vm0 = vcmask 130048   ;;  %vm251_vm1 = vcmask 261120   ;;  %v520_v22 = vmov 0   ;;  %s672_s4 = inlined_call_operand.vmem [shape: bf16[16,128], index: 4, kind: input, shape index: {}]   ;;  %s673_s1 = inlined_call_operand.vmem [shape: bf16[288,128], index: 1, kind: input, shape index: {}]   ;;  %s674_s3 = inlined_call_operand.vmem [shape: bf16[32,16], index: 3, kind: input, shape index: {}]   ;;  %s675_s0 = inlined_call_operand.vmem [shape: bf16[32,288], index: 0, kind: input, shape index: {}]   ;;  %s676_s2 = inlined_call_operand.vmem [shape: f32[32,1], index: 2, kind: input, shape index: {}]   ;;  %s677_s5 = inlined_call_operand.vmem [shape: bf16[32,128], index: 5, kind: output, shape index: {}]  }
   0x1   :  { %v497_v0 = vld [vmem:[%s672_s4] sm:$0xff]  ;;  %v484_v1 = vld [vmem:[%s673_s1 + $0x38] sm:$0xff]  ;;  %v483_v4 = vld [vmem:[%s673_s1 + $0x30] sm:$0xff]  ;;  %518 = vset.pattern.permute.xlu0 %v520_v22  ;;  %519 = vset.pattern.permute.xlu1 %v520_v22 }
   0x2   :  { %v492_v2 = vld [vmem:[%s673_s1 + $0x78] sm:$0xff]  ;;  %v495_v3 = vld [vmem:[%s674_s3] sm:$0xff]  ;;  %101 = vmatpush.bf16.msra.mxu0 %v497_v0  ;;  %509 = vmatpush.bf16.msra.mxu1 %v484_v1  ;;  %v491_v5 = vld [vmem:[%s673_s1 + $0x70] sm:$0xff] }
   0x3   :  { %277 = vmatpush.bf16.msra.mxu2 %v492_v2  ;;  %v494_v6 = vld [vmem:[%s673_s1 + $0x88] sm:$0xff]  ;;  %v493_v8 = vld [vmem:[%s673_s1 + $0x80] sm:$0xff]  ;;  %v473_v10 = vld [vmem:[%s675_s0 + $0x10] sm:$0xf0] }
   0x4   :  { %v482_v7 = vld [vmem:[%s673_s1 + $0x28] sm:$0xff]  ;;  %302 = vmatpush.bf16.msra.mxu3 %v494_v6  ;;  %v481_v13 = vld [vmem:[%s673_s1 + $0x20] sm:$0xff]  ;;  %v480_v15 = vld [vmem:[%s673_s1 + $0x18] sm:$0xff] }
   0x5   :  { %371 = vmatmul.msk.bf16.vlgmr.msra.gmra.mxu0 %vm87_vm0, %v495_v3  ;;  %v383_v9 = vld [vmem:[%s675_s0 + $0x8] sm:$0xf]  ;;  %v489_v14 = vld [vmem:[%s673_s1 + $0x60] sm:$0xff]  ;;  %v488_v16 = vld [vmem:[%s673_s1 + $0x58] sm:$0xff] }
   0x6   :  { %258 = vmatpush.bf16.msrb.mxu0 %v484_v1  ;;  %510 = vmatpush.bf16.msra.mxu1 %v483_v4  ;;  %v490_v11 = vld [vmem:[%s673_s1 + $0x68] sm:$0xff]  ;;  %v384_v12 = vor.u32 %v473_v10, %v383_v9  ;;  %v479_v18 = vld [vmem:[%s673_s1 + $0x10] sm:$0xff]  ;;  %v315_v19 = vld [vmem:[%s676_s2] sm:$0xff] }
   0x7   :  { %278 = vmatpush.bf16.msra.mxu2 %v491_v5  ;;  %v496_v17 = vld [vmem:[%s674_s3 + $0x8] sm:$0xff]  ;;  %v487_v20 = vld [vmem:[%s673_s1 + $0x50] sm:$0xff]  ;;  %321 = vperm.xlu0 %518, %v315_v19   ;;  %v395_v24 = vld [vmem:[%s675_s0 + $0x20] sm:$0xf] }
   0x8   :  { %303 = vmatpush.bf16.msra.mxu3 %v493_v8  ;;  %v317_v21 = vld [vmem:[%s676_s2 + $0x10] sm:$0xff]  ;;  %v478_v23 = vld [vmem:[%s673_s1 + $0x8] sm:$0xff]  ;;  %v477_v27 = vld [vmem:[%s673_s1] sm:$0xff] }
   0x9   :  { %v476_v25 = vld [vmem:[%s675_s0 + $0x28] sm:$0xf0]  ;;  %331 = vperm.xlu1 %519, %v317_v21   ;;  %v485_v28 = vld [vmem:[%s673_s1 + $0x40] sm:$0xff]  ;;  %v387_v30 = vld [vmem:[%s675_s0 + $0x18] sm:$0xf] }
   0xa   :  { %259 = vmatpush.bf16.msrb.mxu0 %v483_v4  ;;  %511 = vmatpush.bf16.msra.mxu1 %v482_v7  ;;  %v486_v26 = vld [vmem:[%s673_s1 + $0x48] sm:$0xff]  ;;  %v396_v29 = vor.u32 %v476_v25, %v395_v24  ;;  %v475_v31 = vld [vmem:[%s675_s0 + $0x20] sm:$0xf0]  ;;  %v377_v34 = vld [vmem:[%s675_s0 + $0xc] sm:$0xf0] }
   0xb   :  { %279 = vmatpush.bf16.msra.mxu2 %v490_v11  ;;  %469 = vmatmul.msk.bf16.vlgmr.msra.gmra.mxu3 %vm251_vm1, %v384_v12  ;;  %v316_v32 = vld [vmem:[%s676_s2 + $0x8] sm:$0xff]  ;;  %v471_v33 = vld [vmem:[%s675_s0 + $0x4] sm:$0xf]  ;;  %v318_v35 = vld [vmem:[%s676_s2 + $0x18] sm:$0xff]  ;;  %v388_v36 = vor.u32 %v475_v31, %v387_v30 }
   0xc   :  { %v380_v37 = vor.u32 %v471_v33, %v377_v34  ;;  %v375_v38 = vld [vmem:[%s675_s0] sm:$0xf]  ;;  %v472_v39 = vld [vmem:[%s675_s0 + $0x8] sm:$0xf0]  ;;  %v474_v41 = vld [vmem:[%s675_s0 + $0x1c] sm:$0xf] }
   0xd   :  { %v376_v40 = vor.u32 %v472_v39, %v375_v38  ;;  %v389_v42 = vld [vmem:[%s675_s0 + $0x24] sm:$0xf0] }
   0xe   :  { %260 = vmatpush.bf16.msrb.mxu0 %v482_v7  ;;  %512 = vmatpush.bf16.msra.mxu1 %v481_v13  ;;  %v392_v43 = vor.u32 %v474_v41, %v389_v42 }
   0xf   :  { %280 = vmatpush.bf16.msra.mxu2 %v489_v14  ;;  %326 = vperm.xlu0 %518, %v316_v32  }
  0x11   :  { %336 = vperm.xlu1 %519, %v318_v35  }
  0x12   :  { %261 = vmatpush.bf16.msrb.mxu0 %v481_v13  ;;  %513 = vmatpush.bf16.msra.mxu1 %v480_v15 }
  0x13   :  { %281 = vmatpush.bf16.msra.mxu2 %v488_v16 }
  0x15   :  { %372 = vmatmul.msk.bf16.gmra.mxu0 %vm87_vm0, %v496_v17 }
  0x16   :  { %262 = vmatpush.bf16.msrb.mxu0 %v480_v15  ;;  %514 = vmatpush.bf16.msra.mxu1 %v479_v18 }
  0x17   :  { %282 = vmatpush.bf16.msra.mxu2 %v487_v20 }
  0x1a   :  { %263 = vmatpush.bf16.msrb.mxu0 %v479_v18  ;;  %515 = vmatpush.bf16.msra.mxu1 %v478_v23 }
  0x1b   :  { %283 = vmatpush.bf16.msra.mxu2 %v486_v26  ;;  %470 = vmatmul.msk.bf16.gmra.mxu3 %vm251_vm1, %v396_v29 }
  0x1e   :  { %264 = vmatpush.bf16.msrb.mxu0 %v478_v23  ;;  %516 = vmatpush.bf16.msra.mxu1 %v477_v27 }
  0x1f   :  { %284 = vmatpush.bf16.msra.mxu2 %v485_v28 }
  0x21   :  { %271 = vmatmul.bf16.vlgmr.msra.gmra.mxu1 %v388_v36 }
  0x22   :  { %265 = vmatpush.bf16.msrb.mxu0 %v477_v27  ;;  %285 = vmatmul.bf16.vlgmr.msra.gmra.mxu2 %v380_v37 }
  0x25   :  { %266 = vmatmul.bf16.vlgmr.msrb.gmra.mxu0 %v376_v40 }
  0x32   :  { %290 = vmatmul.bf16.gmra.mxu2 %v392_v43 }
  0x79   :  { %v322_v52 = vpop.permute.xlu0 %321 }
  0x7b   :  { %v332_v7 = vpop.permute.xlu1 %331 }
  0x81   :  { %v327_v61 = vpop.permute.xlu0 %326 }
  0x82   :  { %v103_v44 = vpop.f32.mrf.mxu0 }
  0x83   :  { %v337_v17 = vpop.permute.xlu1 %336 }
  0x8a   :  { %v105_v45 = vpop.f32.mrf.mxu0 }
  0x8e   :  { %v305_v48 = vpop.f32.mrf.mxu3 }
  0x92   :  { %v108_v46 = vpop.f32.mrf.mxu0 }
  0x96   :  { %v307_v55 = vpop.f32.mrf.mxu3 }
  0x9a   :  { %v110_v47 = vpop.f32.mrf.mxu0 }
  0x9e   :  { %v272_v60 = vpop.f32.mrf.mxu1  ;;  %v310_v3 = vpop.f32.mrf.mxu3 }
  0x9f   :  { %v273_v5 = vadd.f32 %v272_v60, %v108_v46 }
  0xa2   :  { %v267_v49 = vpop.f32.mrf.mxu0 }
  0xa3   :  { %v268_v50 = vadd.f32 %v267_v49, %v103_v44 }
  0xa5   :  { %v286_v51 = vpop.f32.mrf.mxu2 }
  0xa6   :  { %v287_v53 = vadd.f32 %v286_v51, %v268_v50  ;;  %v274_v9 = vpop.f32.mrf.mxu1  ;;  %v312_v14 = vpop.f32.mrf.mxu3 }
  0xa7   :  { %v275_v10 = vadd.f32 %v274_v9, %v110_v47 }
  0xa8   :  { %v306_v57 = vadd.f32 %v305_v48, %v287_v53 }
  0xaa   :  { %v269_v54 = vpop.f32.mrf.mxu0  ;;  %v339_v62 = vadd.f32 %v322_v52, %v306_v57 }
  0xab   :  { %v270_v56 = vadd.f32 %v269_v54, %v105_v45 }
  0xac   :  { %v343_v1 = vmax.f32 %v339_v62, 0.0 }
  0xad   :  { %v288_v58 = vpop.f32.mrf.mxu2 }
  0xae   :  { %v289_v59 = vadd.f32 %v288_v58, %v270_v56 }
  0xb0   :  { %v308_v63 = vadd.f32 %v307_v55, %v289_v59 }
  0xb2   :  { %v340_v0 = vadd.f32 %v327_v61, %v308_v63 }
  0xb4   :  { %v344_v2 = vmax.f32 %v340_v0, 0.0 }
  0xb5   :  { %v291_v4 = vpop.f32.mrf.mxu2 }
  0xb6   :  { %v501_v6 = vpack.c.bf16 %v344_v2, %v343_v1  ;;  %v292_v8 = vadd.f32 %v291_v4, %v273_v5 }
  0xb8   :  { %502 = vst [vmem:[%s677_s5] sm:$0xff] %v501_v6   ;;  %v311_v11 = vadd.f32 %v310_v3, %v292_v8 }
  0xba   :  { %v341_v15 = vadd.f32 %v332_v7, %v311_v11 }
  0xbc   :  { %v345_v19 = vmax.f32 %v341_v15, 0.0 }
  0xbd   :  { %v293_v12 = vpop.f32.mrf.mxu2 }
  0xbe   :  { %v294_v13 = vadd.f32 %v293_v12, %v275_v10 }
  0xc0   :  { %v313_v16 = vadd.f32 %v312_v14, %v294_v13 }
  0xc2   :  { %v342_v18 = vadd.f32 %v337_v17, %v313_v16 }
  0xc4   :  { %v346_v20 = vmax.f32 %v342_v18, 0.0 }
  0xc6   :  { %v506_v21 = vpack.c.bf16 %v346_v20, %v345_v19 }
  0xc8   :  { %508 = vst [vmem:[%s677_s5 + $0x8] sm:$0xff] %v506_v21  }

// kernel: _lambda_.36
= control target key start
LH: loop header
LB: loop body
LE: loop exit
PB: predicated region body
PF: predicated region fallthrough
CT: control target
= control target key end

     0   :  { %vm283_vm0 = vcmask 261120   ;;  %v608_v15 = vmov 0   ;;  %s815_s1 = inlined_call_operand.vmem [shape: bf16[288,128], index: 1, kind: input, shape index: {}]   ;;  %s816_s0 = inlined_call_operand.vmem [shape: bf16[64,288], index: 0, kind: input, shape index: {}]   ;;  %s817_s2 = inlined_call_operand.vmem [shape: f32[64,1], index: 2, kind: input, shape index: {}]   ;;  %s818_s3 = inlined_call_operand.vmem [shape: bf16[64,128], index: 3, kind: output, shape index: {}]  }
   0x1   :  { %v554_v0 = vld [vmem:[%s815_s1 + $0x38] sm:$0xff]  ;;  %v564_v2 = vld [vmem:[%s815_s1 + $0x88] sm:$0xff]  ;;  %v553_v3 = vld [vmem:[%s815_s1 + $0x30] sm:$0xff]  ;;  %606 = vset.pattern.permute.xlu1 %v608_v15  ;;  %605 = vset.pattern.permute.xlu0 %v608_v15 }
   0x2   :  { %v635_v1 = vld [vmem:[%s815_s1 + $0x78] sm:$0xff]  ;;  %296 = vmatpush.bf16.msra.mxu0 %v554_v0  ;;  %588 = vmatpush.bf16.msra.mxu3 %v554_v0  ;;  %v647_v4 = vld [vmem:[%s815_s1 + $0x70] sm:$0xff]  ;;  %v563_v5 = vld [vmem:[%s815_s1 + $0x80] sm:$0xff] }
   0x3   :  { %596 = vmatpush.bf16.msra.mxu1 %v635_v1  ;;  %360 = vmatpush.bf16.msra.mxu2 %v564_v2  ;;  %v421_v6 = vld [vmem:[%s816_s0 + $0x8] sm:$0xf]  ;;  %v537_v7 = vld [vmem:[%s816_s0 + $0x10] sm:$0xf0]  ;;  %v551_v11 = vld [vmem:[%s815_s1 + $0x20] sm:$0xff] }
   0x4   :  { %v552_v8 = vld [vmem:[%s815_s1 + $0x28] sm:$0xff]  ;;  %v422_v10 = vor.u32 %v537_v7, %v421_v6  ;;  %v675_v12 = vld [vmem:[%s815_s1 + $0x60] sm:$0xff]  ;;  %v550_v13 = vld [vmem:[%s815_s1 + $0x18] sm:$0xff]  ;;  %607 = vset.pattern.permute.xlu2 %v608_v15 }
   0x5   :  { %v665_v9 = vld [vmem:[%s815_s1 + $0x68] sm:$0xff]  ;;  %v684_v14 = vld [vmem:[%s815_s1 + $0x58] sm:$0xff]  ;;  %v549_v16 = vld [vmem:[%s815_s1 + $0x10] sm:$0xff] }
   0x6   :  { %297 = vmatpush.bf16.msra.mxu0 %v553_v3  ;;  %589 = vmatpush.bf16.msra.mxu3 %v553_v3  ;;  %v69_v17 = vld [vmem:[%s817_s2 + $0x10] sm:$0xff]  ;;  %v433_v19 = vld [vmem:[%s816_s0 + $0x20] sm:$0xf]  ;;  %v540_v20 = vld [vmem:[%s816_s0 + $0x28] sm:$0xf0] }
   0x7   :  { %597 = vmatpush.bf16.msra.mxu1 %v647_v4  ;;  %361 = vmatpush.bf16.msra.mxu2 %v563_v5  ;;  %v557_v18 = vld [vmem:[%s815_s1 + $0x50] sm:$0xff]  ;;  %v548_v21 = vld [vmem:[%s815_s1 + $0x8] sm:$0xff]  ;;  %v434_v23 = vor.u32 %v540_v20, %v433_v19  ;;  %v67_v24 = vld [vmem:[%s817_s2] sm:$0xff] }
   0x8   :  { %87 = vperm.xlu1 %606, %v69_v17   ;;  %v556_v22 = vld [vmem:[%s815_s1 + $0x48] sm:$0xff]  ;;  %77 = vperm.xlu0 %605, %v67_v24   ;;  %v547_v25 = vld [vmem:[%s815_s1] sm:$0xff]  ;;  %v425_v26 = vld [vmem:[%s816_s0 + $0x18] sm:$0xf] }
   0x9   :  { %v70_v27 = vld [vmem:[%s817_s2 + $0x18] sm:$0xff]  ;;  %v539_v28 = vld [vmem:[%s816_s0 + $0x20] sm:$0xf0]  ;;  %v413_v29 = vld [vmem:[%s816_s0] sm:$0xf] }
   0xa   :  { %298 = vmatpush.bf16.msra.mxu0 %v552_v8  ;;  %590 = vmatpush.bf16.msra.mxu3 %v552_v8  ;;  %v536_v30 = vld [vmem:[%s816_s0 + $0x8] sm:$0xf0]  ;;  %v555_v31 = vld [vmem:[%s815_s1 + $0x40] sm:$0xff]  ;;  %v538_v32 = vld [vmem:[%s816_s0 + $0x1c] sm:$0xf]  ;;  %v426_v34 = vor.u32 %v539_v28, %v425_v26 }
   0xb   :  { %598 = vmatpush.bf16.msra.mxu1 %v665_v9  ;;  %531 = vmatmul.msk.bf16.vlgmr.msra.gmra.mxu2 %vm283_vm0, %v422_v10  ;;  %v427_v33 = vld [vmem:[%s816_s0 + $0x24] sm:$0xf0]  ;;  %v414_v35 = vor.u32 %v536_v30, %v413_v29  ;;  %v74_v38 = vld [vmem:[%s817_s2 + $0x38] sm:$0xff]  ;;  %v71_v39 = vld [vmem:[%s817_s2 + $0x20] sm:$0xff] }
   0xc   :  { %v430_v36 = vor.u32 %v538_v32, %v427_v33  ;;  %v68_v37 = vld [vmem:[%s817_s2 + $0x8] sm:$0xff]  ;;  %v445_v40 = vld [vmem:[%s816_s0 + $0x38] sm:$0xf]  ;;  %v543_v41 = vld [vmem:[%s816_s0 + $0x40] sm:$0xf0]  ;;  %97 = vperm.xlu2 %607, %v71_v39  }
   0xd   :  { %v446_v42 = vor.u32 %v543_v41, %v445_v40  ;;  %v73_v43 = vld [vmem:[%s817_s2 + $0x30] sm:$0xff]  ;;  %v72_v44 = vld [vmem:[%s817_s2 + $0x28] sm:$0xff]  ;;  %v542_v46 = vld [vmem:[%s816_s0 + $0x38] sm:$0xf0] }
   0xe   :  { %299 = vmatpush.bf16.msra.mxu0 %v551_v11  ;;  %591 = vmatpush.bf16.msra.mxu3 %v551_v11  ;;  %v437_v45 = vld [vmem:[%s816_s0 + $0x30] sm:$0xf]  ;;  %v541_v47 = vld [vmem:[%s816_s0 + $0x34] sm:$0xf]  ;;  %v439_v48 = vld [vmem:[%s816_s0 + $0x3c] sm:$0xf0] }
   0xf   :  { %599 = vmatpush.bf16.msra.mxu1 %v675_v12  ;;  %v438_v49 = vor.u32 %v542_v46, %v437_v45  ;;  %v442_v50 = vor.u32 %v541_v47, %v439_v48  ;;  %v457_v51 = vld [vmem:[%s816_s0 + $0x50] sm:$0xf]  ;;  %v546_v52 = vld [vmem:[%s816_s0 + $0x58] sm:$0xf0]  ;;  %v535_v54 = vld [vmem:[%s816_s0 + $0x4] sm:$0xf] }
  0x10   :  { %92 = vperm.xlu1 %606, %v70_v27   ;;  %82 = vperm.xlu0 %605, %v68_v37   ;;  %v458_v53 = vor.u32 %v546_v52, %v457_v51  ;;  %v415_v55 = vld [vmem:[%s816_s0 + $0xc] sm:$0xf0]  ;;  %v449_v57 = vld [vmem:[%s816_s0 + $0x48] sm:$0xf]  ;;  %v545_v58 = vld [vmem:[%s816_s0 + $0x50] sm:$0xf0] }
  0x11   :  { %v418_v56 = vor.u32 %v535_v54, %v415_v55  ;;  %v544_v59 = vld [vmem:[%s816_s0 + $0x4c] sm:$0xf]  ;;  %v451_v60 = vld [vmem:[%s816_s0 + $0x54] sm:$0xf0]  ;;  %v450_v61 = vor.u32 %v545_v58, %v449_v57 }
  0x12   :  { %300 = vmatpush.bf16.msra.mxu0 %v550_v13  ;;  %592 = vmatpush.bf16.msra.mxu3 %v550_v13  ;;  %v454_v62 = vor.u32 %v544_v59, %v451_v60 }
  0x13   :  { %600 = vmatpush.bf16.msra.mxu1 %v684_v14 }
  0x14   :  { %102 = vperm.xlu2 %607, %v72_v44  }
  0x16   :  { %301 = vmatpush.bf16.msra.mxu0 %v549_v16  ;;  %593 = vmatpush.bf16.msra.mxu3 %v549_v16 }
  0x17   :  { %601 = vmatpush.bf16.msra.mxu1 %v557_v18 }
  0x18   :  { %112 = vperm.xlu1 %606, %v74_v38   ;;  %107 = vperm.xlu0 %605, %v73_v43  }
  0x1a   :  { %302 = vmatpush.bf16.msra.mxu0 %v548_v21  ;;  %594 = vmatpush.bf16.msra.mxu3 %v548_v21 }
  0x1b   :  { %602 = vmatpush.bf16.msra.mxu1 %v556_v22  ;;  %532 = vmatmul.msk.bf16.gmra.mxu2 %vm283_vm0, %v434_v23 }
  0x1e   :  { %303 = vmatpush.bf16.msra.mxu0 %v547_v25  ;;  %595 = vmatpush.bf16.msra.mxu3 %v547_v25 }
  0x1f   :  { %603 = vmatpush.bf16.msra.mxu1 %v555_v31 }
  0x21   :  { %309 = vmatmul.bf16.vlgmr.msra.gmra.mxu3 %v426_v34  ;;  %304 = vmatmul.bf16.vlgmr.msra.gmra.mxu0 %v414_v35 }
  0x22   :  { %325 = vmatpush.bf16.msrb.mxu0 %v635_v1  ;;  %338 = vmatmul.bf16.vlgmr.msra.gmra.mxu1 %v430_v36 }
  0x26   :  { %326 = vmatpush.bf16.msrb.mxu0 %v647_v4 }
  0x2a   :  { %327 = vmatpush.bf16.msrb.mxu0 %v665_v9 }
  0x2b   :  { %533 = vmatmul.msk.bf16.gmra.mxu2 %vm283_vm0, %v446_v42 }
  0x2e   :  { %328 = vmatpush.bf16.msrb.mxu0 %v675_v12 }
  0x31   :  { %314 = vmatmul.bf16.gmra.mxu3 %v438_v49 }
  0x32   :  { %329 = vmatpush.bf16.msrb.mxu0 %v684_v14  ;;  %343 = vmatmul.bf16.gmra.mxu1 %v442_v50 }
  0x36   :  { %330 = vmatpush.bf16.msrb.mxu0 %v557_v18 }
  0x3a   :  { %331 = vmatpush.bf16.msrb.mxu0 %v556_v22 }
  0x3b   :  { %534 = vmatmul.msk.bf16.gmra.mxu2 %vm283_vm0, %v458_v53 }
  0x3e   :  { %332 = vmatpush.bf16.msrb.mxu0 %v555_v31 }
  0x41   :  { %333 = vmatmul.bf16.vlgmr.msrb.gmra.mxu0 %v418_v56  ;;  %319 = vmatmul.bf16.gmra.mxu3 %v450_v61 }
  0x42   :  { %348 = vmatmul.bf16.gmra.mxu1 %v454_v62 }
  0x66   :  { %v98_v16 = vpop.permute.xlu2 %97 }
  0x6e   :  { %v103_v27 = vpop.permute.xlu2 %102 }
  0x7a   :  { %v88_v3 = vpop.permute.xlu1 %87  ;;  %v78_v17 = vpop.permute.xlu0 %77 }
  0x82   :  { %v93_v9 = vpop.permute.xlu1 %92  ;;  %v83_v28 = vpop.permute.xlu0 %82 }
  0x8a   :  { %v108_v48 = vpop.permute.xlu0 %107  ;;  %v113_v56 = vpop.permute.xlu1 %112 }
  0x8e   :  { %v363_v63 = vpop.f32.mrf.mxu2 }
  0x96   :  { %v365_v0 = vpop.f32.mrf.mxu2 }
  0x9e   :  { %v368_v1 = vpop.f32.mrf.mxu2  ;;  %v305_v7 = vpop.f32.mrf.mxu0 }
  0x9f   :  { %v339_v2 = vpop.f32.mrf.mxu1  ;;  %v306_v34 = vadd.f32 %v305_v7, %v78_v17 }
  0xa4   :  { %v310_v4 = vpop.f32.mrf.mxu3 }
  0xa5   :  { %v311_v5 = vadd.f32 %v310_v4, %v88_v3 }
  0xa6   :  { %v370_v8 = vpop.f32.mrf.mxu2  ;;  %v307_v19 = vpop.f32.mrf.mxu0 }
  0xa7   :  { %v341_v6 = vpop.f32.mrf.mxu1  ;;  %v340_v10 = vadd.f32 %v339_v2, %v311_v5  ;;  %v308_v39 = vadd.f32 %v307_v19, %v83_v28 }
  0xa9   :  { %v369_v13 = vadd.f32 %v368_v1, %v340_v10 }
  0xab   :  { %v385_v21 = vmax.f32 %v369_v13, 0.0 }
  0xac   :  { %v312_v11 = vpop.f32.mrf.mxu3 }
  0xad   :  { %v313_v12 = vadd.f32 %v312_v11, %v93_v9 }
  0xae   :  { %v373_v20 = vpop.f32.mrf.mxu2 }
  0xaf   :  { %v342_v14 = vadd.f32 %v341_v6, %v313_v12  ;;  %v344_v15 = vpop.f32.mrf.mxu1 }
  0xb1   :  { %v371_v18 = vadd.f32 %v370_v8, %v342_v14 }
  0xb3   :  { %v386_v22 = vmax.f32 %v371_v18, 0.0 }
  0xb4   :  { %v315_v23 = vpop.f32.mrf.mxu3 }
  0xb5   :  { %v573_v24 = vpack.c.bf16 %v386_v22, %v385_v21  ;;  %v316_v25 = vadd.f32 %v315_v23, %v98_v16 }
  0xb6   :  { %v375_v31 = vpop.f32.mrf.mxu2 }
  0xb7   :  { %585 = vst [vmem:[%s818_s3 + $0x8] sm:$0xff] %v573_v24   ;;  %v346_v26 = vpop.f32.mrf.mxu1  ;;  %v345_v29 = vadd.f32 %v344_v15, %v316_v25 }
  0xb9   :  { %v374_v35 = vadd.f32 %v373_v20, %v345_v29 }
  0xbb   :  { %v387_v40 = vmax.f32 %v374_v35, 0.0 }
  0xbc   :  { %v317_v32 = vpop.f32.mrf.mxu3 }
  0xbd   :  { %v318_v33 = vadd.f32 %v317_v32, %v103_v27 }
  0xbe   :  { %v334_v30 = vpop.f32.mrf.mxu0  ;;  %v378_v49 = vpop.f32.mrf.mxu2 }
  0xbf   :  { %v347_v36 = vadd.f32 %v346_v26, %v318_v33  ;;  %v335_v37 = vadd.f32 %v334_v30, %v306_v34  ;;  %v349_v44 = vpop.f32.mrf.mxu1 }
  0xc1   :  { %v376_v38 = vadd.f32 %v375_v31, %v347_v36  ;;  %v364_v43 = vadd.f32 %v363_v63, %v335_v37 }
  0xc3   :  { %v388_v41 = vmax.f32 %v376_v38, 0.0  ;;  %v383_v52 = vmax.f32 %v364_v43, 0.0 }
  0xc4   :  { %v320_v46 = vpop.f32.mrf.mxu3 }
  0xc5   :  { %v578_v47 = vpack.c.bf16 %v388_v41, %v387_v40  ;;  %v321_v51 = vadd.f32 %v320_v46, %v108_v48 }
  0xc6   :  { %v336_v42 = vpop.f32.mrf.mxu0  ;;  %v380_v62 = vpop.f32.mrf.mxu2 }
  0xc7   :  { %v337_v45 = vadd.f32 %v336_v42, %v308_v39  ;;  %586 = vst [vmem:[%s818_s3 + $0x10] sm:$0xff] %v578_v47   ;;  %v350_v55 = vadd.f32 %v349_v44, %v321_v51  ;;  %v351_v59 = vpop.f32.mrf.mxu1 }
  0xc9   :  { %v366_v50 = vadd.f32 %v365_v0, %v337_v45  ;;  %v379_v60 = vadd.f32 %v378_v49, %v350_v55 }
  0xcb   :  { %v384_v53 = vmax.f32 %v366_v50, 0.0  ;;  %v389_v0 = vmax.f32 %v379_v60, 0.0 }
  0xcc   :  { %v322_v57 = vpop.f32.mrf.mxu3 }
  0xcd   :  { %v568_v54 = vpack.c.bf16 %v384_v53, %v383_v52  ;;  %v323_v58 = vadd.f32 %v322_v57, %v113_v56 }
  0xcf   :  { %569 = vst [vmem:[%s818_s3] sm:$0xff] %v568_v54   ;;  %v352_v61 = vadd.f32 %v351_v59, %v323_v58 }
  0xd1   :  { %v381_v63 = vadd.f32 %v380_v62, %v352_v61 }
  0xd3   :  { %v390_v1 = vmax.f32 %v381_v63, 0.0 }
  0xd5   :  { %v583_v2 = vpack.c.bf16 %v390_v1, %v389_v0 }
  0xd7   :  { %587 = vst [vmem:[%s818_s3 + $0x18] sm:$0xff] %v583_v2  }

// kernel: _lambda_.37
= control target key start
LH: loop header
LB: loop body
LE: loop exit
PB: predicated region body
PF: predicated region fallthrough
CT: control target
= control target key end

     0   :  { %vm161_vm0 = vcmask 261120   ;;  %v1116_v59 = vmov 0   ;;  %vm519_vm1 = vcmask 523264   ;;  %s1455_s1 = inlined_call_operand.vmem [shape: bf16[576,128], index: 1, kind: input, shape index: {}]   ;;  %s1456_s4 = inlined_call_operand.vmem [shape: bf16[32,128], index: 4, kind: input, shape index: {}]   ;;  %s1457_s3 = inlined_call_operand.vmem [shape: bf16[64,32], index: 3, kind: input, shape index: {}]   ;;  %s1458_s0 = inlined_call_operand.vmem [shape: bf16[64,576], index: 0, kind: input, shape index: {}]   ;;  %s1459_s2 = inlined_call_operand.vmem [shape: f32[64,1], index: 2, kind: input, shape index: {}]   ;;  %s1460_s5 = inlined_call_operand.vmem [shape: bf16[64,128], index: 5, kind: output, shape index: {}]  }
   0x1   :  { %v1044_v0 = vld [vmem:[%s1455_s1 + $0x38] sm:$0xff]  ;;  %v1078_v1 = vld [vmem:[%s1456_s4 + $0x8] sm:$0xff]  ;;  %v1043_v2 = vld [vmem:[%s1455_s1 + $0x30] sm:$0xff]  ;;  %1113 = vset.pattern.permute.xlu0 %v1116_v59  ;;  %1114 = vset.pattern.permute.xlu1 %v1116_v59 }
   0x2   :  { %1104 = vmatpush.bf16.msra.mxu2 %v1044_v0  ;;  %532 = vmatpush.bf16.msra.mxu1 %v1044_v0  ;;  %v1077_v3 = vld [vmem:[%s1456_s4] sm:$0xff]  ;;  %v1060_v4 = vld [vmem:[%s1455_s1 + $0xb8] sm:$0xff]  ;;  %v1042_v5 = vld [vmem:[%s1455_s1 + $0x28] sm:$0xff] }
   0x3   :  { %1102 = vmatpush.bf16.msra.mxu3 %v1078_v1  ;;  %180 = vmatpush.bf16.msra.mxu0 %v1078_v1  ;;  %v1068_v6 = vld [vmem:[%s1455_s1 + $0xf8] sm:$0xff]  ;;  %v1075_v7 = vld [vmem:[%s1457_s3 + $0x10] sm:$0xff]  ;;  %v1073_v8 = vld [vmem:[%s1457_s3] sm:$0xff] }
   0x4   :  { %v1059_v9 = vld [vmem:[%s1455_s1 + $0xb0] sm:$0xff]  ;;  %v1041_v11 = vld [vmem:[%s1455_s1 + $0x20] sm:$0xff]  ;;  %v1058_v12 = vld [vmem:[%s1455_s1 + $0xa8] sm:$0xff]  ;;  %1115 = vset.pattern.permute.xlu2 %v1116_v59 }
   0x5   :  { %v1067_v10 = vld [vmem:[%s1455_s1 + $0xf0] sm:$0xff]  ;;  %v1066_v13 = vld [vmem:[%s1455_s1 + $0xe8] sm:$0xff]  ;;  %v1040_v14 = vld [vmem:[%s1455_s1 + $0x18] sm:$0xff] }
   0x6   :  { %1105 = vmatpush.bf16.msra.mxu2 %v1043_v2  ;;  %533 = vmatpush.bf16.msra.mxu1 %v1043_v2  ;;  %v1057_v15 = vld [vmem:[%s1455_s1 + $0xa0] sm:$0xff]  ;;  %v1039_v17 = vld [vmem:[%s1455_s1 + $0x10] sm:$0xff]  ;;  %v1056_v18 = vld [vmem:[%s1455_s1 + $0x98] sm:$0xff] }
   0x7   :  { %1103 = vmatpush.bf16.msra.mxu3 %v1077_v3  ;;  %181 = vmatpush.bf16.msra.mxu0 %v1077_v3  ;;  %v1065_v16 = vld [vmem:[%s1455_s1 + $0xe0] sm:$0xff]  ;;  %v1064_v19 = vld [vmem:[%s1455_s1 + $0xd8] sm:$0xff]  ;;  %v1038_v20 = vld [vmem:[%s1455_s1 + $0x8] sm:$0xff] }
   0x8   :  { %v1076_v21 = vld [vmem:[%s1457_s3 + $0x18] sm:$0xff]  ;;  %v1074_v22 = vld [vmem:[%s1457_s3 + $0x8] sm:$0xff]  ;;  %v1055_v23 = vld [vmem:[%s1455_s1 + $0x90] sm:$0xff] }
   0x9   :  { %v1063_v24 = vld [vmem:[%s1455_s1 + $0xd0] sm:$0xff]  ;;  %v1037_v25 = vld [vmem:[%s1455_s1] sm:$0xff]  ;;  %v1052_v30 = vld [vmem:[%s1455_s1 + $0x78] sm:$0xff] }
   0xa   :  { %1106 = vmatpush.bf16.msra.mxu2 %v1042_v5  ;;  %534 = vmatpush.bf16.msra.mxu1 %v1042_v5  ;;  %v831_v26 = vld [vmem:[%s1458_s0 + $0x50] sm:$0xf]  ;;  %v1029_v27 = vld [vmem:[%s1458_s0 + $0x60] sm:$0xf0]  ;;  %v791_v28 = vld [vmem:[%s1458_s0] sm:$0xf] }
   0xb   :  { %590 = vmatpush.bf16.msrb.mxu3 %v1060_v4  ;;  %619 = vmatpush.bf16.msrb.mxu0 %v1068_v6  ;;  %v1019_v29 = vld [vmem:[%s1458_s0 + $0x10] sm:$0xf0]  ;;  %v1072_v31 = vld [vmem:[%s1455_s1 + $0x118] sm:$0xff]  ;;  %v1054_v32 = vld [vmem:[%s1455_s1 + $0x88] sm:$0xff]  ;;  %v832_v34 = vor.u32 %v1029_v27, %v831_v26 }
   0xc   :  { %787 = vmatmul.msk.bf16.vlgmr.msra.gmra.mxu3 %vm161_vm0, %v1075_v7  ;;  %785 = vmatmul.msk.bf16.vlgmr.msra.gmra.mxu0 %vm161_vm0, %v1073_v8  ;;  %v1062_v33 = vld [vmem:[%s1455_s1 + $0xc8] sm:$0xff]  ;;  %v792_v35 = vor.u32 %v1019_v29, %v791_v28  ;;  %v1051_v36 = vld [vmem:[%s1455_s1 + $0x70] sm:$0xff]  ;;  %v1053_v38 = vld [vmem:[%s1455_s1 + $0x80] sm:$0xff] }
   0xd   :  { %v1071_v37 = vld [vmem:[%s1455_s1 + $0x110] sm:$0xff]  ;;  %v1061_v39 = vld [vmem:[%s1455_s1 + $0xc0] sm:$0xff]  ;;  %v1050_v40 = vld [vmem:[%s1455_s1 + $0x68] sm:$0xff] }
   0xe   :  { %1107 = vmatpush.bf16.msra.mxu2 %v1041_v11  ;;  %535 = vmatpush.bf16.msra.mxu1 %v1041_v11  ;;  %v1070_v41 = vld [vmem:[%s1455_s1 + $0x108] sm:$0xff]  ;;  %v1020_v43 = vld [vmem:[%s1458_s0 + $0x18] sm:$0xf0]  ;;  %v801_v45 = vld [vmem:[%s1458_s0 + $0x1c] sm:$0xf0] }
   0xf   :  { %591 = vmatpush.bf16.msrb.mxu3 %v1059_v9  ;;  %620 = vmatpush.bf16.msrb.mxu0 %v1067_v10  ;;  %v799_v42 = vld [vmem:[%s1458_s0 + $0x8] sm:$0xf]  ;;  %v1018_v44 = vld [vmem:[%s1458_s0 + $0xc] sm:$0xf]  ;;  %v1049_v46 = vld [vmem:[%s1455_s1 + $0x60] sm:$0xff] }
  0x10   :  { %v800_v47 = vor.u32 %v1020_v43, %v799_v42  ;;  %v1069_v48 = vld [vmem:[%s1455_s1 + $0x100] sm:$0xff]  ;;  %v804_v49 = vor.u32 %v1018_v44, %v801_v45  ;;  %v851_v50 = vld [vmem:[%s1458_s0 + $0x78] sm:$0xf]  ;;  %v1034_v51 = vld [vmem:[%s1458_s0 + $0x88] sm:$0xf0] }
  0x11   :  { %v811_v52 = vld [vmem:[%s1458_s0 + $0x28] sm:$0xf]  ;;  %v1024_v53 = vld [vmem:[%s1458_s0 + $0x38] sm:$0xf0]  ;;  %v852_v55 = vor.u32 %v1034_v51, %v851_v50  ;;  %v1047_v57 = vld [vmem:[%s1455_s1 + $0x50] sm:$0xff] }
  0x12   :  { %1108 = vmatpush.bf16.msra.mxu2 %v1040_v14  ;;  %536 = vmatpush.bf16.msra.mxu1 %v1040_v14  ;;  %v1048_v54 = vld [vmem:[%s1455_s1 + $0x58] sm:$0xff]  ;;  %v812_v56 = vor.u32 %v1024_v53, %v811_v52  ;;  %v677_v58 = vld [vmem:[%s1459_s2] sm:$0xff]  ;;  %v1046_v60 = vld [vmem:[%s1455_s1 + $0x48] sm:$0xff] }
  0x13   :  { %592 = vmatpush.bf16.msrb.mxu3 %v1058_v12  ;;  %621 = vmatpush.bf16.msrb.mxu0 %v1066_v13  ;;  %v819_v61 = vld [vmem:[%s1458_s0 + $0x30] sm:$0xf]  ;;  %v1025_v62 = vld [vmem:[%s1458_s0 + $0x40] sm:$0xf0]  ;;  %v1023_v63 = vld [vmem:[%s1458_s0 + $0x34] sm:$0xf] }
  0x14   :  { %687 = vperm.xlu0 %1113, %v677_v58   ;;  %v821_v0 = vld [vmem:[%s1458_s0 + $0x44] sm:$0xf0]  ;;  %v1045_v1 = vld [vmem:[%s1455_s1 + $0x40] sm:$0xff]  ;;  %v820_v2 = vor.u32 %v1025_v62, %v819_v61  ;;  %v793_v5 = vld [vmem:[%s1458_s0 + $0x14] sm:$0xf0] }
  0x15   :  { %v824_v3 = vor.u32 %v1023_v63, %v821_v0  ;;  %v1017_v4 = vld [vmem:[%s1458_s0 + $0x4] sm:$0xf]  ;;  %v807_v6 = vld [vmem:[%s1458_s0 + $0x10] sm:$0xf]  ;;  %v678_v10 = vld [vmem:[%s1459_s2 + $0x8] sm:$0xff] }
  0x16   :  { %1109 = vmatpush.bf16.msra.mxu2 %v1039_v17  ;;  %537 = vmatpush.bf16.msra.mxu1 %v1039_v17  ;;  %v1021_v7 = vld [vmem:[%s1458_s0 + $0x20] sm:$0xf0]  ;;  %v796_v8 = vor.u32 %v1017_v4, %v793_v5  ;;  %v679_v11 = vld [vmem:[%s1459_s2 + $0x10] sm:$0xff]  ;;  %v839_v12 = vld [vmem:[%s1458_s0 + $0x58] sm:$0xf] }
  0x17   :  { %593 = vmatpush.bf16.msrb.mxu3 %v1057_v15  ;;  %622 = vmatpush.bf16.msrb.mxu0 %v1065_v16  ;;  %v808_v9 = vor.u32 %v1021_v7, %v807_v6  ;;  %v1030_v13 = vld [vmem:[%s1458_s0 + $0x68] sm:$0xf0]  ;;  %v1028_v14 = vld [vmem:[%s1458_s0 + $0x5c] sm:$0xf]  ;;  %v841_v15 = vld [vmem:[%s1458_s0 + $0x6c] sm:$0xf0] }
  0x18   :  { %697 = vperm.xlu1 %1114, %v679_v11   ;;  %v840_v16 = vor.u32 %v1030_v13, %v839_v12  ;;  %v844_v17 = vor.u32 %v1028_v14, %v841_v15  ;;  %v681_v26 = vld [vmem:[%s1459_s2 + $0x20] sm:$0xff]  ;;  %v1035_v28 = vld [vmem:[%s1458_s0 + $0x90] sm:$0xf0]  ;;  %v853_v42 = vld [vmem:[%s1458_s0 + $0x8c] sm:$0xf0] }
  0x19   :  { %707 = vperm.xlu2 %1115, %v681_v26   ;;  %v859_v27 = vld [vmem:[%s1458_s0 + $0x80] sm:$0xf]  ;;  %v1033_v29 = vld [vmem:[%s1458_s0 + $0x84] sm:$0xf]  ;;  %v867_v43 = vld [vmem:[%s1458_s0 + $0x88] sm:$0xf] }
  0x1a   :  { %1110 = vmatpush.bf16.msra.mxu2 %v1038_v20  ;;  %538 = vmatpush.bf16.msra.mxu1 %v1038_v20  ;;  %v827_v20 = vld [vmem:[%s1458_s0 + $0x38] sm:$0xf]  ;;  %v1036_v44 = vld [vmem:[%s1458_s0 + $0x98] sm:$0xf0] }
  0x1b   :  { %594 = vmatpush.bf16.msrb.mxu3 %v1056_v18  ;;  %623 = vmatpush.bf16.msrb.mxu0 %v1064_v19  ;;  %v1022_v18 = vld [vmem:[%s1458_s0 + $0x2c] sm:$0xf]  ;;  %v813_v19 = vld [vmem:[%s1458_s0 + $0x3c] sm:$0xf0] }
  0x1c   :  { %788 = vmatmul.msk.bf16.gmra.mxu3 %vm161_vm0, %v1076_v21  ;;  %786 = vmatmul.msk.bf16.gmra.mxu0 %vm161_vm0, %v1074_v22  ;;  %v1026_v21 = vld [vmem:[%s1458_s0 + $0x48] sm:$0xf0]  ;;  %v816_v22 = vor.u32 %v1022_v18, %v813_v19 }
  0x1d   :  { %692 = vperm.xlu0 %1113, %v678_v10  }
  0x1e   :  { %1111 = vmatpush.bf16.msra.mxu2 %v1037_v25  ;;  %539 = vmatpush.bf16.msra.mxu1 %v1037_v25  ;;  %v683_v25 = vld [vmem:[%s1459_s2 + $0x30] sm:$0xff] }
  0x1f   :  { %595 = vmatpush.bf16.msrb.mxu3 %v1055_v23  ;;  %624 = vmatpush.bf16.msrb.mxu0 %v1063_v24  ;;  %v828_v23 = vor.u32 %v1026_v21, %v827_v20  ;;  %v680_v24 = vld [vmem:[%s1459_s2 + $0x18] sm:$0xff] }
  0x20   :  { %702 = vperm.xlu1 %1114, %v680_v24  }
  0x21   :  { %550 = vmatmul.bf16.vlgmr.msra.gmra.mxu2 %v832_v34  ;;  %540 = vmatmul.bf16.vlgmr.msra.gmra.mxu1 %v792_v35  ;;  %v682_v34 = vld [vmem:[%s1459_s2 + $0x28] sm:$0xff]  ;;  %v1027_v35 = vld [vmem:[%s1458_s0 + $0x54] sm:$0xf] }
  0x22   :  { %561 = vmatpush.bf16.msrb.mxu2 %v1052_v30  ;;  %652 = vmatpush.bf16.msrb.mxu1 %v1072_v31  ;;  %v861_v30 = vld [vmem:[%s1458_s0 + $0x94] sm:$0xf0]  ;;  %v860_v31 = vor.u32 %v1035_v28, %v859_v27 }
  0x23   :  { %596 = vmatpush.bf16.msrb.mxu3 %v1054_v32  ;;  %625 = vmatpush.bf16.msrb.mxu0 %v1062_v33  ;;  %v684_v32 = vld [vmem:[%s1459_s2 + $0x38] sm:$0xff]  ;;  %v864_v33 = vor.u32 %v1033_v29, %v861_v30 }
  0x24   :  { %712 = vperm.xlu2 %1115, %v682_v34  }
  0x25   :  { %717 = vperm.xlu0 %1113, %v683_v25  }
  0x26   :  { %562 = vmatpush.bf16.msrb.mxu2 %v1051_v36  ;;  %653 = vmatpush.bf16.msrb.mxu1 %v1071_v37  ;;  %v833_v36 = vld [vmem:[%s1458_s0 + $0x64] sm:$0xf0]  ;;  %v847_v37 = vld [vmem:[%s1458_s0 + $0x60] sm:$0xf] }
  0x27   :  { %597 = vmatpush.bf16.msrb.mxu3 %v1053_v38  ;;  %626 = vmatpush.bf16.msrb.mxu0 %v1061_v39  ;;  %v1031_v38 = vld [vmem:[%s1458_s0 + $0x70] sm:$0xf0]  ;;  %v836_v39 = vor.u32 %v1027_v35, %v833_v36 }
  0x28   :  { %722 = vperm.xlu1 %1114, %v684_v32  }
  0x2a   :  { %563 = vmatpush.bf16.msrb.mxu2 %v1050_v40  ;;  %654 = vmatpush.bf16.msrb.mxu1 %v1070_v41  ;;  %v848_v40 = vor.u32 %v1031_v38, %v847_v37  ;;  %v1032_v41 = vld [vmem:[%s1458_s0 + $0x7c] sm:$0xf] }
  0x2b   :  { %v856_v45 = vor.u32 %v1032_v41, %v853_v42 }
  0x2c   :  { %598 = vmatmul.bf16.vlgmr.msrb.gmra.mxu3 %v800_v47  ;;  %627 = vmatmul.bf16.vlgmr.msrb.gmra.mxu0 %v804_v49 }
  0x2e   :  { %564 = vmatpush.bf16.msrb.mxu2 %v1049_v46  ;;  %655 = vmatpush.bf16.msrb.mxu1 %v1069_v48  ;;  %v868_v46 = vor.u32 %v1036_v44, %v867_v43 }
  0x31   :  { %555 = vmatmul.bf16.gmra.mxu2 %v852_v55  ;;  %545 = vmatmul.bf16.gmra.mxu1 %v812_v56 }
  0x32   :  { %565 = vmatpush.bf16.msrb.mxu2 %v1048_v54 }
  0x36   :  { %566 = vmatpush.bf16.msrb.mxu2 %v1047_v57 }
  0x3a   :  { %567 = vmatpush.bf16.msrb.mxu2 %v1046_v60 }
  0x3c   :  { %603 = vmatmul.bf16.gmra.mxu3 %v820_v2  ;;  %632 = vmatmul.bf16.gmra.mxu0 %v824_v3 }
  0x3e   :  { %568 = vmatpush.bf16.msrb.mxu2 %v1045_v1 }
  0x41   :  { %569 = vmatmul.bf16.vlgmr.msrb.gmra.mxu2 %v796_v8  ;;  %1013 = vmatmul.msk.bf16.vlgmr.msrb.gmra.mxu1 %vm519_vm1, %v808_v9 }
  0x4c   :  { %608 = vmatmul.bf16.gmra.mxu3 %v840_v16  ;;  %637 = vmatmul.bf16.gmra.mxu0 %v844_v17 }
  0x51   :  { %574 = vmatmul.bf16.gmra.mxu2 %v816_v22  ;;  %1014 = vmatmul.msk.bf16.gmra.mxu1 %vm519_vm1, %v828_v23 }
  0x5c   :  { %613 = vmatmul.bf16.gmra.mxu3 %v860_v31  ;;  %642 = vmatmul.bf16.gmra.mxu0 %v864_v33 }
  0x61   :  { %579 = vmatmul.bf16.gmra.mxu2 %v836_v39  ;;  %1015 = vmatmul.msk.bf16.gmra.mxu1 %vm519_vm1, %v848_v40 }
  0x71   :  { %584 = vmatmul.bf16.gmra.mxu2 %v856_v45  ;;  %1016 = vmatmul.msk.bf16.gmra.mxu1 %vm519_vm1, %v868_v46 }
  0x86   :  { %v688_v11 = vpop.permute.xlu0 %687 }
  0x89   :  { %v183_v48 = vpop.f32.mrf.mxu0 }
  0x8a   :  { %v698_v34 = vpop.permute.xlu1 %697 }
  0x8f   :  { %v193_v47 = vpop.f32.mrf.mxu3  ;;  %v693_v22 = vpop.permute.xlu0 %692 }
  0x91   :  { %v185_v50 = vpop.f32.mrf.mxu0 }
  0x92   :  { %v703_v46 = vpop.permute.xlu1 %702 }
  0x97   :  { %v1425_v49 = vpop.f32.mrf.mxu3 }
  0x99   :  { %v188_v56 = vpop.f32.mrf.mxu0 }
  0x9e   :  { %v541_v51 = vpop.f32.mrf.mxu1 }
  0x9f   :  { %v198_v53 = vpop.f32.mrf.mxu3  ;;  %v542_v5 = vadd.f32 %v541_v51, %v183_v48 }
  0xa1   :  { %v190_v60 = vpop.f32.mrf.mxu0 }
  0xa4   :  { %v551_v52 = vpop.f32.mrf.mxu2 }
  0xa5   :  { %v1427_v54 = vadd.f32 %v551_v52, %v193_v47 }
  0xa6   :  { %v543_v55 = vpop.f32.mrf.mxu1 }
  0xa7   :  { %v1431_v59 = vpop.f32.mrf.mxu3  ;;  %v544_v12 = vadd.f32 %v543_v55, %v185_v50 }
  0xa9   :  { %v628_v1 = vpop.f32.mrf.mxu0 }
  0xac   :  { %v1429_v57 = vpop.f32.mrf.mxu2 }
  0xae   :  { %v546_v58 = vpop.f32.mrf.mxu1 }
  0xaf   :  { %v599_v0 = vpop.f32.mrf.mxu3  ;;  %v547_v23 = vadd.f32 %v546_v58, %v188_v56 }
  0xb1   :  { %v630_v7 = vpop.f32.mrf.mxu0 }
  0xb4   :  { %v556_v61 = vpop.f32.mrf.mxu2 }
  0xb5   :  { %v1433_v62 = vadd.f32 %v556_v61, %v198_v53 }
  0xb6   :  { %v548_v63 = vpop.f32.mrf.mxu1 }
  0xb7   :  { %v601_v4 = vpop.f32.mrf.mxu3  ;;  %v549_v37 = vadd.f32 %v548_v63, %v190_v60  ;;  %v708_v60 = vpop.permute.xlu2 %707 }
  0xb9   :  { %v633_v17 = vpop.f32.mrf.mxu0 }
  0xbc   :  { %v1435_v2 = vpop.f32.mrf.mxu2 }
  0xbe   :  { %v657_v3 = vpop.f32.mrf.mxu1 }
  0xbf   :  { %v604_v15 = vpop.f32.mrf.mxu3 }
  0xc1   :  { %v635_v33 = vpop.f32.mrf.mxu0 }
  0xc4   :  { %v570_v6 = vpop.f32.mrf.mxu2 }
  0xc5   :  { %v571_v8 = vadd.f32 %v570_v6, %v542_v5 }
  0xc6   :  { %v659_v9 = vpop.f32.mrf.mxu1 }
  0xc7   :  { %v600_v10 = vadd.f32 %v599_v0, %v571_v8  ;;  %v606_v29 = vpop.f32.mrf.mxu3  ;;  %v554_v0 = vadd.f32 %v1429_v57, %v1425_v49 }
  0xc9   :  { %v629_v13 = vadd.f32 %v628_v1, %v600_v10  ;;  %v638_v45 = vpop.f32.mrf.mxu0 }
  0xcb   :  { %v658_v18 = vadd.f32 %v657_v3, %v629_v13 }
  0xcc   :  { %v572_v14 = vpop.f32.mrf.mxu2 }
  0xcd   :  { %v573_v16 = vadd.f32 %v572_v14, %v544_v12  ;;  %v725_v24 = vadd.f32 %v688_v11, %v658_v18 }
  0xce   :  { %v662_v20 = vpop.f32.mrf.mxu1 }
  0xcf   :  { %v602_v19 = vadd.f32 %v601_v4, %v573_v16  ;;  %v733_v30 = vmax.f32 %v725_v24, 0.0  ;;  %v609_v43 = vpop.f32.mrf.mxu3 }
  0xd1   :  { %v631_v21 = vadd.f32 %v630_v7, %v602_v19  ;;  %v640_v3 = vpop.f32.mrf.mxu0 }
  0xd3   :  { %v660_v25 = vadd.f32 %v659_v9, %v631_v21  ;;  %v713_v9 = vpop.permute.xlu2 %712 }
  0xd4   :  { %v575_v26 = vpop.f32.mrf.mxu2 }
  0xd5   :  { %v726_v27 = vadd.f32 %v693_v22, %v660_v25  ;;  %v576_v28 = vadd.f32 %v575_v26, %v547_v23 }
  0xd6   :  { %v664_v36 = vpop.f32.mrf.mxu1 }
  0xd7   :  { %v734_v31 = vmax.f32 %v726_v27, 0.0  ;;  %v605_v32 = vadd.f32 %v604_v15, %v576_v28  ;;  %v611_v63 = vpop.f32.mrf.mxu3  ;;  %v718_v28 = vpop.permute.xlu0 %717 }
  0xd9   :  { %v1082_v35 = vpack.c.bf16 %v734_v31, %v733_v30  ;;  %v634_v38 = vadd.f32 %v633_v17, %v605_v32  ;;  %v643_v57 = vpop.f32.mrf.mxu0  ;;  %v723_v32 = vpop.permute.xlu1 %722 }
  0xdb   :  { %1083 = vst [vmem:[%s1460_s5] sm:$0xff] %v1082_v35   ;;  %v663_v41 = vadd.f32 %v662_v20, %v634_v38  ;;  %v559_v20 = vadd.f32 %v1435_v2, %v1431_v59 }
  0xdc   :  { %v577_v39 = vpop.f32.mrf.mxu2 }
  0xdd   :  { %v578_v40 = vadd.f32 %v577_v39, %v549_v37  ;;  %v727_v47 = vadd.f32 %v698_v34, %v663_v41 }
  0xde   :  { %v667_v50 = vpop.f32.mrf.mxu1 }
  0xdf   :  { %v607_v42 = vadd.f32 %v606_v29, %v578_v40  ;;  %v735_v55 = vmax.f32 %v727_v47, 0.0  ;;  %v614_v12 = vpop.f32.mrf.mxu3 }
  0xe1   :  { %v636_v44 = vadd.f32 %v635_v33, %v607_v42 }
  0xe3   :  { %v665_v48 = vadd.f32 %v664_v36, %v636_v44 }
  0xe4   :  { %v580_v51 = vpop.f32.mrf.mxu2 }
  0xe5   :  { %v728_v52 = vadd.f32 %v703_v46, %v665_v48  ;;  %v581_v53 = vadd.f32 %v580_v51, %v1427_v54 }
  0xe6   :  { %v669_v6 = vpop.f32.mrf.mxu1 }
  0xe7   :  { %v736_v56 = vmax.f32 %v728_v52, 0.0  ;;  %v610_v58 = vadd.f32 %v609_v43, %v581_v53  ;;  %v616_v24 = vpop.f32.mrf.mxu3 }
  0xe9   :  { %v1087_v61 = vpack.c.bf16 %v736_v56, %v735_v55  ;;  %v639_v1 = vadd.f32 %v638_v45, %v610_v58 }
  0xeb   :  { %1099 = vst [vmem:[%s1460_s5 + $0x8] sm:$0xff] %v1087_v61   ;;  %v668_v7 = vadd.f32 %v667_v50, %v639_v1 }
  0xec   :  { %v582_v4 = vpop.f32.mrf.mxu2 }
  0xed   :  { %v583_v5 = vadd.f32 %v582_v4, %v554_v0  ;;  %v729_v10 = vadd.f32 %v708_v60, %v668_v7 }
  0xee   :  { %v672_v18 = vpop.f32.mrf.mxu1 }
  0xef   :  { %v612_v54 = vadd.f32 %v611_v63, %v583_v5  ;;  %v737_v15 = vmax.f32 %v729_v10, 0.0 }
  0xf1   :  { %v641_v8 = vadd.f32 %v640_v3, %v612_v54 }
  0xf3   :  { %v670_v11 = vadd.f32 %v669_v6, %v641_v8 }
  0xf4   :  { %v585_v13 = vpop.f32.mrf.mxu2 }
  0xf5   :  { %v730_v14 = vadd.f32 %v713_v9, %v670_v11  ;;  %v586_v49 = vadd.f32 %v585_v13, %v1433_v62  ;;  %v645_v62 = vpop.f32.mrf.mxu0 }
  0xf6   :  { %v674_v29 = vpop.f32.mrf.mxu1 }
  0xf7   :  { %v738_v16 = vmax.f32 %v730_v14, 0.0  ;;  %v615_v17 = vadd.f32 %v614_v12, %v586_v49 }
  0xf9   :  { %v1092_v19 = vpack.c.bf16 %v738_v16, %v737_v15  ;;  %v644_v21 = vadd.f32 %v643_v57, %v615_v17 }
  0xfb   :  { %1100 = vst [vmem:[%s1460_s5 + $0x10] sm:$0xff] %v1092_v19   ;;  %v673_v25 = vadd.f32 %v672_v18, %v644_v21 }
  0xfc   :  { %v587_v22 = vpop.f32.mrf.mxu2 }
  0xfd   :  { %v588_v23 = vadd.f32 %v587_v22, %v559_v20  ;;  %v731_v30 = vadd.f32 %v718_v28, %v673_v25 }
  0xff   :  { %v617_v26 = vadd.f32 %v616_v24, %v588_v23  ;;  %v739_v34 = vmax.f32 %v731_v30, 0.0 }
 0x101   :  { %v646_v27 = vadd.f32 %v645_v62, %v617_v26 }
 0x103   :  { %v675_v31 = vadd.f32 %v674_v29, %v646_v27 }
 0x105   :  { %v732_v33 = vadd.f32 %v723_v32, %v675_v31 }
 0x107   :  { %v740_v59 = vmax.f32 %v732_v33, 0.0 }
 0x109   :  { %v1097_v2 = vpack.c.bf16 %v740_v59, %v739_v34 }
 0x10b   :  { %1101 = vst [vmem:[%s1460_s5 + $0x18] sm:$0xff] %v1097_v2  }

// kernel: _lambda_.38
= control target key start
LH: loop header
LB: loop body
LE: loop exit
PB: predicated region body
PF: predicated region fallthrough
CT: control target
= control target key end

     0   :  { %v988_v6 = vmov 0   ;;  %vm475_vm0 = vcmask 523264   ;;  %s1283_s1 = inlined_call_operand.vmem [shape: bf16[576,128], index: 1, kind: input, shape index: {}]   ;;  %s1284_s2 = inlined_call_operand.vmem [shape: f32[64,1], index: 2, kind: input, shape index: {}]   ;;  %s1285_s0 = inlined_call_operand.vmem [shape: bf16[64,576], index: 0, kind: input, shape index: {}]   ;;  %s1286_s3 = inlined_call_operand.vmem [shape: bf16[64,128], index: 3, kind: output, shape index: {}]  }
   0x1   :  { %v916_v0 = vld [vmem:[%s1283_s1 + $0x38] sm:$0xff]  ;;  %v915_v1 = vld [vmem:[%s1283_s1 + $0x30] sm:$0xff]  ;;  %v914_v4 = vld [vmem:[%s1283_s1 + $0x28] sm:$0xff]  ;;  %986 = vset.pattern.permute.xlu1 %v988_v6  ;;  %985 = vset.pattern.permute.xlu0 %v988_v6 }
   0x2   :  { %968 = vmatpush.bf16.msra.mxu1 %v916_v0  ;;  %969 = vmatpush.bf16.msra.mxu2 %v916_v0  ;;  %v940_v2 = vld [vmem:[%s1283_s1 + $0xf8] sm:$0xff]  ;;  %v939_v3 = vld [vmem:[%s1283_s1 + $0xf0] sm:$0xff]  ;;  %v938_v5 = vld [vmem:[%s1283_s1 + $0xe8] sm:$0xff] }
   0x3   :  { %488 = vmatpush.bf16.msra.mxu0 %v916_v0  ;;  %575 = vmatpush.bf16.msra.mxu3 %v940_v2  ;;  %v913_v7 = vld [vmem:[%s1283_s1 + $0x20] sm:$0xff]  ;;  %v113_v8 = vld [vmem:[%s1284_s2 + $0x10] sm:$0xff]  ;;  %v912_v11 = vld [vmem:[%s1283_s1 + $0x18] sm:$0xff] }
   0x4   :  { %987 = vset.pattern.permute.xlu2 %v988_v6  ;;  %v937_v9 = vld [vmem:[%s1283_s1 + $0xe0] sm:$0xff]  ;;  %131 = vperm.xlu1 %986, %v113_v8   ;;  %v936_v12 = vld [vmem:[%s1283_s1 + $0xd8] sm:$0xff]  ;;  %v911_v13 = vld [vmem:[%s1283_s1 + $0x10] sm:$0xff] }
   0x5   :  { %v111_v10 = vld [vmem:[%s1284_s2] sm:$0xff]  ;;  %v114_v14 = vld [vmem:[%s1284_s2 + $0x18] sm:$0xff]  ;;  %v935_v15 = vld [vmem:[%s1283_s1 + $0xd0] sm:$0xff] }
   0x6   :  { %970 = vmatpush.bf16.msra.mxu1 %v915_v1  ;;  %971 = vmatpush.bf16.msra.mxu2 %v915_v1  ;;  %v112_v16 = vld [vmem:[%s1284_s2 + $0x8] sm:$0xff]  ;;  %v909_v19 = vld [vmem:[%s1283_s1] sm:$0xff]  ;;  %v896_v21 = vld [vmem:[%s1285_s0 + $0x38] sm:$0xf0] }
   0x7   :  { %489 = vmatpush.bf16.msra.mxu0 %v915_v1  ;;  %576 = vmatpush.bf16.msra.mxu3 %v939_v3  ;;  %v910_v17 = vld [vmem:[%s1283_s1 + $0x8] sm:$0xff]  ;;  %v723_v22 = vld [vmem:[%s1285_s0 + $0x78] sm:$0xf]  ;;  %v663_v26 = vld [vmem:[%s1285_s0] sm:$0xf] }
   0x8   :  { %121 = vperm.xlu0 %985, %v111_v10   ;;  %v934_v18 = vld [vmem:[%s1283_s1 + $0xc8] sm:$0xff]  ;;  %v932_v24 = vld [vmem:[%s1283_s1 + $0xb8] sm:$0xff]  ;;  %v933_v27 = vld [vmem:[%s1283_s1 + $0xc0] sm:$0xff] }
   0x9   :  { %v683_v20 = vld [vmem:[%s1285_s0 + $0x28] sm:$0xf]  ;;  %v906_v23 = vld [vmem:[%s1285_s0 + $0x88] sm:$0xf0]  ;;  %v924_v25 = vld [vmem:[%s1283_s1 + $0x78] sm:$0xff] }
   0xa   :  { %972 = vmatpush.bf16.msra.mxu1 %v914_v4  ;;  %973 = vmatpush.bf16.msra.mxu2 %v914_v4  ;;  %v684_v28 = vor.u32 %v896_v21, %v683_v20  ;;  %v724_v29 = vor.u32 %v906_v23, %v723_v22  ;;  %v891_v30 = vld [vmem:[%s1285_s0 + $0x10] sm:$0xf0]  ;;  %v890_v31 = vld [vmem:[%s1285_s0 + $0xc] sm:$0xf]  ;;  %v673_v32 = vld [vmem:[%s1285_s0 + $0x1c] sm:$0xf0] }
   0xb   :  { %490 = vmatpush.bf16.msra.mxu0 %v914_v4  ;;  %577 = vmatpush.bf16.msra.mxu3 %v938_v5  ;;  %v944_v33 = vld [vmem:[%s1283_s1 + $0x118] sm:$0xff]  ;;  %v931_v34 = vld [vmem:[%s1283_s1 + $0xb0] sm:$0xff]  ;;  %v664_v37 = vor.u32 %v891_v30, %v663_v26  ;;  %v676_v38 = vor.u32 %v890_v31, %v673_v32  ;;  %v930_v41 = vld [vmem:[%s1283_s1 + $0xa8] sm:$0xff] }
   0xc   :  { %136 = vperm.xlu1 %986, %v114_v14   ;;  %v923_v35 = vld [vmem:[%s1283_s1 + $0x70] sm:$0xff]  ;;  %v118_v36 = vld [vmem:[%s1284_s2 + $0x38] sm:$0xff]  ;;  %v922_v42 = vld [vmem:[%s1283_s1 + $0x68] sm:$0xff] }
   0xd   :  { %v943_v39 = vld [vmem:[%s1283_s1 + $0x110] sm:$0xff]  ;;  %v942_v43 = vld [vmem:[%s1283_s1 + $0x108] sm:$0xff]  ;;  %v929_v44 = vld [vmem:[%s1283_s1 + $0xa0] sm:$0xff] }
   0xe   :  { %974 = vmatpush.bf16.msra.mxu1 %v913_v7  ;;  %975 = vmatpush.bf16.msra.mxu2 %v913_v7  ;;  %v117_v40 = vld [vmem:[%s1284_s2 + $0x30] sm:$0xff]  ;;  %v921_v45 = vld [vmem:[%s1283_s1 + $0x60] sm:$0xff]  ;;  %v928_v49 = vld [vmem:[%s1283_s1 + $0x98] sm:$0xff] }
   0xf   :  { %491 = vmatpush.bf16.msra.mxu0 %v913_v7  ;;  %578 = vmatpush.bf16.msra.mxu3 %v937_v9  ;;  %v703_v46 = vld [vmem:[%s1285_s0 + $0x50] sm:$0xf]  ;;  %v901_v47 = vld [vmem:[%s1285_s0 + $0x60] sm:$0xf0]  ;;  %v920_v50 = vld [vmem:[%s1283_s1 + $0x58] sm:$0xff] }
  0x10   :  { %126 = vperm.xlu0 %985, %v112_v16   ;;  %v941_v48 = vld [vmem:[%s1283_s1 + $0x100] sm:$0xff]  ;;  %v679_v51 = vld [vmem:[%s1285_s0 + $0x10] sm:$0xf]  ;;  %v704_v52 = vor.u32 %v901_v47, %v703_v46  ;;  %v895_v54 = vld [vmem:[%s1285_s0 + $0x34] sm:$0xf] }
  0x11   :  { %v893_v53 = vld [vmem:[%s1285_s0 + $0x20] sm:$0xf0]  ;;  %v693_v55 = vld [vmem:[%s1285_s0 + $0x44] sm:$0xf0]  ;;  %v927_v56 = vld [vmem:[%s1283_s1 + $0x90] sm:$0xff] }
  0x12   :  { %976 = vmatpush.bf16.msra.mxu1 %v912_v11  ;;  %977 = vmatpush.bf16.msra.mxu2 %v912_v11  ;;  %v919_v57 = vld [vmem:[%s1283_s1 + $0x50] sm:$0xff]  ;;  %v680_v58 = vor.u32 %v893_v53, %v679_v51  ;;  %v696_v59 = vor.u32 %v895_v54, %v693_v55  ;;  %v115_v60 = vld [vmem:[%s1284_s2 + $0x20] sm:$0xff]  ;;  %v926_v61 = vld [vmem:[%s1283_s1 + $0x88] sm:$0xff] }
  0x13   :  { %492 = vmatpush.bf16.msra.mxu0 %v912_v11  ;;  %579 = vmatpush.bf16.msra.mxu3 %v936_v12  ;;  %v918_v62 = vld [vmem:[%s1283_s1 + $0x48] sm:$0xff]  ;;  %v925_v63 = vld [vmem:[%s1283_s1 + $0x80] sm:$0xff]  ;;  %v892_v2 = vld [vmem:[%s1285_s0 + $0x18] sm:$0xf0] }
  0x14   :  { %156 = vperm.xlu1 %986, %v118_v36   ;;  %141 = vperm.xlu2 %987, %v115_v60   ;;  %v917_v0 = vld [vmem:[%s1283_s1 + $0x40] sm:$0xff]  ;;  %v671_v1 = vld [vmem:[%s1285_s0 + $0x8] sm:$0xf]  ;;  %v665_v6 = vld [vmem:[%s1285_s0 + $0x14] sm:$0xf0] }
  0x15   :  { %v116_v3 = vld [vmem:[%s1284_s2 + $0x28] sm:$0xff]  ;;  %v672_v4 = vor.u32 %v892_v2, %v671_v1  ;;  %v889_v5 = vld [vmem:[%s1285_s0 + $0x4] sm:$0xf]  ;;  %v699_v7 = vld [vmem:[%s1285_s0 + $0x38] sm:$0xf] }
  0x16   :  { %978 = vmatpush.bf16.msra.mxu1 %v911_v13  ;;  %979 = vmatpush.bf16.msra.mxu2 %v911_v13  ;;  %v668_v8 = vor.u32 %v889_v5, %v665_v6  ;;  %v898_v9 = vld [vmem:[%s1285_s0 + $0x48] sm:$0xf0]  ;;  %v900_v10 = vld [vmem:[%s1285_s0 + $0x5c] sm:$0xf]  ;;  %v713_v11 = vld [vmem:[%s1285_s0 + $0x6c] sm:$0xf0] }
  0x17   :  { %493 = vmatpush.bf16.msra.mxu0 %v911_v13  ;;  %580 = vmatpush.bf16.msra.mxu3 %v935_v15  ;;  %v700_v12 = vor.u32 %v898_v9, %v699_v7  ;;  %v716_v13 = vor.u32 %v900_v10, %v713_v11  ;;  %v691_v14 = vld [vmem:[%s1285_s0 + $0x30] sm:$0xf]  ;;  %v897_v15 = vld [vmem:[%s1285_s0 + $0x40] sm:$0xf0]  ;;  %v903_v21 = vld [vmem:[%s1285_s0 + $0x70] sm:$0xf0] }
  0x18   :  { %151 = vperm.xlu0 %985, %v117_v40   ;;  %v692_v16 = vor.u32 %v897_v15, %v691_v14  ;;  %v905_v22 = vld [vmem:[%s1285_s0 + $0x84] sm:$0xf]  ;;  %v733_v23 = vld [vmem:[%s1285_s0 + $0x94] sm:$0xf0]  ;;  %v705_v30 = vld [vmem:[%s1285_s0 + $0x64] sm:$0xf0] }
  0x19   :  { %v711_v26 = vld [vmem:[%s1285_s0 + $0x58] sm:$0xf]  ;;  %v739_v32 = vld [vmem:[%s1285_s0 + $0x88] sm:$0xf]  ;;  %v907_v36 = vld [vmem:[%s1285_s0 + $0x90] sm:$0xf0] }
  0x1a   :  { %980 = vmatpush.bf16.msra.mxu1 %v910_v17  ;;  %981 = vmatpush.bf16.msra.mxu2 %v910_v17 }
  0x1b   :  { %494 = vmatpush.bf16.msra.mxu0 %v910_v17  ;;  %581 = vmatpush.bf16.msra.mxu3 %v934_v18  ;;  %v894_v17 = vld [vmem:[%s1285_s0 + $0x2c] sm:$0xf]  ;;  %v685_v18 = vld [vmem:[%s1285_s0 + $0x3c] sm:$0xf0] }
  0x1c   :  { %146 = vperm.xlu2 %987, %v116_v3   ;;  %v688_v20 = vor.u32 %v894_v17, %v685_v18 }
  0x1e   :  { %982 = vmatpush.bf16.msra.mxu1 %v909_v19  ;;  %983 = vmatpush.bf16.msra.mxu2 %v909_v19 }
  0x1f   :  { %495 = vmatpush.bf16.msra.mxu0 %v909_v19  ;;  %582 = vmatpush.bf16.msra.mxu3 %v933_v27  ;;  %v719_v19 = vld [vmem:[%s1285_s0 + $0x60] sm:$0xf]  ;;  %v902_v27 = vld [vmem:[%s1285_s0 + $0x68] sm:$0xf0] }
  0x21   :  { %501 = vmatmul.bf16.vlgmr.msra.gmra.mxu1 %v684_v28  ;;  %511 = vmatmul.bf16.vlgmr.msra.gmra.mxu2 %v724_v29  ;;  %v712_v28 = vor.u32 %v902_v27, %v711_v26  ;;  %v899_v29 = vld [vmem:[%s1285_s0 + $0x54] sm:$0xf] }
  0x22   :  { %546 = vmatpush.bf16.msrb.mxu2 %v932_v24  ;;  %517 = vmatpush.bf16.msrb.mxu1 %v924_v25  ;;  %v720_v24 = vor.u32 %v903_v21, %v719_v19  ;;  %v736_v25 = vor.u32 %v905_v22, %v733_v23  ;;  %v708_v31 = vor.u32 %v899_v29, %v705_v30 }
  0x23   :  { %608 = vmatpush.bf16.msrb.mxu0 %v944_v33  ;;  %583 = vmatmul.bf16.vlgmr.msra.gmra.mxu3 %v676_v38  ;;  %v908_v33 = vld [vmem:[%s1285_s0 + $0x98] sm:$0xf0] }
  0x24   :  { %496 = vmatmul.bf16.vlgmr.msra.gmra.mxu0 %v664_v37  ;;  %v904_v38 = vld [vmem:[%s1285_s0 + $0x7c] sm:$0xf] }
  0x26   :  { %547 = vmatpush.bf16.msrb.mxu2 %v931_v34  ;;  %518 = vmatpush.bf16.msrb.mxu1 %v923_v35  ;;  %v740_v34 = vor.u32 %v908_v33, %v739_v32  ;;  %v731_v35 = vld [vmem:[%s1285_s0 + $0x80] sm:$0xf] }
  0x27   :  { %609 = vmatpush.bf16.msrb.mxu0 %v943_v39  ;;  %v732_v37 = vor.u32 %v907_v36, %v731_v35  ;;  %v725_v39 = vld [vmem:[%s1285_s0 + $0x8c] sm:$0xf0] }
  0x28   :  { %v728_v40 = vor.u32 %v904_v38, %v725_v39 }
  0x2a   :  { %548 = vmatpush.bf16.msrb.mxu2 %v930_v41  ;;  %519 = vmatpush.bf16.msrb.mxu1 %v922_v42 }
  0x2b   :  { %610 = vmatpush.bf16.msrb.mxu0 %v942_v43 }
  0x2e   :  { %549 = vmatpush.bf16.msrb.mxu2 %v929_v44  ;;  %520 = vmatpush.bf16.msrb.mxu1 %v921_v45 }
  0x2f   :  { %611 = vmatpush.bf16.msrb.mxu0 %v941_v48 }
  0x31   :  { %506 = vmatmul.bf16.gmra.mxu1 %v704_v52 }
  0x32   :  { %550 = vmatpush.bf16.msrb.mxu2 %v928_v49  ;;  %521 = vmatpush.bf16.msrb.mxu1 %v920_v50 }
  0x33   :  { %588 = vmatmul.bf16.gmra.mxu3 %v696_v59 }
  0x34   :  { %885 = vmatmul.msk.bf16.vlgmr.msrb.gmra.mxu0 %vm475_vm0, %v680_v58 }
  0x36   :  { %551 = vmatpush.bf16.msrb.mxu2 %v927_v56  ;;  %522 = vmatpush.bf16.msrb.mxu1 %v919_v57 }
  0x3a   :  { %552 = vmatpush.bf16.msrb.mxu2 %v926_v61  ;;  %523 = vmatpush.bf16.msrb.mxu1 %v918_v62 }
  0x3e   :  { %553 = vmatpush.bf16.msrb.mxu2 %v925_v63  ;;  %524 = vmatpush.bf16.msrb.mxu1 %v917_v0 }
  0x41   :  { %554 = vmatmul.bf16.vlgmr.msrb.gmra.mxu2 %v672_v4  ;;  %525 = vmatmul.bf16.vlgmr.msrb.gmra.mxu1 %v668_v8 }
  0x43   :  { %593 = vmatmul.bf16.gmra.mxu3 %v716_v13 }
  0x44   :  { %886 = vmatmul.msk.bf16.gmra.mxu0 %vm475_vm0, %v700_v12 }
  0x51   :  { %559 = vmatmul.bf16.gmra.mxu2 %v692_v16  ;;  %530 = vmatmul.bf16.gmra.mxu1 %v688_v20 }
  0x53   :  { %598 = vmatmul.bf16.gmra.mxu3 %v736_v25 }
  0x54   :  { %887 = vmatmul.msk.bf16.gmra.mxu0 %vm475_vm0, %v720_v24 }
  0x61   :  { %564 = vmatmul.bf16.gmra.mxu2 %v712_v28  ;;  %535 = vmatmul.bf16.gmra.mxu1 %v708_v31 }
  0x64   :  { %888 = vmatmul.msk.bf16.gmra.mxu0 %vm475_vm0, %v740_v34 }
  0x6e   :  { %v142_v22 = vpop.permute.xlu2 %141 }
  0x71   :  { %569 = vmatmul.bf16.gmra.mxu2 %v732_v37  ;;  %540 = vmatmul.bf16.gmra.mxu1 %v728_v40 }
  0x76   :  { %v132_v63 = vpop.permute.xlu1 %131  ;;  %v147_v37 = vpop.permute.xlu2 %146 }
  0x7a   :  { %v122_v51 = vpop.permute.xlu0 %121 }
  0x7e   :  { %v137_v14 = vpop.permute.xlu1 %136 }
  0x82   :  { %v127_v58 = vpop.permute.xlu0 %126 }
  0x9e   :  { %v502_v41 = vpop.f32.mrf.mxu1 }
  0x9f   :  { %v503_v7 = vadd.f32 %v502_v41, %v132_v63 }
  0xa1   :  { %v497_v42 = vpop.f32.mrf.mxu0 }
  0xa2   :  { %v498_v52 = vadd.f32 %v497_v42, %v122_v51  ;;  %v152_v51 = vpop.permute.xlu0 %151 }
  0xa4   :  { %v1265_v46 = vpop.f32.mrf.mxu2 }
  0xa6   :  { %v504_v43 = vpop.f32.mrf.mxu1  ;;  %v584_v47 = vpop.f32.mrf.mxu3 }
  0xa7   :  { %v505_v18 = vadd.f32 %v504_v43, %v137_v14 }
  0xa9   :  { %v499_v44 = vpop.f32.mrf.mxu0 }
  0xaa   :  { %v500_v60 = vadd.f32 %v499_v44, %v127_v58 }
  0xac   :  { %v1267_v50 = vpop.f32.mrf.mxu2 }
  0xae   :  { %v507_v45 = vpop.f32.mrf.mxu1  ;;  %v586_v54 = vpop.f32.mrf.mxu3 }
  0xaf   :  { %v508_v29 = vadd.f32 %v507_v45, %v142_v22 }
  0xb1   :  { %v613_v49 = vpop.f32.mrf.mxu0 }
  0xb6   :  { %v509_v48 = vpop.f32.mrf.mxu1  ;;  %v589_v2 = vpop.f32.mrf.mxu3 }
  0xb7   :  { %v510_v40 = vadd.f32 %v509_v48, %v147_v37  ;;  %v157_v48 = vpop.permute.xlu1 %156 }
  0xb9   :  { %v615_v57 = vpop.f32.mrf.mxu0 }
  0xbe   :  { %v526_v53 = vpop.f32.mrf.mxu1  ;;  %v591_v16 = vpop.f32.mrf.mxu3 }
  0xbf   :  { %v527_v55 = vadd.f32 %v526_v53, %v498_v52 }
  0xc1   :  { %v618_v4 = vpop.f32.mrf.mxu0 }
  0xc4   :  { %v555_v56 = vpop.f32.mrf.mxu2 }
  0xc5   :  { %v556_v59 = vadd.f32 %v555_v56, %v527_v55 }
  0xc6   :  { %v528_v61 = vpop.f32.mrf.mxu1  ;;  %v594_v28 = vpop.f32.mrf.mxu3 }
  0xc7   :  { %v529_v62 = vadd.f32 %v528_v61, %v500_v60  ;;  %v585_v0 = vadd.f32 %v584_v47, %v556_v59 }
  0xc9   :  { %v614_v5 = vadd.f32 %v613_v49, %v585_v0  ;;  %v620_v19 = vpop.f32.mrf.mxu0 }
  0xcb   :  { %v633_v10 = vmax.f32 %v614_v5, 0.0 }
  0xcc   :  { %v557_v1 = vpop.f32.mrf.mxu2 }
  0xcd   :  { %v558_v3 = vadd.f32 %v557_v1, %v529_v62  ;;  %v515_v1 = vadd.f32 %v1267_v50, %v157_v48 }
  0xce   :  { %v531_v9 = vpop.f32.mrf.mxu1  ;;  %v596_v42 = vpop.f32.mrf.mxu3 }
  0xcf   :  { %v587_v6 = vadd.f32 %v586_v54, %v558_v3  ;;  %v532_v12 = vadd.f32 %v531_v9, %v503_v7  ;;  %v513_v54 = vadd.f32 %v1265_v46, %v152_v51 }
  0xd1   :  { %v616_v8 = vadd.f32 %v615_v57, %v587_v6  ;;  %v623_v32 = vpop.f32.mrf.mxu0 }
  0xd3   :  { %v634_v11 = vmax.f32 %v616_v8, 0.0 }
  0xd4   :  { %v560_v13 = vpop.f32.mrf.mxu2 }
  0xd5   :  { %v948_v15 = vpack.c.bf16 %v634_v11, %v633_v10  ;;  %v561_v17 = vadd.f32 %v560_v13, %v532_v12 }
  0xd6   :  { %v533_v20 = vpop.f32.mrf.mxu1  ;;  %v599_v60 = vpop.f32.mrf.mxu3 }
  0xd7   :  { %949 = vst [vmem:[%s1286_s3] sm:$0xff] %v948_v15   ;;  %v534_v21 = vadd.f32 %v533_v20, %v505_v18  ;;  %v590_v23 = vadd.f32 %v589_v2, %v561_v17 }
  0xd9   :  { %v619_v26 = vadd.f32 %v618_v4, %v590_v23  ;;  %v625_v45 = vpop.f32.mrf.mxu0 }
  0xdb   :  { %v635_v33 = vmax.f32 %v619_v26, 0.0 }
  0xdc   :  { %v562_v24 = vpop.f32.mrf.mxu2 }
  0xdd   :  { %v563_v25 = vadd.f32 %v562_v24, %v534_v21 }
  0xde   :  { %v536_v31 = vpop.f32.mrf.mxu1  ;;  %v601_v6 = vpop.f32.mrf.mxu3 }
  0xdf   :  { %v592_v27 = vadd.f32 %v591_v16, %v563_v25  ;;  %v537_v35 = vadd.f32 %v536_v31, %v508_v29 }
  0xe1   :  { %v621_v30 = vadd.f32 %v620_v19, %v592_v27  ;;  %v628_v63 = vpop.f32.mrf.mxu0 }
  0xe3   :  { %v636_v34 = vmax.f32 %v621_v30, 0.0 }
  0xe4   :  { %v565_v36 = vpop.f32.mrf.mxu2 }
  0xe5   :  { %v953_v38 = vpack.c.bf16 %v636_v34, %v635_v33  ;;  %v566_v39 = vadd.f32 %v565_v36, %v537_v35 }
  0xe6   :  { %v538_v41 = vpop.f32.mrf.mxu1 }
  0xe7   :  { %965 = vst [vmem:[%s1286_s3 + $0x8] sm:$0xff] %v953_v38   ;;  %v539_v43 = vadd.f32 %v538_v41, %v510_v40  ;;  %v595_v44 = vadd.f32 %v594_v28, %v566_v39 }
  0xe9   :  { %v624_v52 = vadd.f32 %v623_v32, %v595_v44  ;;  %v630_v9 = vpop.f32.mrf.mxu0 }
  0xeb   :  { %v637_v57 = vmax.f32 %v624_v52, 0.0 }
  0xec   :  { %v567_v47 = vpop.f32.mrf.mxu2 }
  0xed   :  { %v568_v49 = vadd.f32 %v567_v47, %v539_v43 }
  0xee   :  { %v541_v56 = vpop.f32.mrf.mxu1 }
  0xef   :  { %v597_v53 = vadd.f32 %v596_v42, %v568_v49  ;;  %v542_v59 = vadd.f32 %v541_v56, %v513_v54 }
  0xf1   :  { %v626_v55 = vadd.f32 %v625_v45, %v597_v53 }
  0xf3   :  { %v638_v58 = vmax.f32 %v626_v55, 0.0 }
  0xf4   :  { %v570_v61 = vpop.f32.mrf.mxu2 }
  0xf5   :  { %v958_v62 = vpack.c.bf16 %v638_v58, %v637_v57  ;;  %v571_v0 = vadd.f32 %v570_v61, %v542_v59 }
  0xf6   :  { %v543_v2 = vpop.f32.mrf.mxu1 }
  0xf7   :  { %966 = vst [vmem:[%s1286_s3 + $0x10] sm:$0xff] %v958_v62   ;;  %v544_v3 = vadd.f32 %v543_v2, %v515_v1  ;;  %v600_v46 = vadd.f32 %v599_v60, %v571_v0 }
  0xf9   :  { %v629_v7 = vadd.f32 %v628_v63, %v600_v46 }
  0xfb   :  { %v639_v11 = vmax.f32 %v629_v7, 0.0 }
  0xfc   :  { %v572_v4 = vpop.f32.mrf.mxu2 }
  0xfd   :  { %v573_v5 = vadd.f32 %v572_v4, %v544_v3 }
  0xff   :  { %v602_v8 = vadd.f32 %v601_v6, %v573_v5 }
 0x101   :  { %v631_v10 = vadd.f32 %v630_v9, %v602_v8 }
 0x103   :  { %v640_v12 = vmax.f32 %v631_v10, 0.0 }
 0x105   :  { %v963_v13 = vpack.c.bf16 %v640_v12, %v639_v11 }
 0x107   :  { %967 = vst [vmem:[%s1286_s3 + $0x18] sm:$0xff] %v963_v13  }

// kernel: _lambda_.39
= control target key start
LH: loop header
LB: loop body
LE: loop exit
PB: predicated region body
PF: predicated region fallthrough
CT: control target
= control target key end

     0   :  { %v1034_v6 = vmov 0   ;;  %vm478_vm0 = vcmask 523264   ;;  %s1349_s1 = inlined_call_operand.vmem [shape: bf16[576,128], index: 1, kind: input, shape index: {}]   ;;  %s1350_s2 = inlined_call_operand.vmem [shape: f32[64,1], index: 2, kind: input, shape index: {}]   ;;  %s1351_s0 = inlined_call_operand.vmem [shape: bf16[64,576], index: 0, kind: input, shape index: {}]   ;;  %s1352_s3 = inlined_call_operand.vmem [shape: bf16[64,128], index: 3, kind: input, shape index: {}]   ;;  %s1353_s4 = inlined_call_operand.vmem [shape: bf16[64,128], index: 4, kind: output, shape index: {}]  }
   0x1   :  { %v943_v0 = vld [vmem:[%s1349_s1 + $0x38] sm:$0xff]  ;;  %v942_v1 = vld [vmem:[%s1349_s1 + $0x30] sm:$0xff]  ;;  %v941_v4 = vld [vmem:[%s1349_s1 + $0x28] sm:$0xff]  ;;  %1032 = vset.pattern.permute.xlu1 %v1034_v6  ;;  %1031 = vset.pattern.permute.xlu0 %v1034_v6 }
   0x2   :  { %1014 = vmatpush.bf16.msra.mxu1 %v943_v0  ;;  %1015 = vmatpush.bf16.msra.mxu2 %v943_v0  ;;  %v967_v2 = vld [vmem:[%s1349_s1 + $0xf8] sm:$0xff]  ;;  %v966_v3 = vld [vmem:[%s1349_s1 + $0xf0] sm:$0xff]  ;;  %v965_v5 = vld [vmem:[%s1349_s1 + $0xe8] sm:$0xff] }
   0x3   :  { %491 = vmatpush.bf16.msra.mxu0 %v943_v0  ;;  %578 = vmatpush.bf16.msra.mxu3 %v967_v2  ;;  %v940_v7 = vld [vmem:[%s1349_s1 + $0x20] sm:$0xff]  ;;  %v116_v8 = vld [vmem:[%s1350_s2 + $0x10] sm:$0xff]  ;;  %v939_v11 = vld [vmem:[%s1349_s1 + $0x18] sm:$0xff] }
   0x4   :  { %1033 = vset.pattern.permute.xlu2 %v1034_v6  ;;  %v964_v9 = vld [vmem:[%s1349_s1 + $0xe0] sm:$0xff]  ;;  %134 = vperm.xlu1 %1032, %v116_v8   ;;  %v963_v12 = vld [vmem:[%s1349_s1 + $0xd8] sm:$0xff]  ;;  %v938_v13 = vld [vmem:[%s1349_s1 + $0x10] sm:$0xff] }
   0x5   :  { %v114_v10 = vld [vmem:[%s1350_s2] sm:$0xff]  ;;  %v117_v14 = vld [vmem:[%s1350_s2 + $0x18] sm:$0xff]  ;;  %v962_v15 = vld [vmem:[%s1349_s1 + $0xd0] sm:$0xff] }
   0x6   :  { %1016 = vmatpush.bf16.msra.mxu1 %v942_v1  ;;  %1017 = vmatpush.bf16.msra.mxu2 %v942_v1  ;;  %v115_v16 = vld [vmem:[%s1350_s2 + $0x8] sm:$0xff]  ;;  %v936_v19 = vld [vmem:[%s1349_s1] sm:$0xff]  ;;  %v923_v21 = vld [vmem:[%s1351_s0 + $0x38] sm:$0xf0] }
   0x7   :  { %492 = vmatpush.bf16.msra.mxu0 %v942_v1  ;;  %579 = vmatpush.bf16.msra.mxu3 %v966_v3  ;;  %v937_v17 = vld [vmem:[%s1349_s1 + $0x8] sm:$0xff]  ;;  %v750_v22 = vld [vmem:[%s1351_s0 + $0x78] sm:$0xf]  ;;  %v690_v26 = vld [vmem:[%s1351_s0] sm:$0xf] }
   0x8   :  { %124 = vperm.xlu0 %1031, %v114_v10   ;;  %v961_v18 = vld [vmem:[%s1349_s1 + $0xc8] sm:$0xff]  ;;  %v959_v24 = vld [vmem:[%s1349_s1 + $0xb8] sm:$0xff]  ;;  %v960_v27 = vld [vmem:[%s1349_s1 + $0xc0] sm:$0xff] }
   0x9   :  { %v710_v20 = vld [vmem:[%s1351_s0 + $0x28] sm:$0xf]  ;;  %v933_v23 = vld [vmem:[%s1351_s0 + $0x88] sm:$0xf0]  ;;  %v951_v25 = vld [vmem:[%s1349_s1 + $0x78] sm:$0xff] }
   0xa   :  { %1018 = vmatpush.bf16.msra.mxu1 %v941_v4  ;;  %1019 = vmatpush.bf16.msra.mxu2 %v941_v4  ;;  %v711_v28 = vor.u32 %v923_v21, %v710_v20  ;;  %v751_v29 = vor.u32 %v933_v23, %v750_v22  ;;  %v918_v30 = vld [vmem:[%s1351_s0 + $0x10] sm:$0xf0]  ;;  %v917_v31 = vld [vmem:[%s1351_s0 + $0xc] sm:$0xf]  ;;  %v700_v32 = vld [vmem:[%s1351_s0 + $0x1c] sm:$0xf0] }
   0xb   :  { %493 = vmatpush.bf16.msra.mxu0 %v941_v4  ;;  %580 = vmatpush.bf16.msra.mxu3 %v965_v5  ;;  %v971_v33 = vld [vmem:[%s1349_s1 + $0x118] sm:$0xff]  ;;  %v958_v34 = vld [vmem:[%s1349_s1 + $0xb0] sm:$0xff]  ;;  %v691_v37 = vor.u32 %v918_v30, %v690_v26  ;;  %v703_v38 = vor.u32 %v917_v31, %v700_v32  ;;  %v957_v41 = vld [vmem:[%s1349_s1 + $0xa8] sm:$0xff] }
   0xc   :  { %139 = vperm.xlu1 %1032, %v117_v14   ;;  %v950_v35 = vld [vmem:[%s1349_s1 + $0x70] sm:$0xff]  ;;  %v121_v36 = vld [vmem:[%s1350_s2 + $0x38] sm:$0xff]  ;;  %v949_v42 = vld [vmem:[%s1349_s1 + $0x68] sm:$0xff] }
   0xd   :  { %v970_v39 = vld [vmem:[%s1349_s1 + $0x110] sm:$0xff]  ;;  %v969_v43 = vld [vmem:[%s1349_s1 + $0x108] sm:$0xff]  ;;  %v956_v44 = vld [vmem:[%s1349_s1 + $0xa0] sm:$0xff] }
   0xe   :  { %1020 = vmatpush.bf16.msra.mxu1 %v940_v7  ;;  %1021 = vmatpush.bf16.msra.mxu2 %v940_v7  ;;  %v120_v40 = vld [vmem:[%s1350_s2 + $0x30] sm:$0xff]  ;;  %v948_v45 = vld [vmem:[%s1349_s1 + $0x60] sm:$0xff]  ;;  %v955_v49 = vld [vmem:[%s1349_s1 + $0x98] sm:$0xff] }
   0xf   :  { %494 = vmatpush.bf16.msra.mxu0 %v940_v7  ;;  %581 = vmatpush.bf16.msra.mxu3 %v964_v9  ;;  %v730_v46 = vld [vmem:[%s1351_s0 + $0x50] sm:$0xf]  ;;  %v928_v47 = vld [vmem:[%s1351_s0 + $0x60] sm:$0xf0]  ;;  %v947_v50 = vld [vmem:[%s1349_s1 + $0x58] sm:$0xff] }
  0x10   :  { %129 = vperm.xlu0 %1031, %v115_v16   ;;  %v968_v48 = vld [vmem:[%s1349_s1 + $0x100] sm:$0xff]  ;;  %v706_v51 = vld [vmem:[%s1351_s0 + $0x10] sm:$0xf]  ;;  %v731_v52 = vor.u32 %v928_v47, %v730_v46  ;;  %v922_v54 = vld [vmem:[%s1351_s0 + $0x34] sm:$0xf] }
  0x11   :  { %v920_v53 = vld [vmem:[%s1351_s0 + $0x20] sm:$0xf0]  ;;  %v720_v55 = vld [vmem:[%s1351_s0 + $0x44] sm:$0xf0]  ;;  %v954_v56 = vld [vmem:[%s1349_s1 + $0x90] sm:$0xff] }
  0x12   :  { %1022 = vmatpush.bf16.msra.mxu1 %v939_v11  ;;  %1023 = vmatpush.bf16.msra.mxu2 %v939_v11  ;;  %v946_v57 = vld [vmem:[%s1349_s1 + $0x50] sm:$0xff]  ;;  %v707_v58 = vor.u32 %v920_v53, %v706_v51  ;;  %v723_v59 = vor.u32 %v922_v54, %v720_v55  ;;  %v118_v60 = vld [vmem:[%s1350_s2 + $0x20] sm:$0xff]  ;;  %v953_v61 = vld [vmem:[%s1349_s1 + $0x88] sm:$0xff] }
  0x13   :  { %495 = vmatpush.bf16.msra.mxu0 %v939_v11  ;;  %582 = vmatpush.bf16.msra.mxu3 %v963_v12  ;;  %v945_v62 = vld [vmem:[%s1349_s1 + $0x48] sm:$0xff]  ;;  %v952_v63 = vld [vmem:[%s1349_s1 + $0x80] sm:$0xff]  ;;  %v919_v2 = vld [vmem:[%s1351_s0 + $0x18] sm:$0xf0] }
  0x14   :  { %159 = vperm.xlu1 %1032, %v121_v36   ;;  %144 = vperm.xlu2 %1033, %v118_v60   ;;  %v944_v0 = vld [vmem:[%s1349_s1 + $0x40] sm:$0xff]  ;;  %v698_v1 = vld [vmem:[%s1351_s0 + $0x8] sm:$0xf]  ;;  %v692_v6 = vld [vmem:[%s1351_s0 + $0x14] sm:$0xf0] }
  0x15   :  { %v119_v3 = vld [vmem:[%s1350_s2 + $0x28] sm:$0xff]  ;;  %v699_v4 = vor.u32 %v919_v2, %v698_v1  ;;  %v916_v5 = vld [vmem:[%s1351_s0 + $0x4] sm:$0xf]  ;;  %v726_v7 = vld [vmem:[%s1351_s0 + $0x38] sm:$0xf] }
  0x16   :  { %1024 = vmatpush.bf16.msra.mxu1 %v938_v13  ;;  %1025 = vmatpush.bf16.msra.mxu2 %v938_v13  ;;  %v695_v8 = vor.u32 %v916_v5, %v692_v6  ;;  %v925_v9 = vld [vmem:[%s1351_s0 + $0x48] sm:$0xf0]  ;;  %v927_v10 = vld [vmem:[%s1351_s0 + $0x5c] sm:$0xf]  ;;  %v740_v11 = vld [vmem:[%s1351_s0 + $0x6c] sm:$0xf0] }
  0x17   :  { %496 = vmatpush.bf16.msra.mxu0 %v938_v13  ;;  %583 = vmatpush.bf16.msra.mxu3 %v962_v15  ;;  %v727_v12 = vor.u32 %v925_v9, %v726_v7  ;;  %v743_v13 = vor.u32 %v927_v10, %v740_v11  ;;  %v718_v14 = vld [vmem:[%s1351_s0 + $0x30] sm:$0xf]  ;;  %v924_v15 = vld [vmem:[%s1351_s0 + $0x40] sm:$0xf0]  ;;  %v930_v21 = vld [vmem:[%s1351_s0 + $0x70] sm:$0xf0] }
  0x18   :  { %154 = vperm.xlu0 %1031, %v120_v40   ;;  %v719_v16 = vor.u32 %v924_v15, %v718_v14  ;;  %v932_v22 = vld [vmem:[%s1351_s0 + $0x84] sm:$0xf]  ;;  %v760_v23 = vld [vmem:[%s1351_s0 + $0x94] sm:$0xf0]  ;;  %v732_v30 = vld [vmem:[%s1351_s0 + $0x64] sm:$0xf0] }
  0x19   :  { %v738_v26 = vld [vmem:[%s1351_s0 + $0x58] sm:$0xf]  ;;  %v766_v32 = vld [vmem:[%s1351_s0 + $0x88] sm:$0xf]  ;;  %v934_v36 = vld [vmem:[%s1351_s0 + $0x90] sm:$0xf0] }
  0x1a   :  { %1026 = vmatpush.bf16.msra.mxu1 %v937_v17  ;;  %1027 = vmatpush.bf16.msra.mxu2 %v937_v17 }
  0x1b   :  { %497 = vmatpush.bf16.msra.mxu0 %v937_v17  ;;  %584 = vmatpush.bf16.msra.mxu3 %v961_v18  ;;  %v921_v17 = vld [vmem:[%s1351_s0 + $0x2c] sm:$0xf]  ;;  %v712_v18 = vld [vmem:[%s1351_s0 + $0x3c] sm:$0xf0] }
  0x1c   :  { %149 = vperm.xlu2 %1033, %v119_v3   ;;  %v715_v20 = vor.u32 %v921_v17, %v712_v18 }
  0x1e   :  { %1028 = vmatpush.bf16.msra.mxu1 %v936_v19  ;;  %1029 = vmatpush.bf16.msra.mxu2 %v936_v19 }
  0x1f   :  { %498 = vmatpush.bf16.msra.mxu0 %v936_v19  ;;  %585 = vmatpush.bf16.msra.mxu3 %v960_v27  ;;  %v746_v19 = vld [vmem:[%s1351_s0 + $0x60] sm:$0xf]  ;;  %v929_v27 = vld [vmem:[%s1351_s0 + $0x68] sm:$0xf0] }
  0x21   :  { %504 = vmatmul.bf16.vlgmr.msra.gmra.mxu1 %v711_v28  ;;  %514 = vmatmul.bf16.vlgmr.msra.gmra.mxu2 %v751_v29  ;;  %v739_v28 = vor.u32 %v929_v27, %v738_v26  ;;  %v926_v29 = vld [vmem:[%s1351_s0 + $0x54] sm:$0xf]  ;;  %v1008_v27 = vld [vmem:[%s1352_s3 + $0x8] sm:$0xff]  }
  0x22   :  { %549 = vmatpush.bf16.msrb.mxu2 %v959_v24  ;;  %520 = vmatpush.bf16.msrb.mxu1 %v951_v25  ;;  %v747_v24 = vor.u32 %v930_v21, %v746_v19  ;;  %v763_v25 = vor.u32 %v932_v22, %v760_v23  ;;  %v735_v31 = vor.u32 %v926_v29, %v732_v30 }
  0x23   :  { %611 = vmatpush.bf16.msrb.mxu0 %v971_v33  ;;  %586 = vmatmul.bf16.vlgmr.msra.gmra.mxu3 %v703_v38  ;;  %v935_v33 = vld [vmem:[%s1351_s0 + $0x98] sm:$0xf0] }
  0x24   :  { %499 = vmatmul.bf16.vlgmr.msra.gmra.mxu0 %v691_v37  ;;  %v931_v38 = vld [vmem:[%s1351_s0 + $0x7c] sm:$0xf] }
  0x26   :  { %550 = vmatpush.bf16.msrb.mxu2 %v958_v34  ;;  %521 = vmatpush.bf16.msrb.mxu1 %v950_v35  ;;  %v767_v34 = vor.u32 %v935_v33, %v766_v32  ;;  %v758_v35 = vld [vmem:[%s1351_s0 + $0x80] sm:$0xf]  ;;  %v978_v32 = vunpack.c.l.bf16 %v1008_v27 }
  0x27   :  { %612 = vmatpush.bf16.msrb.mxu0 %v970_v39  ;;  %v759_v37 = vor.u32 %v934_v36, %v758_v35  ;;  %v752_v39 = vld [vmem:[%s1351_s0 + $0x8c] sm:$0xf0]  ;;  %v979_v35 = vunpack.c.h.bf16 %v1008_v27 }
  0x28   :  { %v755_v40 = vor.u32 %v931_v38, %v752_v39 }
  0x2a   :  { %551 = vmatpush.bf16.msrb.mxu2 %v957_v41  ;;  %522 = vmatpush.bf16.msrb.mxu1 %v949_v42 }
  0x2b   :  { %613 = vmatpush.bf16.msrb.mxu0 %v969_v43 }
  0x2e   :  { %552 = vmatpush.bf16.msrb.mxu2 %v956_v44  ;;  %523 = vmatpush.bf16.msrb.mxu1 %v948_v45 }
  0x2f   :  { %614 = vmatpush.bf16.msrb.mxu0 %v968_v48 }
  0x31   :  { %509 = vmatmul.bf16.gmra.mxu1 %v731_v52 }
  0x32   :  { %553 = vmatpush.bf16.msrb.mxu2 %v955_v49  ;;  %524 = vmatpush.bf16.msrb.mxu1 %v947_v50 }
  0x33   :  { %591 = vmatmul.bf16.gmra.mxu3 %v723_v59 }
  0x34   :  { %912 = vmatmul.msk.bf16.vlgmr.msrb.gmra.mxu0 %vm478_vm0, %v707_v58 }
  0x36   :  { %554 = vmatpush.bf16.msrb.mxu2 %v954_v56  ;;  %525 = vmatpush.bf16.msrb.mxu1 %v946_v57 }
  0x3a   :  { %555 = vmatpush.bf16.msrb.mxu2 %v953_v61  ;;  %526 = vmatpush.bf16.msrb.mxu1 %v945_v62 }
  0x3e   :  { %556 = vmatpush.bf16.msrb.mxu2 %v952_v63  ;;  %527 = vmatpush.bf16.msrb.mxu1 %v944_v0  ;;  %v973_v63 = vld [vmem:[%s1352_s3] sm:$0xff]  }
  0x3f   :  { %v974_v5 = vunpack.c.l.bf16 %v973_v63  ;;  %v975_v9 = vunpack.c.h.bf16 %v973_v63 }
  0x41   :  { %557 = vmatmul.bf16.vlgmr.msrb.gmra.mxu2 %v699_v4  ;;  %528 = vmatmul.bf16.vlgmr.msrb.gmra.mxu1 %v695_v8 }
  0x43   :  { %596 = vmatmul.bf16.gmra.mxu3 %v743_v13 }
  0x44   :  { %913 = vmatmul.msk.bf16.gmra.mxu0 %vm478_vm0, %v727_v12 }
  0x51   :  { %562 = vmatmul.bf16.gmra.mxu2 %v719_v16  ;;  %533 = vmatmul.bf16.gmra.mxu1 %v715_v20 }
  0x53   :  { %601 = vmatmul.bf16.gmra.mxu3 %v763_v25 }
  0x54   :  { %914 = vmatmul.msk.bf16.gmra.mxu0 %vm478_vm0, %v747_v24 }
  0x61   :  { %567 = vmatmul.bf16.gmra.mxu2 %v739_v28  ;;  %538 = vmatmul.bf16.gmra.mxu1 %v735_v31 }
  0x64   :  { %915 = vmatmul.msk.bf16.gmra.mxu0 %vm478_vm0, %v767_v34 }
  0x6e   :  { %v145_v29 = vpop.permute.xlu2 %144 }
  0x71   :  { %572 = vmatmul.bf16.gmra.mxu2 %v759_v37  ;;  %543 = vmatmul.bf16.gmra.mxu1 %v755_v40 }
  0x76   :  { %v135_v1 = vpop.permute.xlu1 %134 }
  0x7a   :  { %v125_v51 = vpop.permute.xlu0 %124 }
  0x7e   :  { %v140_v17 = vpop.permute.xlu1 %139 }
  0x82   :  { %v130_v59 = vpop.permute.xlu0 %129 }
  0x9e   :  { %v505_v41 = vpop.f32.mrf.mxu1 }
  0x9f   :  { %v506_v10 = vadd.f32 %v505_v41, %v135_v1 }
  0xa1   :  { %v500_v42 = vpop.f32.mrf.mxu0 }
  0xa2   :  { %v501_v52 = vadd.f32 %v500_v42, %v125_v51 }
  0xa4   :  { %v1316_v46 = vpop.f32.mrf.mxu2 }
  0xa6   :  { %v507_v43 = vpop.f32.mrf.mxu1  ;;  %v587_v47 = vpop.f32.mrf.mxu3 }
  0xa7   :  { %v508_v23 = vadd.f32 %v507_v43, %v140_v17 }
  0xa9   :  { %v502_v44 = vpop.f32.mrf.mxu0 }
  0xaa   :  { %v503_v60 = vadd.f32 %v502_v44, %v130_v59 }
  0xac   :  { %v1320_v50 = vpop.f32.mrf.mxu2 }
  0xae   :  { %v510_v45 = vpop.f32.mrf.mxu1  ;;  %v589_v55 = vpop.f32.mrf.mxu3 }
  0xaf   :  { %v511_v36 = vadd.f32 %v510_v45, %v145_v29 }
  0xb1   :  { %v616_v49 = vpop.f32.mrf.mxu0 }
  0xb6   :  { %v1318_v48 = vpop.f32.mrf.mxu1  ;;  %v592_v3 = vpop.f32.mrf.mxu3 }
  0xb9   :  { %v618_v57 = vpop.f32.mrf.mxu0 }
  0xbe   :  { %v529_v53 = vpop.f32.mrf.mxu1  ;;  %v594_v21 = vpop.f32.mrf.mxu3 }
  0xbf   :  { %v530_v54 = vadd.f32 %v529_v53, %v501_v52 }
  0xc1   :  { %v621_v7 = vpop.f32.mrf.mxu0 }
  0xc4   :  { %v558_v56 = vpop.f32.mrf.mxu2 }
  0xc5   :  { %v559_v58 = vadd.f32 %v558_v56, %v530_v54  ;;  %v1009_v56 = vld [vmem:[%s1352_s3 + $0x10] sm:$0xff]  }
  0xc6   :  { %v531_v62 = vpop.f32.mrf.mxu1  ;;  %v597_v37 = vpop.f32.mrf.mxu3  ;;  %v982_v63 = vunpack.c.l.bf16 %v1009_v56 }
  0xc7   :  { %v588_v61 = vadd.f32 %v587_v47, %v559_v58  ;;  %v532_v0 = vadd.f32 %v531_v62, %v503_v60  ;;  %v150_v47 = vpop.permute.xlu2 %149 }
  0xc8   :  { %v513_v54 = vadd.f32 %v1318_v48, %v150_v47  ;;  %v983_v48 = vunpack.c.h.bf16 %v1009_v56 }
  0xc9   :  { %v617_v4 = vadd.f32 %v616_v49, %v588_v61  ;;  %v623_v24 = vpop.f32.mrf.mxu0  ;;  %v155_v61 = vpop.permute.xlu0 %154 }
  0xcb   :  { %v652_v11 = vadd.f32 %v974_v5, %v617_v4 }
  0xcc   :  { %v560_v2 = vpop.f32.mrf.mxu2 }
  0xcd   :  { %v561_v6 = vadd.f32 %v560_v2, %v532_v0  ;;  %v660_v18 = vmax.f32 %v652_v11, 0.0  ;;  %v516_v2 = vadd.f32 %v1316_v46, %v155_v61 }
  0xce   :  { %v534_v13 = vpop.f32.mrf.mxu1 }
  0xcf   :  { %v590_v8 = vadd.f32 %v589_v55, %v561_v6  ;;  %v535_v14 = vadd.f32 %v534_v13, %v506_v10  ;;  %v160_v10 = vpop.permute.xlu1 %159 }
  0xd1   :  { %v619_v12 = vadd.f32 %v618_v57, %v590_v8  ;;  %v626_v41 = vpop.f32.mrf.mxu0  ;;  %v599_v57 = vpop.f32.mrf.mxu3 }
  0xd3   :  { %v653_v15 = vadd.f32 %v975_v9, %v619_v12 }
  0xd4   :  { %v563_v16 = vpop.f32.mrf.mxu2 }
  0xd5   :  { %v661_v19 = vmax.f32 %v653_v15, 0.0  ;;  %v564_v20 = vadd.f32 %v563_v16, %v535_v14  ;;  %v518_v16 = vadd.f32 %v1320_v50, %v160_v10 }
  0xd6   :  { %v536_v26 = vpop.f32.mrf.mxu1 }
  0xd7   :  { %v991_v22 = vpack.c.bf16 %v661_v19, %v660_v18  ;;  %v593_v25 = vadd.f32 %v592_v3, %v564_v20  ;;  %v537_v28 = vadd.f32 %v536_v26, %v508_v23  ;;  %v1010_v18 = vld [vmem:[%s1352_s3 + $0x18] sm:$0xff]  }
  0xd8   :  { %v987_v26 = vunpack.c.h.bf16 %v1010_v18 }
  0xd9   :  { %992 = vst [vmem:[%s1353_s4] sm:$0xff] %v991_v22   ;;  %v622_v31 = vadd.f32 %v621_v7, %v593_v25  ;;  %v628_v59 = vpop.f32.mrf.mxu0  ;;  %v602_v8 = vpop.f32.mrf.mxu3  ;;  %v986_v22 = vunpack.c.l.bf16 %v1010_v18 }
  0xdb   :  { %v654_v38 = vadd.f32 %v978_v32, %v622_v31 }
  0xdc   :  { %v565_v30 = vpop.f32.mrf.mxu2 }
  0xdd   :  { %v566_v33 = vadd.f32 %v565_v30, %v537_v28  ;;  %v662_v49 = vmax.f32 %v654_v38, 0.0 }
  0xde   :  { %v539_v40 = vpop.f32.mrf.mxu1 }
  0xdf   :  { %v595_v34 = vadd.f32 %v594_v21, %v566_v33  ;;  %v540_v42 = vadd.f32 %v539_v40, %v511_v36 }
  0xe1   :  { %v624_v39 = vadd.f32 %v623_v24, %v595_v34  ;;  %v631_v14 = vpop.f32.mrf.mxu0  ;;  %v604_v24 = vpop.f32.mrf.mxu3 }
  0xe3   :  { %v655_v43 = vadd.f32 %v979_v35, %v624_v39 }
  0xe4   :  { %v568_v44 = vpop.f32.mrf.mxu2 }
  0xe5   :  { %v663_v51 = vmax.f32 %v655_v43, 0.0  ;;  %v569_v52 = vadd.f32 %v568_v44, %v540_v42 }
  0xe6   :  { %v541_v55 = vpop.f32.mrf.mxu1 }
  0xe7   :  { %v996_v53 = vpack.c.bf16 %v663_v51, %v662_v49  ;;  %v598_v45 = vadd.f32 %v597_v37, %v569_v52  ;;  %v542_v58 = vadd.f32 %v541_v55, %v513_v54 }
  0xe9   :  { %1011 = vst [vmem:[%s1353_s4 + $0x8] sm:$0xff] %v996_v53   ;;  %v627_v62 = vadd.f32 %v626_v41, %v598_v45  ;;  %v633_v27 = vpop.f32.mrf.mxu0 }
  0xeb   :  { %v656_v3 = vadd.f32 %v982_v63, %v627_v62 }
  0xec   :  { %v570_v60 = vpop.f32.mrf.mxu2 }
  0xed   :  { %v571_v0 = vadd.f32 %v570_v60, %v542_v58  ;;  %v664_v11 = vmax.f32 %v656_v3, 0.0 }
  0xee   :  { %v544_v5 = vpop.f32.mrf.mxu1 }
  0xef   :  { %v600_v1 = vadd.f32 %v599_v57, %v571_v0  ;;  %v545_v6 = vadd.f32 %v544_v5, %v516_v2 }
  0xf1   :  { %v629_v4 = vadd.f32 %v628_v59, %v600_v1 }
  0xf3   :  { %v657_v7 = vadd.f32 %v983_v48, %v629_v4 }
  0xf4   :  { %v573_v9 = vpop.f32.mrf.mxu2 }
  0xf5   :  { %v665_v12 = vmax.f32 %v657_v7, 0.0  ;;  %v574_v13 = vadd.f32 %v573_v9, %v545_v6 }
  0xf6   :  { %v546_v17 = vpop.f32.mrf.mxu1 }
  0xf7   :  { %v1001_v15 = vpack.c.bf16 %v665_v12, %v664_v11  ;;  %v603_v46 = vadd.f32 %v602_v8, %v574_v13  ;;  %v547_v19 = vadd.f32 %v546_v17, %v518_v16 }
  0xf9   :  { %1012 = vst [vmem:[%s1353_s4 + $0x10] sm:$0xff] %v1001_v15   ;;  %v632_v21 = vadd.f32 %v631_v14, %v603_v46 }
  0xfb   :  { %v658_v50 = vadd.f32 %v986_v22, %v632_v21 }
  0xfc   :  { %v575_v20 = vpop.f32.mrf.mxu2 }
  0xfd   :  { %v576_v23 = vadd.f32 %v575_v20, %v547_v19  ;;  %v666_v30 = vmax.f32 %v658_v50, 0.0 }
  0xff   :  { %v605_v25 = vadd.f32 %v604_v24, %v576_v23 }
 0x101   :  { %v634_v28 = vadd.f32 %v633_v27, %v605_v25 }
 0x103   :  { %v659_v29 = vadd.f32 %v987_v26, %v634_v28 }
 0x105   :  { %v667_v31 = vmax.f32 %v659_v29, 0.0 }
 0x107   :  { %v1006_v32 = vpack.c.bf16 %v667_v31, %v666_v30 }
 0x109   :  { %1013 = vst [vmem:[%s1353_s4 + $0x18] sm:$0xff] %v1006_v32  }

</bundles_post_ra>
